<compile_context>
chip_gen: v7x
topology: tpu7x:2x2x1
jax: 0.10.0
libtpu: 0.0.40
codegen_flags: <defaults>
</compile_context>

<pallas_src>
import functools
import math

import jax
import jax.numpy as jnp
from jax import lax
from jax.experimental import pallas as pl
from jax.experimental.pallas import tpu as pltpu

LANES = 128


def _round_up(x, m):
    return (x + m - 1) // m * m


def _pad_to(a, shape):
    pads = [(0, t - s) for s, t in zip(a.shape, shape)]
    return jnp.pad(a, pads)


# ---------------------------------------------------------------------------
# Fused Bottleneck kernel: one image (flattened to HW x C) per grid step.
# ---------------------------------------------------------------------------
def _bottleneck_kernel(x_ref, w1_ref, s1_ref, b1_ref, w2_ref, s2_ref, b2_ref,
                       w3_ref, s3_ref, b3_ref, o_ref, h1p_ref, acc_ref,
                       *, H, W, P):
    HW = H * W
    cpm = h1p_ref.shape[-1]
    PB = h1p_ref.shape[0] - P - HW

    # Load the input tile once (bf16, real channel count); reused for conv1
    # and the identity residual.
    x2d = x_ref[0]                                           # (HW, cin) bf16

    # --- conv1 (1x1) + bn1 + ReLU -------------------------------------------
    h1 = jnp.dot(x2d, w1_ref[...], preferred_element_type=jnp.float32)
    h1 = jnp.maximum(h1 * s1_ref[...] + b1_ref[...], 0.0)

    # --- stage h1 into the flat, zero-haloed bf16 scratch ---------------------
    # Rows [0,P) and [P+HW, P+HW+PB) are the top/bottom zero halos; only these
    # small strips are written, the interior is fully overwritten each step.
    h1p_ref[pl.ds(0, P), :] = jnp.zeros((P, cpm), jnp.bfloat16)
    h1p_ref[pl.ds(P + HW, PB), :] = jnp.zeros((PB, cpm), jnp.bfloat16)
    h1p_ref[pl.ds(P, HW), :] = h1.astype(jnp.bfloat16)

    # --- conv2 (3x3, stride 1, pad 1): 9 shifted contiguous slices -----------
    # Tap (dy,dx) of the flat row-major image is the slice starting at
    # P + dy*W + dx; row (dy) halos are covered by the zero strips, column
    # (dx) halos by a per-output-column mask.
    col = lax.broadcasted_iota(jnp.int32, (HW, 1), 0) % W
    ok_left = col >= 1             # output column has a valid left neighbour
    ok_right = col <= W - 2        # ... and a valid right neighbour

    first = True
    for dy in (-1, 0, 1):
        for dx in (-1, 0, 1):
            t = (dy + 1) * 3 + (dx + 1)
            patch = h1p_ref[pl.ds(P + dy * W + dx, HW), :]   # (HW, cpm) bf16
            if dx == -1:
                patch = jnp.where(ok_left, patch, jnp.bfloat16(0))
            elif dx == 1:
                patch = jnp.where(ok_right, patch, jnp.bfloat16(0))
            # TODO(synk): on v6e/v7x taps could be packed pairwise along K
            # (K=256) to fill the 256-wide MXU; kept per-tap since this kernel
            # is ld/st-bound, not MXU-bound, at these sizes.
            contrib = jnp.dot(patch, w2_ref[t],
                              preferred_element_type=jnp.float32)
            if first:
                acc_ref[...] = contrib
                first = False
            else:
                acc_ref[...] += contrib

    h2 = jnp.maximum(acc_ref[...] * s2_ref[...] + b2_ref[...], 0.0)
    h2 = h2.astype(jnp.bfloat16)

    # --- conv3 (1x1) + bn3 + identity residual + ReLU ------------------------
    out = jnp.dot(h2, w3_ref[...], preferred_element_type=jnp.float32)
    out = out * s3_ref[...] + b3_ref[...] + x2d.astype(jnp.float32)
    o_ref[0] = jnp.maximum(out, 0.0).astype(o_ref.dtype)


# ---------------------------------------------------------------------------
# Wrapper: layout plumbing + one pallas_call for the whole block
# ---------------------------------------------------------------------------
def bottleneck_forward(x_nchw, p, stride=1):
    # TODO(synk): stride != 1 / `downsample` branch not implemented (module
    # defaults: stride=1, downsample=None).
    assert stride == 1, "only stride=1 / downsample=None is implemented"

    x = jnp.transpose(x_nchw, (0, 2, 3, 1))                  # NCHW -> NHWC
    N, H, W, cin = x.shape
    cmid = p["w1_hwio"].shape[-1]
    cout = p["w3_hwio"].shape[-1]
    assert cin == cout == 4 * cmid, "identity residual needs in == 4*out chans"

    HW = H * W
    cpm = _round_up(cmid, LANES)            # mid channels padded to lane width
    P = _round_up(W + 1, 16)                # top halo rows (bf16-tile aligned)
    PB = _round_up(W + 1, 16)               # bottom halo rows

    # bf16 weights (mid channels zero-padded to 128 lanes); BN scale/bias stay
    # f32 and are applied on the f32 accumulators in-kernel.
    w1 = _pad_to(p["w1_hwio"].reshape(cin, cmid), (cin, cpm)).astype(jnp.bfloat16)
    w2 = _pad_to(p["w2_hwio"].reshape(9, cmid, cmid),
                 (9, cpm, cpm)).astype(jnp.bfloat16)
    w3 = _pad_to(p["w3_hwio"].reshape(cmid, cout), (cpm, cout)).astype(jnp.bfloat16)
    # NOTE: scale/bias padding MUST be zero so padded h1/h2 lanes stay exactly
    # zero through ReLU and never leak into the real output channels.
    s1 = _pad_to(p["s1"], (1, cpm)).astype(jnp.float32)
    b1 = _pad_to(p["b1"], (1, cpm)).astype(jnp.float32)
    s2 = _pad_to(p["s2"], (1, cpm)).astype(jnp.float32)
    b2 = _pad_to(p["b2"], (1, cpm)).astype(jnp.float32)
    s3 = p["s3"].astype(jnp.float32)
    b3 = p["b3"].astype(jnp.float32)

    # Slim HBM I/O: bf16 input with its real channel count (no 8x lane pad).
    x_flat = x.astype(jnp.bfloat16).reshape(N, HW, cin)

    flops = int(2 * N * HW * cmid * (cin + 9 * cmid + cout))
    bytes_accessed = int(x_flat.size * 2 + N * HW * cout * 4 +
                         (w1.size + w2.size + w3.size) * 2 +
                         (s1.size + b1.size + s2.size + b2.size +
                          s3.size + b3.size) * 4)

    kernel = functools.partial(_bottleneck_kernel, H=H, W=W, P=P)
    out = pl.pallas_call(
        kernel,
        out_shape=jax.ShapeDtypeStruct((N, HW, cout), jnp.float32),
        grid=(N,),
        in_specs=[
            pl.BlockSpec((1, HW, cin), lambda n: (n, 0, 0)),     # x (bf16)
            pl.BlockSpec((cin, cpm), lambda n: (0, 0)),          # w1
            pl.BlockSpec((1, cpm), lambda n: (0, 0)),            # s1
            pl.BlockSpec((1, cpm), lambda n: (0, 0)),            # b1
            pl.BlockSpec((9, cpm, cpm), lambda n: (0, 0, 0)),    # w2 taps
            pl.BlockSpec((1, cpm), lambda n: (0, 0)),            # s2
            pl.BlockSpec((1, cpm), lambda n: (0, 0)),            # b2
            pl.BlockSpec((cpm, cout), lambda n: (0, 0)),         # w3
            pl.BlockSpec((1, cout), lambda n: (0, 0)),           # s3
            pl.BlockSpec((1, cout), lambda n: (0, 0)),           # b3
        ],
        out_specs=pl.BlockSpec((1, HW, cout), lambda n: (n, 0, 0)),
        scratch_shapes=[
            pltpu.VMEM((P + HW + PB, cpm), jnp.bfloat16),   # flat haloed h1
            pltpu.VMEM((HW, cpm), jnp.float32),             # conv2 accumulator
        ],
        compiler_params=pltpu.CompilerParams(
            dimension_semantics=("parallel",),
            # Headroom for real ResNet spatial sizes on v5e (16 MiB default).
            vmem_limit_bytes=32 * 1024 * 1024),
        cost_estimate=pl.CostEstimate(flops=flops, transcendentals=0,
                                      bytes_accessed=bytes_accessed),
        # TODO(synk): add a spatial row-tile grid axis (needs in-kernel halo
        # DMA) so tiny batches still give enough grid steps for pipelining and
        # the v7x 2-TC split; currently pipelining relies on batch >= ~8.
    )(x_flat, w1, s1, b1, w2, s2, b2, w3, s3, b3)

    out = out.reshape(N, H, W, cout)
    return jnp.transpose(out, (0, 3, 1, 2))                  # NHWC -> NCHW


# ---------------------------------------------------------------------------
# Deterministic synthetic parameters (BatchNorm folded, inference mode)
# ---------------------------------------------------------------------------
def _fold_bn(key, c, eps=1e-5):
    k1, k2, k3, k4 = jax.random.split(key, 4)
    gamma = jax.random.uniform(k1, (1, c), jnp.float32, 0.5, 1.5)
    beta = 0.1 * jax.random.normal(k2, (1, c), jnp.float32)
    mean = 0.1 * jax.random.normal(k3, (1, c), jnp.float32)
    var = jax.random.uniform(k4, (1, c), jnp.float32, 0.5, 1.5)
    scale = gamma / jnp.sqrt(var + eps)
    bias = beta - mean * scale
    return scale, bias


def make_params(key, c_in, c_mid):
    # TODO(synk): BatchNorm folded with inference (running-stats) semantics;
    # training-mode batch statistics are not reproduced.
    ks = jax.random.split(key, 6)
    w1_hwio = jax.random.normal(ks[0], (1, 1, c_in, c_mid), jnp.float32) / math.sqrt(c_in)
    w2_hwio = jax.random.normal(ks[1], (3, 3, c_mid, c_mid), jnp.float32) / math.sqrt(9 * c_mid)
    w3_hwio = jax.random.normal(ks[2], (1, 1, c_mid, 4 * c_mid), jnp.float32) / math.sqrt(c_mid)
    s1, b1 = _fold_bn(ks[3], c_mid)
    s2, b2 = _fold_bn(ks[4], c_mid)
    s3, b3 = _fold_bn(ks[5], 4 * c_mid)
    return dict(w1_hwio=w1_hwio, w2_hwio=w2_hwio, w3_hwio=w3_hwio,
                s1=s1, b1=b1, s2=s2, b2=b2, s3=s3, b3=b3)


# ---------------------------------------------------------------------------
# Pure-JAX reference (f32, HIGHEST) for the correctness check
# ---------------------------------------------------------------------------
def ref_bottleneck(x_nchw, p, stride=1):
    dn = ("NHWC", "HWIO", "NHWC")
    x = jnp.transpose(x_nchw, (0, 2, 3, 1)).astype(jnp.float32)
    h = lax.conv_general_dilated(x, p["w1_hwio"], (1, 1), "VALID",
                                 dimension_numbers=dn,
                                 precision=lax.Precision.HIGHEST)
    h = jnp.maximum(h * p["s1"] + p["b1"], 0.0)
    h = lax.conv_general_dilated(h, p["w2_hwio"], (stride, stride),
                                 ((1, 1), (1, 1)), dimension_numbers=dn,
                                 precision=lax.Precision.HIGHEST)
    h = jnp.maximum(h * p["s2"] + p["b2"], 0.0)
    h = lax.conv_general_dilated(h, p["w3_hwio"], (1, 1), "VALID",
                                 dimension_numbers=dn,
                                 precision=lax.Precision.HIGHEST)
    h = h * p["s3"] + p["b3"]
    out = jnp.maximum(h + x, 0.0)
    return jnp.transpose(out, (0, 3, 1, 2))


if __name__ == "__main__":
    # Bottleneck(in_channels=16, out_channels=4, stride=1, downsample=None):
    # identity residual requires in_channels == 4 * out_channels.
    N, C_IN, H, W = 8, 16, 16, 16
    C_MID = 4

    key = jax.random.PRNGKey(0)
    params = make_params(key, C_IN, C_MID)
    x = jax.random.normal(jax.random.fold_in(key, 123), (N, C_IN, H, W),
                          jnp.float32)

    out = bottleneck_forward(x, params, stride=1)
    out = jax.block_until_ready(out)

    ref = ref_bottleneck(x, params, stride=1)
    assert out.shape == (N, 4 * C_MID, H, W), out.shape
    # bf16 MXU operands + bf16 input (f32 accumulation) -> loosened tolerance.
    if not jnp.allclose(out, ref, atol=5e-2, rtol=5e-2):
        raise AssertionError(
            f"mismatch vs reference, max abs diff = {jnp.max(jnp.abs(out - ref))}")
    print("KERNEL_OK")
</pallas_src>

<mosaic_0001>
module attributes {stable_mosaic.version = 11 : i64} {
  func.func @_bottleneck_kernel(%arg0: i32, %arg1: memref<1x256x16xbf16, #tpu.memory_space<vmem>>, %arg2: memref<16x128xbf16, #tpu.memory_space<vmem>>, %arg3: memref<1x128xf32, #tpu.memory_space<vmem>>, %arg4: memref<1x128xf32, #tpu.memory_space<vmem>>, %arg5: memref<9x128x128xbf16, #tpu.memory_space<vmem>>, %arg6: memref<1x128xf32, #tpu.memory_space<vmem>>, %arg7: memref<1x128xf32, #tpu.memory_space<vmem>>, %arg8: memref<128x16xbf16, #tpu.memory_space<vmem>>, %arg9: memref<1x16xf32, #tpu.memory_space<vmem>>, %arg10: memref<1x16xf32, #tpu.memory_space<vmem>>, %arg11: memref<1x256x16xf32, #tpu.memory_space<vmem>>, %arg12: memref<320x128xbf16, #tpu.memory_space<vmem>>, %arg13: memref<256x128xf32, #tpu.memory_space<vmem>>) attributes {dimension_semantics = [#tpu.dimension_semantics<parallel>], iteration_bounds = array<i64: 8>, scalar_prefetch = 0 : i64, scratch_operands = 2 : i64, tpu.core_type = #tpu.core_type<tc>, window_params = [{transform_indices = @transform_0, window_bounds = array<i64: 1, 256, 16>}, {pipeline_mode = #tpu.pipeline_mode<synchronous>, transform_indices = @transform_1, window_bounds = array<i64: 16, 128>}, {pipeline_mode = #tpu.pipeline_mode<synchronous>, transform_indices = @transform_2, window_bounds = array<i64: 1, 128>}, {pipeline_mode = #tpu.pipeline_mode<synchronous>, transform_indices = @transform_3, window_bounds = array<i64: 1, 128>}, {pipeline_mode = #tpu.pipeline_mode<synchronous>, transform_indices = @transform_4, window_bounds = array<i64: 9, 128, 128>}, {pipeline_mode = #tpu.pipeline_mode<synchronous>, transform_indices = @transform_5, window_bounds = array<i64: 1, 128>}, {pipeline_mode = #tpu.pipeline_mode<synchronous>, transform_indices = @transform_6, window_bounds = array<i64: 1, 128>}, {pipeline_mode = #tpu.pipeline_mode<synchronous>, transform_indices = @transform_7, window_bounds = array<i64: 128, 16>}, {pipeline_mode = #tpu.pipeline_mode<synchronous>, transform_indices = @transform_8, window_bounds = array<i64: 1, 16>}, {pipeline_mode = #tpu.pipeline_mode<synchronous>, transform_indices = @transform_9, window_bounds = array<i64: 1, 16>}, {transform_indices = @transform_10, window_bounds = array<i64: 1, 256, 16>}]} {
    %c0 = arith.constant 0 : index
    %c0_0 = arith.constant 0 : index
    %c0_1 = arith.constant 0 : index
    %0 = vector.load %arg1[%c0, %c0_0, %c0_1] : memref<1x256x16xbf16, #tpu.memory_space<vmem>>, vector<1x256x16xbf16>
    %1 = vector.shape_cast %0 : vector<1x256x16xbf16> to vector<256x16xbf16>
    %c0_2 = arith.constant 0 : index
    %c0_3 = arith.constant 0 : index
    %2 = vector.load %arg2[%c0_2, %c0_3] : memref<16x128xbf16, #tpu.memory_space<vmem>>, vector<16x128xbf16>
    %cst = arith.constant dense<0.000000e+00> : vector<256x128xf32>
    %3 = tpu.matmul %1, %2, %cst {dimension_numbers = #tpu.dot_dimension_numbers<[1], [0], [0], [1], [0, 0, 1, 1], [], []>} : vector<256x16xbf16>, vector<16x128xbf16>, vector<256x128xf32> -> vector<256x128xf32>
    %c0_4 = arith.constant 0 : index
    %c0_5 = arith.constant 0 : index
    %4 = vector.load %arg3[%c0_4, %c0_5] : memref<1x128xf32, #tpu.memory_space<vmem>>, vector<1x128xf32>
    %5 = vector.broadcast %4 : vector<1x128xf32> to vector<256x128xf32>
    %6 = arith.mulf %3, %5 : vector<256x128xf32>
    %c0_6 = arith.constant 0 : index
    %c0_7 = arith.constant 0 : index
    %7 = vector.load %arg4[%c0_6, %c0_7] : memref<1x128xf32, #tpu.memory_space<vmem>>, vector<1x128xf32>
    %8 = vector.broadcast %7 : vector<1x128xf32> to vector<256x128xf32>
    %9 = arith.addf %6, %8 : vector<256x128xf32>
    %cst_8 = arith.constant 0.000000e+00 : f32
    %10 = vector.broadcast %cst_8 : f32 to vector<256x128xf32>
    %11 = arith.maximumf %9, %10 : vector<256x128xf32>
    %cst_9 = arith.constant 0.000000e+00 : bf16
    %12 = vector.broadcast %cst_9 : bf16 to vector<32x128xbf16>
    %c0_10 = arith.constant 0 : index
    %c0_11 = arith.constant 0 : index
    %13 = vector.load %arg12[%c0_10, %c0_11] : memref<320x128xbf16, #tpu.memory_space<vmem>>, vector<32x128xbf16>
    tpu.vector_store %arg12[%c0_10, %c0_11], %12 {strides = array<i32>} : memref<320x128xbf16, #tpu.memory_space<vmem>>, vector<32x128xbf16>,
    %cst_12 = arith.constant 0.000000e+00 : bf16
    %14 = vector.broadcast %cst_12 : bf16 to vector<32x128xbf16>
    %c288 = arith.constant 288 : index
    %c0_13 = arith.constant 0 : index
    %15 = vector.load %arg12[%c288, %c0_13] : memref<320x128xbf16, #tpu.memory_space<vmem>>, vector<32x128xbf16>
    tpu.vector_store %arg12[%c288, %c0_13], %14 {strides = array<i32>} : memref<320x128xbf16, #tpu.memory_space<vmem>>, vector<32x128xbf16>,
    %16 = arith.truncf %11 : vector<256x128xf32> to vector<256x128xbf16>
    %c32 = arith.constant 32 : index
    %c0_14 = arith.constant 0 : index
    %17 = vector.load %arg12[%c32, %c0_14] : memref<320x128xbf16, #tpu.memory_space<vmem>>, vector<256x128xbf16>
    tpu.vector_store %arg12[%c32, %c0_14], %16 {strides = array<i32>} : memref<320x128xbf16, #tpu.memory_space<vmem>>, vector<256x128xbf16>,
    %18 = tpu.iota {dimensions = array<i32: 0>} : vector<256x1xi32>
    %c16_i32 = arith.constant 16 : i32
    %c0_i32 = arith.constant 0 : i32
    %19 = arith.cmpi eq, %c16_i32, %c0_i32 : i32
    %c1_i32 = arith.constant 1 : i32
    %20 = arith.select %19, %c1_i32, %c16_i32 : i32
    %21 = vector.broadcast %20 : i32 to vector<256x1xi32>
    %22 = arith.remsi %18, %21 : vector<256x1xi32>
    %c0_i32_15 = arith.constant 0 : i32
    %23 = vector.broadcast %c0_i32_15 : i32 to vector<256x1xi32>
    %24 = arith.cmpi ne, %22, %23 : vector<256x1xi32>
    %c0_i32_16 = arith.constant 0 : i32
    %25 = vector.broadcast %c0_i32_16 : i32 to vector<256x1xi32>
    %26 = arith.cmpi slt, %22, %25 : vector<256x1xi32>
    %c0_i32_17 = arith.constant 0 : i32
    %27 = arith.cmpi slt, %20, %c0_i32_17 : i32
    %28 = vector.broadcast %27 : i1 to vector<256x1xi1>
    %29 = vector.broadcast %28 : vector<256x1xi1> to vector<256x1xi1>
    %30 = arith.xori %26, %29 : vector<256x1xi1>
    %31 = arith.andi %30, %24 : vector<256x1xi1>
    %32 = vector.broadcast %20 : i32 to vector<256x1xi32>
    %33 = arith.addi %22, %32 : vector<256x1xi32>
    %34 = arith.select %31, %33, %22 : vector<256x1xi1>, vector<256x1xi32>
    %c1_i32_18 = arith.constant 1 : i32
    %35 = vector.broadcast %c1_i32_18 : i32 to vector<256x1xi32>
    %36 = arith.cmpi sge, %34, %35 : vector<256x1xi32>
    %c14_i32 = arith.constant 14 : i32
    %37 = vector.broadcast %c14_i32 : i32 to vector<256x1xi32>
    %38 = arith.cmpi sle, %34, %37 : vector<256x1xi32>
    %c15 = arith.constant 15 : index
    %c0_19 = arith.constant 0 : index
    %39 = vector.load %arg12[%c15, %c0_19] : memref<320x128xbf16, #tpu.memory_space<vmem>>, vector<256x128xbf16>
    %cst_20 = arith.constant 0.000000e+00 : bf16
    %40 = vector.shape_cast %36 : vector<256x1xi1> to vector<256x1xi1>
    %41 = vector.broadcast %40 : vector<256x1xi1> to vector<256x128xi1>
    %42 = vector.broadcast %cst_20 : bf16 to vector<256x128xbf16>
    %43 = arith.select %41, %39, %42 : vector<256x128xi1>, vector<256x128xbf16>
    %c0_21 = arith.constant 0 : index
    %c0_22 = arith.constant 0 : index
    %c0_23 = arith.constant 0 : index
    %44 = vector.load %arg5[%c0_21, %c0_22, %c0_23] : memref<9x128x128xbf16, #tpu.memory_space<vmem>>, vector<1x128x128xbf16>
    %45 = vector.shape_cast %44 : vector<1x128x128xbf16> to vector<128x128xbf16>
    %cst_24 = arith.constant dense<0.000000e+00> : vector<256x128xf32>
    %46 = tpu.matmul %43, %45, %cst_24 {dimension_numbers = #tpu.dot_dimension_numbers<[1], [0], [0], [1], [0, 0, 1, 1], [], []>} : vector<256x128xbf16>, vector<128x128xbf16>, vector<256x128xf32> -> vector<256x128xf32>
    %c0_25 = arith.constant 0 : index
    %c0_26 = arith.constant 0 : index
    %47 = vector.load %arg13[%c0_25, %c0_26] : memref<256x128xf32, #tpu.memory_space<vmem>>, vector<256x128xf32>
    tpu.vector_store %arg13[%c0_25, %c0_26], %46 {strides = array<i32>} : memref<256x128xf32, #tpu.memory_space<vmem>>, vector<256x128xf32>,
    %c16 = arith.constant 16 : index
    %c0_27 = arith.constant 0 : index
    %48 = vector.load %arg12[%c16, %c0_27] : memref<320x128xbf16, #tpu.memory_space<vmem>>, vector<256x128xbf16>
    %c1 = arith.constant 1 : index
    %c0_28 = arith.constant 0 : index
    %c0_29 = arith.constant 0 : index
    %49 = vector.load %arg5[%c1, %c0_28, %c0_29] : memref<9x128x128xbf16, #tpu.memory_space<vmem>>, vector<1x128x128xbf16>
    %50 = vector.shape_cast %49 : vector<1x128x128xbf16> to vector<128x128xbf16>
    %cst_30 = arith.constant dense<0.000000e+00> : vector<256x128xf32>
    %51 = tpu.matmul %48, %50, %cst_30 {dimension_numbers = #tpu.dot_dimension_numbers<[1], [0], [0], [1], [0, 0, 1, 1], [], []>} : vector<256x128xbf16>, vector<128x128xbf16>, vector<256x128xf32> -> vector<256x128xf32>
    %c0_31 = arith.constant 0 : index
    %c0_32 = arith.constant 0 : index
    %52 = vector.load %arg13[%c0_31, %c0_32] : memref<256x128xf32, #tpu.memory_space<vmem>>, vector<256x128xf32>
    %53 = arith.addf %52, %51 : vector<256x128xf32>
    %c0_33 = arith.constant 0 : index
    %c0_34 = arith.constant 0 : index
    %54 = vector.load %arg13[%c0_33, %c0_34] : memref<256x128xf32, #tpu.memory_space<vmem>>, vector<256x128xf32>
    tpu.vector_store %arg13[%c0_33, %c0_34], %53 {strides = array<i32>} : memref<256x128xf32, #tpu.memory_space<vmem>>, vector<256x128xf32>,
    %c17 = arith.constant 17 : index
    %c0_35 = arith.constant 0 : index
    %55 = vector.load %arg12[%c17, %c0_35] : memref<320x128xbf16, #tpu.memory_space<vmem>>, vector<256x128xbf16>
    %cst_36 = arith.constant 0.000000e+00 : bf16
    %56 = vector.shape_cast %38 : vector<256x1xi1> to vector<256x1xi1>
    %57 = vector.broadcast %56 : vector<256x1xi1> to vector<256x128xi1>
    %58 = vector.broadcast %cst_36 : bf16 to vector<256x128xbf16>
    %59 = arith.select %57, %55, %58 : vector<256x128xi1>, vector<256x128xbf16>
    %c2 = arith.constant 2 : index
    %c0_37 = arith.constant 0 : index
    %c0_38 = arith.constant 0 : index
    %60 = vector.load %arg5[%c2, %c0_37, %c0_38] : memref<9x128x128xbf16, #tpu.memory_space<vmem>>, vector<1x128x128xbf16>
    %61 = vector.shape_cast %60 : vector<1x128x128xbf16> to vector<128x128xbf16>
    %cst_39 = arith.constant dense<0.000000e+00> : vector<256x128xf32>
    %62 = tpu.matmul %59, %61, %cst_39 {dimension_numbers = #tpu.dot_dimension_numbers<[1], [0], [0], [1], [0, 0, 1, 1], [], []>} : vector<256x128xbf16>, vector<128x128xbf16>, vector<256x128xf32> -> vector<256x128xf32>
    %c0_40 = arith.constant 0 : index
    %c0_41 = arith.constant 0 : index
    %63 = vector.load %arg13[%c0_40, %c0_41] : memref<256x128xf32, #tpu.memory_space<vmem>>, vector<256x128xf32>
    %64 = arith.addf %63, %62 : vector<256x128xf32>
    %c0_42 = arith.constant 0 : index
    %c0_43 = arith.constant 0 : index
    %65 = vector.load %arg13[%c0_42, %c0_43] : memref<256x128xf32, #tpu.memory_space<vmem>>, vector<256x128xf32>
    tpu.vector_store %arg13[%c0_42, %c0_43], %64 {strides = array<i32>} : memref<256x128xf32, #tpu.memory_space<vmem>>, vector<256x128xf32>,
    %c31 = arith.constant 31 : index
    %c0_44 = arith.constant 0 : index
    %66 = vector.load %arg12[%c31, %c0_44] : memref<320x128xbf16, #tpu.memory_space<vmem>>, vector<256x128xbf16>
    %cst_45 = arith.constant 0.000000e+00 : bf16
    %67 = vector.shape_cast %36 : vector<256x1xi1> to vector<256x1xi1>
    %68 = vector.broadcast %67 : vector<256x1xi1> to vector<256x128xi1>
    %69 = vector.broadcast %cst_45 : bf16 to vector<256x128xbf16>
    %70 = arith.select %68, %66, %69 : vector<256x128xi1>, vector<256x128xbf16>
    %c3 = arith.constant 3 : index
    %c0_46 = arith.constant 0 : index
    %c0_47 = arith.constant 0 : index
    %71 = vector.load %arg5[%c3, %c0_46, %c0_47] : memref<9x128x128xbf16, #tpu.memory_space<vmem>>, vector<1x128x128xbf16>
    %72 = vector.shape_cast %71 : vector<1x128x128xbf16> to vector<128x128xbf16>
    %cst_48 = arith.constant dense<0.000000e+00> : vector<256x128xf32>
    %73 = tpu.matmul %70, %72, %cst_48 {dimension_numbers = #tpu.dot_dimension_numbers<[1], [0], [0], [1], [0, 0, 1, 1], [], []>} : vector<256x128xbf16>, vector<128x128xbf16>, vector<256x128xf32> -> vector<256x128xf32>
    %c0_49 = arith.constant 0 : index
    %c0_50 = arith.constant 0 : index
    %74 = vector.load %arg13[%c0_49, %c0_50] : memref<256x128xf32, #tpu.memory_space<vmem>>, vector<256x128xf32>
    %75 = arith.addf %74, %73 : vector<256x128xf32>
    %c0_51 = arith.constant 0 : index
    %c0_52 = arith.constant 0 : index
    %76 = vector.load %arg13[%c0_51, %c0_52] : memref<256x128xf32, #tpu.memory_space<vmem>>, vector<256x128xf32>
    tpu.vector_store %arg13[%c0_51, %c0_52], %75 {strides = array<i32>} : memref<256x128xf32, #tpu.memory_space<vmem>>, vector<256x128xf32>,
    %c32_53 = arith.constant 32 : index
    %c0_54 = arith.constant 0 : index
    %77 = vector.load %arg12[%c32_53, %c0_54] : memref<320x128xbf16, #tpu.memory_space<vmem>>, vector<256x128xbf16>
    %c4 = arith.constant 4 : index
    %c0_55 = arith.constant 0 : index
    %c0_56 = arith.constant 0 : index
    %78 = vector.load %arg5[%c4, %c0_55, %c0_56] : memref<9x128x128xbf16, #tpu.memory_space<vmem>>, vector<1x128x128xbf16>
    %79 = vector.shape_cast %78 : vector<1x128x128xbf16> to vector<128x128xbf16>
    %cst_57 = arith.constant dense<0.000000e+00> : vector<256x128xf32>
    %80 = tpu.matmul %77, %79, %cst_57 {dimension_numbers = #tpu.dot_dimension_numbers<[1], [0], [0], [1], [0, 0, 1, 1], [], []>} : vector<256x128xbf16>, vector<128x128xbf16>, vector<256x128xf32> -> vector<256x128xf32>
    %c0_58 = arith.constant 0 : index
    %c0_59 = arith.constant 0 : index
    %81 = vector.load %arg13[%c0_58, %c0_59] : memref<256x128xf32, #tpu.memory_space<vmem>>, vector<256x128xf32>
    %82 = arith.addf %81, %80 : vector<256x128xf32>
    %c0_60 = arith.constant 0 : index
    %c0_61 = arith.constant 0 : index
    %83 = vector.load %arg13[%c0_60, %c0_61] : memref<256x128xf32, #tpu.memory_space<vmem>>, vector<256x128xf32>
    tpu.vector_store %arg13[%c0_60, %c0_61], %82 {strides = array<i32>} : memref<256x128xf32, #tpu.memory_space<vmem>>, vector<256x128xf32>,
    %c33 = arith.constant 33 : index
    %c0_62 = arith.constant 0 : index
    %84 = vector.load %arg12[%c33, %c0_62] : memref<320x128xbf16, #tpu.memory_space<vmem>>, vector<256x128xbf16>
    %cst_63 = arith.constant 0.000000e+00 : bf16
    %85 = vector.shape_cast %38 : vector<256x1xi1> to vector<256x1xi1>
    %86 = vector.broadcast %85 : vector<256x1xi1> to vector<256x128xi1>
    %87 = vector.broadcast %cst_63 : bf16 to vector<256x128xbf16>
    %88 = arith.select %86, %84, %87 : vector<256x128xi1>, vector<256x128xbf16>
    %c5 = arith.constant 5 : index
    %c0_64 = arith.constant 0 : index
    %c0_65 = arith.constant 0 : index
    %89 = vector.load %arg5[%c5, %c0_64, %c0_65] : memref<9x128x128xbf16, #tpu.memory_space<vmem>>, vector<1x128x128xbf16>
    %90 = vector.shape_cast %89 : vector<1x128x128xbf16> to vector<128x128xbf16>
    %cst_66 = arith.constant dense<0.000000e+00> : vector<256x128xf32>
    %91 = tpu.matmul %88, %90, %cst_66 {dimension_numbers = #tpu.dot_dimension_numbers<[1], [0], [0], [1], [0, 0, 1, 1], [], []>} : vector<256x128xbf16>, vector<128x128xbf16>, vector<256x128xf32> -> vector<256x128xf32>
    %c0_67 = arith.constant 0 : index
    %c0_68 = arith.constant 0 : index
    %92 = vector.load %arg13[%c0_67, %c0_68] : memref<256x128xf32, #tpu.memory_space<vmem>>, vector<256x128xf32>
    %93 = arith.addf %92, %91 : vector<256x128xf32>
    %c0_69 = arith.constant 0 : index
    %c0_70 = arith.constant 0 : index
    %94 = vector.load %arg13[%c0_69, %c0_70] : memref<256x128xf32, #tpu.memory_space<vmem>>, vector<256x128xf32>
    tpu.vector_store %arg13[%c0_69, %c0_70], %93 {strides = array<i32>} : memref<256x128xf32, #tpu.memory_space<vmem>>, vector<256x128xf32>,
    %c47 = arith.constant 47 : index
    %c0_71 = arith.constant 0 : index
    %95 = vector.load %arg12[%c47, %c0_71] : memref<320x128xbf16, #tpu.memory_space<vmem>>, vector<256x128xbf16>
    %cst_72 = arith.constant 0.000000e+00 : bf16
    %96 = vector.shape_cast %36 : vector<256x1xi1> to vector<256x1xi1>
    %97 = vector.broadcast %96 : vector<256x1xi1> to vector<256x128xi1>
    %98 = vector.broadcast %cst_72 : bf16 to vector<256x128xbf16>
    %99 = arith.select %97, %95, %98 : vector<256x128xi1>, vector<256x128xbf16>
    %c6 = arith.constant 6 : index
    %c0_73 = arith.constant 0 : index
    %c0_74 = arith.constant 0 : index
    %100 = vector.load %arg5[%c6, %c0_73, %c0_74] : memref<9x128x128xbf16, #tpu.memory_space<vmem>>, vector<1x128x128xbf16>
    %101 = vector.shape_cast %100 : vector<1x128x128xbf16> to vector<128x128xbf16>
    %cst_75 = arith.constant dense<0.000000e+00> : vector<256x128xf32>
    %102 = tpu.matmul %99, %101, %cst_75 {dimension_numbers = #tpu.dot_dimension_numbers<[1], [0], [0], [1], [0, 0, 1, 1], [], []>} : vector<256x128xbf16>, vector<128x128xbf16>, vector<256x128xf32> -> vector<256x128xf32>
    %c0_76 = arith.constant 0 : index
    %c0_77 = arith.constant 0 : index
    %103 = vector.load %arg13[%c0_76, %c0_77] : memref<256x128xf32, #tpu.memory_space<vmem>>, vector<256x128xf32>
    %104 = arith.addf %103, %102 : vector<256x128xf32>
    %c0_78 = arith.constant 0 : index
    %c0_79 = arith.constant 0 : index
    %105 = vector.load %arg13[%c0_78, %c0_79] : memref<256x128xf32, #tpu.memory_space<vmem>>, vector<256x128xf32>
    tpu.vector_store %arg13[%c0_78, %c0_79], %104 {strides = array<i32>} : memref<256x128xf32, #tpu.memory_space<vmem>>, vector<256x128xf32>,
    %c48 = arith.constant 48 : index
    %c0_80 = arith.constant 0 : index
    %106 = vector.load %arg12[%c48, %c0_80] : memref<320x128xbf16, #tpu.memory_space<vmem>>, vector<256x128xbf16>
    %c7 = arith.constant 7 : index
    %c0_81 = arith.constant 0 : index
    %c0_82 = arith.constant 0 : index
    %107 = vector.load %arg5[%c7, %c0_81, %c0_82] : memref<9x128x128xbf16, #tpu.memory_space<vmem>>, vector<1x128x128xbf16>
    %108 = vector.shape_cast %107 : vector<1x128x128xbf16> to vector<128x128xbf16>
    %cst_83 = arith.constant dense<0.000000e+00> : vector<256x128xf32>
    %109 = tpu.matmul %106, %108, %cst_83 {dimension_numbers = #tpu.dot_dimension_numbers<[1], [0], [0], [1], [0, 0, 1, 1], [], []>} : vector<256x128xbf16>, vector<128x128xbf16>, vector<256x128xf32> -> vector<256x128xf32>
    %c0_84 = arith.constant 0 : index
    %c0_85 = arith.constant 0 : index
    %110 = vector.load %arg13[%c0_84, %c0_85] : memref<256x128xf32, #tpu.memory_space<vmem>>, vector<256x128xf32>
    %111 = arith.addf %110, %109 : vector<256x128xf32>
    %c0_86 = arith.constant 0 : index
    %c0_87 = arith.constant 0 : index
    %112 = vector.load %arg13[%c0_86, %c0_87] : memref<256x128xf32, #tpu.memory_space<vmem>>, vector<256x128xf32>
    tpu.vector_store %arg13[%c0_86, %c0_87], %111 {strides = array<i32>} : memref<256x128xf32, #tpu.memory_space<vmem>>, vector<256x128xf32>,
    %c49 = arith.constant 49 : index
    %c0_88 = arith.constant 0 : index
    %113 = vector.load %arg12[%c49, %c0_88] : memref<320x128xbf16, #tpu.memory_space<vmem>>, vector<256x128xbf16>
    %cst_89 = arith.constant 0.000000e+00 : bf16
    %114 = vector.shape_cast %38 : vector<256x1xi1> to vector<256x1xi1>
    %115 = vector.broadcast %114 : vector<256x1xi1> to vector<256x128xi1>
    %116 = vector.broadcast %cst_89 : bf16 to vector<256x128xbf16>
    %117 = arith.select %115, %113, %116 : vector<256x128xi1>, vector<256x128xbf16>
    %c8 = arith.constant 8 : index
    %c0_90 = arith.constant 0 : index
    %c0_91 = arith.constant 0 : index
    %118 = vector.load %arg5[%c8, %c0_90, %c0_91] : memref<9x128x128xbf16, #tpu.memory_space<vmem>>, vector<1x128x128xbf16>
    %119 = vector.shape_cast %118 : vector<1x128x128xbf16> to vector<128x128xbf16>
    %cst_92 = arith.constant dense<0.000000e+00> : vector<256x128xf32>
    %120 = tpu.matmul %117, %119, %cst_92 {dimension_numbers = #tpu.dot_dimension_numbers<[1], [0], [0], [1], [0, 0, 1, 1], [], []>} : vector<256x128xbf16>, vector<128x128xbf16>, vector<256x128xf32> -> vector<256x128xf32>
    %c0_93 = arith.constant 0 : index
    %c0_94 = arith.constant 0 : index
    %121 = vector.load %arg13[%c0_93, %c0_94] : memref<256x128xf32, #tpu.memory_space<vmem>>, vector<256x128xf32>
    %122 = arith.addf %121, %120 : vector<256x128xf32>
    %c0_95 = arith.constant 0 : index
    %c0_96 = arith.constant 0 : index
    %123 = vector.load %arg13[%c0_95, %c0_96] : memref<256x128xf32, #tpu.memory_space<vmem>>, vector<256x128xf32>
    tpu.vector_store %arg13[%c0_95, %c0_96], %122 {strides = array<i32>} : memref<256x128xf32, #tpu.memory_space<vmem>>, vector<256x128xf32>,
    %c0_97 = arith.constant 0 : index
    %c0_98 = arith.constant 0 : index
    %124 = vector.load %arg13[%c0_97, %c0_98] : memref<256x128xf32, #tpu.memory_space<vmem>>, vector<256x128xf32>
    %c0_99 = arith.constant 0 : index
    %c0_100 = arith.constant 0 : index
    %125 = vector.load %arg6[%c0_99, %c0_100] : memref<1x128xf32, #tpu.memory_space<vmem>>, vector<1x128xf32>
    %126 = vector.broadcast %125 : vector<1x128xf32> to vector<256x128xf32>
    %127 = arith.mulf %124, %126 : vector<256x128xf32>
    %c0_101 = arith.constant 0 : index
    %c0_102 = arith.constant 0 : index
    %128 = vector.load %arg7[%c0_101, %c0_102] : memref<1x128xf32, #tpu.memory_space<vmem>>, vector<1x128xf32>
    %129 = vector.broadcast %128 : vector<1x128xf32> to vector<256x128xf32>
    %130 = arith.addf %127, %129 : vector<256x128xf32>
    %cst_103 = arith.constant 0.000000e+00 : f32
    %131 = vector.broadcast %cst_103 : f32 to vector<256x128xf32>
    %132 = arith.maximumf %130, %131 : vector<256x128xf32>
    %133 = arith.truncf %132 : vector<256x128xf32> to vector<256x128xbf16>
    %c0_104 = arith.constant 0 : index
    %c0_105 = arith.constant 0 : index
    %134 = vector.load %arg8[%c0_104, %c0_105] : memref<128x16xbf16, #tpu.memory_space<vmem>>, vector<128x16xbf16>
    %cst_106 = arith.constant dense<0.000000e+00> : vector<256x16xf32>
    %135 = tpu.matmul %133, %134, %cst_106 {dimension_numbers = #tpu.dot_dimension_numbers<[1], [0], [0], [1], [0, 0, 1, 1], [], []>} : vector<256x128xbf16>, vector<128x16xbf16>, vector<256x16xf32> -> vector<256x16xf32>
    %c0_107 = arith.constant 0 : index
    %c0_108 = arith.constant 0 : index
    %136 = vector.load %arg9[%c0_107, %c0_108] : memref<1x16xf32, #tpu.memory_space<vmem>>, vector<1x16xf32>
    %137 = vector.broadcast %136 : vector<1x16xf32> to vector<256x16xf32>
    %138 = arith.mulf %135, %137 : vector<256x16xf32>
    %c0_109 = arith.constant 0 : index
    %c0_110 = arith.constant 0 : index
    %139 = vector.load %arg10[%c0_109, %c0_110] : memref<1x16xf32, #tpu.memory_space<vmem>>, vector<1x16xf32>
    %140 = vector.broadcast %139 : vector<1x16xf32> to vector<256x16xf32>
    %141 = arith.addf %138, %140 : vector<256x16xf32>
    %142 = arith.extf %1 : vector<256x16xbf16> to vector<256x16xf32>
    %143 = arith.addf %141, %142 : vector<256x16xf32>
    %cst_111 = arith.constant 0.000000e+00 : f32
    %144 = vector.broadcast %cst_111 : f32 to vector<256x16xf32>
    %145 = arith.maximumf %143, %144 : vector<256x16xf32>
    %c0_112 = arith.constant 0 : index
    %c0_113 = arith.constant 0 : index
    %c0_114 = arith.constant 0 : index
    %146 = vector.load %arg11[%c0_112, %c0_113, %c0_114] : memref<1x256x16xf32, #tpu.memory_space<vmem>>, vector<1x256x16xf32>
    %147 = vector.shape_cast %146 : vector<1x256x16xf32> to vector<256x16xf32>
    %148 = vector.shape_cast %145 : vector<256x16xf32> to vector<1x256x16xf32>
    tpu.vector_store %arg11[%c0_112, %c0_113, %c0_114], %148 {strides = array<i32>} : memref<1x256x16xf32, #tpu.memory_space<vmem>>, vector<1x256x16xf32>,
    return
  }
  func.func @transform_0(%arg0: i32) -> (i32, i32, i32) {
    %c0_i32 = arith.constant 0 : i32
    %c0_i32_0 = arith.constant 0 : i32
    %c0_i32_1 = arith.constant 0 : i32
    return %arg0, %c0_i32, %c0_i32_0 : i32, i32, i32
  }
  func.func @transform_1(%arg0: i32) -> (i32, i32) {
    %c0_i32 = arith.constant 0 : i32
    %c0_i32_0 = arith.constant 0 : i32
    %c0_i32_1 = arith.constant 0 : i32
    return %c0_i32, %c0_i32_0 : i32, i32
  }
  func.func @transform_2(%arg0: i32) -> (i32, i32) {
    %c0_i32 = arith.constant 0 : i32
    %c0_i32_0 = arith.constant 0 : i32
    %c0_i32_1 = arith.constant 0 : i32
    return %c0_i32, %c0_i32_0 : i32, i32
  }
  func.func @transform_3(%arg0: i32) -> (i32, i32) {
    %c0_i32 = arith.constant 0 : i32
    %c0_i32_0 = arith.constant 0 : i32
    %c0_i32_1 = arith.constant 0 : i32
    return %c0_i32, %c0_i32_0 : i32, i32
  }
  func.func @transform_4(%arg0: i32) -> (i32, i32, i32) {
    %c0_i32 = arith.constant 0 : i32
    %c0_i32_0 = arith.constant 0 : i32
    %c0_i32_1 = arith.constant 0 : i32
    %c0_i32_2 = arith.constant 0 : i32
    return %c0_i32, %c0_i32_0, %c0_i32_1 : i32, i32, i32
  }
  func.func @transform_5(%arg0: i32) -> (i32, i32) {
    %c0_i32 = arith.constant 0 : i32
    %c0_i32_0 = arith.constant 0 : i32
    %c0_i32_1 = arith.constant 0 : i32
    return %c0_i32, %c0_i32_0 : i32, i32
  }
  func.func @transform_6(%arg0: i32) -> (i32, i32) {
    %c0_i32 = arith.constant 0 : i32
    %c0_i32_0 = arith.constant 0 : i32
    %c0_i32_1 = arith.constant 0 : i32
    return %c0_i32, %c0_i32_0 : i32, i32
  }
  func.func @transform_7(%arg0: i32) -> (i32, i32) {
    %c0_i32 = arith.constant 0 : i32
    %c0_i32_0 = arith.constant 0 : i32
    %c0_i32_1 = arith.constant 0 : i32
    return %c0_i32, %c0_i32_0 : i32, i32
  }
  func.func @transform_8(%arg0: i32) -> (i32, i32) {
    %c0_i32 = arith.constant 0 : i32
    %c0_i32_0 = arith.constant 0 : i32
    %c0_i32_1 = arith.constant 0 : i32
    return %c0_i32, %c0_i32_0 : i32, i32
  }
  func.func @transform_9(%arg0: i32) -> (i32, i32) {
    %c0_i32 = arith.constant 0 : i32
    %c0_i32_0 = arith.constant 0 : i32
    %c0_i32_1 = arith.constant 0 : i32
    return %c0_i32, %c0_i32_0 : i32, i32
  }
  func.func @transform_10(%arg0: i32) -> (i32, i32, i32) {
    %c0_i32 = arith.constant 0 : i32
    %c0_i32_0 = arith.constant 0 : i32
    %c0_i32_1 = arith.constant 0 : i32
    return %arg0, %c0_i32, %c0_i32_0 : i32, i32, i32
  }
}

</mosaic_0001>

<bundles_post_ra>
// kernel: tpu_custom_call.1
= control target key start
LH: loop header
LB: loop body
LE: loop exit
PB: predicated region body
PF: predicated region fallthrough
CT: control target
= control target key end

     0   :  { %s8128_s13 = smov 0   ;;  %s10240_s0 = inlined_call_operand.vmem [shape: bf16[8,256,16], index: 0, kind: input, shape index: {}]   ;;  %s10241_s1 = inlined_call_operand.vmem [shape: bf16[16,128], index: 1, kind: input, shape index: {}]   ;;  %s10242_s2 = inlined_call_operand.vmem [shape: f32[1,128], index: 2, kind: input, shape index: {}]   ;;  %s10243_s3 = inlined_call_operand.vmem [shape: f32[1,128], index: 3, kind: input, shape index: {}]   ;;  %s10244_s4 = inlined_call_operand.vmem [shape: bf16[9,128,128], index: 4, kind: input, shape index: {}]   ;;  %s10245_s5 = inlined_call_operand.vmem [shape: f32[1,128], index: 5, kind: input, shape index: {}]   ;;  %s10246_s6 = inlined_call_operand.vmem [shape: f32[1,128], index: 6, kind: input, shape index: {}]   ;;  %s10247_s7 = inlined_call_operand.vmem [shape: bf16[128,16], index: 7, kind: input, shape index: {}]   ;;  %s10248_s8 = inlined_call_operand.vmem [shape: f32[1,16], index: 8, kind: input, shape index: {}]   ;;  %s10249_s9 = inlined_call_operand.vmem [shape: f32[1,16], index: 9, kind: input, shape index: {}]   ;;  %s10250_s10 = inlined_call_operand.vmem [shape: f32[8,256,16], index: 10, kind: output, shape index: {}]  }
   0x1 LB: > { %s6579_s14 = sadd.s32 4294967295, %s8069_s13   ;;  %p6583_p0 = scmp.ge.s32.totalorder %s8069_s13, 1  ;;  %s8069_s13 = sphi %s8128_s13, %s20_s13  }
   0x2   : > { %p312_p1 = scmp.lt.s32.totalorder %s8069_s13, 9 }
   0x4   : > { %p313_p2 = pnand %p6583_p0, %p312_p1 }
   0x6   : > { %316 = sbr.rel (%p313_p2) target bundleno = 1054 (0x41e), region = 60 }
   0xd   : > { %v7924_v0 = vld [vmem:[%s10241_s1] sm:$0xff]   ;;  %p350_p3 = scmp.lt.s32.totalorder %s6579_s14, 7  ;;  %vm10251_vm0 = vcmask 130048   ;;  %v7943_v19 = vld [vmem:[%s10244_s4 + $0x8] sm:$0xff]   ;;  %v839_v20 = vlaneseq  ;;  %v7945_v23 = vld [vmem:[%s10244_s4 + $0x10] sm:$0xff]   ;;  %v8071_v31 = vmov 0  }
   0xe   : > { %v7941_v1 = vld [vmem:[%s10244_s4] sm:$0xff]   ;;  %7128 = vmatprep.subr.bf16.mxu0 %v7924_v0  ;;  %v7944_v21 = vld [vmem:[%s10244_s4 + $0xc8] sm:$0xff]   ;;  %v7946_v25 = vld [vmem:[%s10244_s4 + $0xd0] sm:$0xff]   ;;  %803 = vst [vmem:[#allocation2] sm:$0xff] %v8071_v31  ;;  %vm8072_vm4 = vmmov 1   ;;  %v8262_v57 = vrot.slane %v8071_v31, 7 }
   0xf   : > { %s10452_s14 = smov (!%p350_p3, %s6579_s14), 7  ;;  %v7942_v2 = vld [vmem:[%s10244_s4 + $0xc0] sm:$0xff]   ;;  %7129 = vmatpush3.bf16.msra.mxu0 %v7924_v0  ;;  %v8191_v22 = vshrl.u32 %v839_v20, 7  ;;  %v7947_v28 = vld [vmem:[%s10244_s4 + $0x18] sm:$0xff]   ;;  %804 = vst [vmem:[#allocation2 + $0x8] sm:$0xff] %v8071_v31  ;;  %vm1402_vm5 = vmpackc.low %vm8072_vm4, %vm8072_vm4 }
  0x10   : > { %s6869_s21 = sshll.u32 %s10452_s14, 7  ;;  %7162 = vmatprep.subr.bf16.mxu0 %v7941_v1  ;;  %7306 = vmatprep.subr.bf16.mxu1 %v7942_v2  ;;  %v7948_v30 = vld [vmem:[%s10244_s4 + $0xd8] sm:$0xff]   ;;  %805 = vst [vmem:[#allocation2 + $0x90] sm:$0xff] %v8071_v31  ;;  %806 = vst [vmem:[#allocation2 + $0x98] sm:$0xff] %v8071_v31  ;;  %v8220_v33 = vsel %vm1402_vm5, 65537, %v8071_v31  ;;  %v7949_v34 = vld [vmem:[%s10244_s4 + $0x20] sm:$0xff]  }
  0x11   : > { %s8151_s24 = scalar_lea.vmem %s10240_s0, %s6869_s21  ;;  %7307 = vmatpush3.bf16.msra.mxu1 %v7942_v2  ;;  %v842_v24 = vadd.s32 16, %v8191_v22  ;;  %v876_v26 = vand.u32 15, %v8191_v22  ;;  %v7950_v37 = vld [vmem:[%s10244_s4 + $0xe0] sm:$0xff]   ;;  %v7951_v43 = vld [vmem:[%s10244_s4 + $0x28] sm:$0xff]   ;;  %vm1513_vm7 = vsmask.f32 7424 }
  0x12   : > { %v363_v3 = vld [vmem:[%s8151_s24] sm:$0xff]   ;;  %v365_v4 = vld [vmem:[%s8151_s24 + $0x8] sm:$0xff]   ;;  %v367_v5 = vld [vmem:[%s8151_s24 + $0x10] sm:$0xff]   ;;  %7308 = vmatprep.subr.bf16.mxu1 %v7944_v21  ;;  %vm1691_vm10 = vsmask.f32 256  ;;  %v844_v62 = vadd.s32 32, %v8191_v22 }
  0x13   : > { %7130 = vmatprep.mubr.msk.bf16.mxu0 %vm10251_vm0, %v363_v3  ;;  %v369_v6 = vld [vmem:[%s8151_s24 + $0x18] sm:$0xff]   ;;  %v371_v7 = vld [vmem:[%s8151_s24 + $0x20] sm:$0xff]   ;;  %v373_v8 = vld [vmem:[%s8151_s24 + $0x28] sm:$0xff]   ;;  %v890_v27 = vand.u32 15, %v842_v24  ;;  %vm1256_vm1 = vcmp.ge.s32.totalorder %v876_v26, 1  ;;  %v846_v0 = vadd.s32 48, %v8191_v22 }
  0x14   : > { %7131 = vmatmul.mubr.msk.bf16.vlgmr.msra.gmra.mrb[0].mxu0 %vm10251_vm0, %v365_v4  ;;  %v375_v9 = vld [vmem:[%s8151_s24 + $0x30] sm:$0xff]   ;;  %v377_v10 = vld [vmem:[%s8151_s24 + $0x38] sm:$0xff]   ;;  %v379_v11 = vld [vmem:[%s8151_s24 + $0x40] sm:$0xff]   ;;  %v904_v63 = vand.u32 15, %v844_v62  ;;  %v848_v2 = vadd.s32 64, %v8191_v22  ;;  %v852_v3 = vadd.s32 96, %v8191_v22 }
  0x15   : > { %7134 = vmatprep.mubr.msk.bf16.mxu0 %vm10251_vm0, %v367_v5  ;;  %7163 = vmatpush3.bf16.msra.mxu0 %v7941_v1  ;;  %v381_v12 = vld [vmem:[%s8151_s24 + $0x48] sm:$0xff]   ;;  %v383_v13 = vld [vmem:[%s8151_s24 + $0x50] sm:$0xff]   ;;  %v385_v14 = vld [vmem:[%s8151_s24 + $0x58] sm:$0xff]   ;;  %vm8204_vm2 = vcmp.ge.s32.totalorder %v890_v27, 1  ;;  %v918_v1 = vand.u32 15, %v846_v0  ;;  %v860_v20 = vadd.s32 160, %v8191_v22 }
  0x16   : > { %v387_v15 = vld [vmem:[%s8151_s24 + $0x60] sm:$0xff]   ;;  %v389_v16 = vld [vmem:[%s8151_s24 + $0x68] sm:$0xff]   ;;  %v391_v17 = vld [vmem:[%s8151_s24 + $0x70] sm:$0xff]   ;;  %7164 = vmatprep.subr.bf16.mxu0 %v7943_v19  ;;  %7309 = vmatpush3.bf16.msra.mxu1 %v7944_v21  ;;  %vm1260_vm11 = vcmp.ge.s32.totalorder %v904_v63, 1  ;;  %v932_v5 = vand.u32 15, %v848_v2  ;;  %v862_v24 = vadd.s32 176, %v8191_v22 }
  0x17   : > { %v393_v18 = vld [vmem:[%s8151_s24 + $0x78] sm:$0xff]   ;;  %7310 = vmatprep.subr.bf16.mxu1 %v7946_v25  ;;  %vm1401_vm3 = vmpackc.low %vm1256_vm1, %vm1256_vm1  ;;  %v7952_v45 = vld [vmem:[%s10244_s4 + $0xe8] sm:$0xff]   ;;  %vm1262_vm13 = vcmp.ge.s32.totalorder %v918_v1, 1  ;;  %s6870_s25 = sshll.u32 %s10452_s14, 8 }
  0x18   : > { %v1433_v32 = vsel %vm1401_vm3, 65537, %v8071_v31  ;;  %vm1403_vm6 = vmpackc.low %vm8204_vm2, %vm8204_vm2  ;;  %v7953_v49 = vld [vmem:[%s10244_s4 + $0x30] sm:$0xff]   ;;  %v1320_v52 = vld [vmem:[#allocation2] sm:$0x80]  ;;  %vm1264_vm15 = vcmp.ge.s32.totalorder %v932_v5, 1  ;;  %s10100_s28 = scalar_lea.vmem %s10250_s10, %s6870_s25 }
  0x19   : > { %7165 = vmatpush3.bf16.msra.mxu0 %v7943_v19  ;;  %v1435_v35 = vsel %vm1403_vm6, 65537, %v8071_v31  ;;  %v6623_v36 = vcombine.low %v1433_v32, %v8220_v33  ;;  %v7954_v51 = vld [vmem:[%s10244_s4 + $0xf0] sm:$0xff]   ;;  %v7955_v54 = vld [vmem:[%s10244_s4 + $0x38] sm:$0xff]   ;;  %v8269_v60 = vld [vmem:[%s10244_s4 + $0x100] sm:$0xff]  }
  0x1a   : > { %7166 = vmatprep.subr.bf16.mxu0 %v7945_v23  ;;  %7311 = vmatpush3.bf16.msra.mxu1 %v7946_v25  ;;  %v6624_v38 = vcombine.low %v1435_v35, %v8220_v33  ;;  %v7956_v56 = vld [vmem:[%s10244_s4 + $0xf8] sm:$0xff]   ;;  %v8275_v61 = vld [vmem:[%s10244_s4 + $0x40] sm:$0xff]   ;;  %vm1405_vm12 = vmpackc.low %vm1260_vm11, %vm1260_vm11 }
  0x1b   : > { %7312 = vmatprep.subr.bf16.mxu1 %v7948_v30  ;;  %v1515_v39 = vshll.u32 %v6623_v36, 16  ;;  %v1518_v40 = vshrl.u32 %v6623_v36, 16  ;;  %v1437_v4 = vsel %vm1405_vm12, 65537, %v8071_v31  ;;  %vm1407_vm14 = vmpackc.low %vm1262_vm13, %vm1262_vm13  ;;  %v1016_v36 = vand.u32 15, %v860_v20  ;;  %v8454_v63 = vld [vmem:[%s10243_s3] ss:$0 sm:$0xff] }
  0x1c   : > { %7135 = vmatmul.mubr.msk.bf16.gmra.mrb[4].mxu0 %vm10251_vm0, %v369_v6  ;;  %v1522_v41 = vshll.u32 %v6624_v38, 16  ;;  %v1526_v42 = vshrl.u32 %v6624_v38, 16  ;;  %v850_v6 = vadd.s32 80, %v8191_v22  ;;  %vm1409_vm2 = vmpackc.low %vm1264_vm15, %vm1264_vm15  ;;  %v3243_v38 = vld [vmem:[#allocation2 + $0x8] sm:$0x80] }
  0x1d   : > { %7138 = vmatprep.mubr.msk.bf16.mxu0 %vm10251_vm0, %v371_v7  ;;  %7167 = vmatpush3.bf16.msra.mxu0 %v7945_v23  ;;  %v8234_v44 = vrot.slane %v1515_v39, 1  ;;  %v960_v7 = vand.u32 15, %v852_v3  ;;  %v1441_v23 = vsel %vm1409_vm2, 65537, %v8071_v31  ;;  %v1030_v39 = vand.u32 15, %v862_v24 }
  0x1e   : > { %7168 = vmatprep.subr.bf16.mxu0 %v7947_v28  ;;  %7313 = vmatpush3.bf16.msra.mxu1 %v7948_v30  ;;  %v1524_v46 = vrot.slane %v1522_v41, 1  ;;  %v6627_v35 = vcombine.low %v1441_v23, %v8220_v33  ;;  %vm8338_vm15 = vcmp.ge.s32.totalorder %v1016_v36, 1  ;;  %v8424_v36 = vadd.s32 8, %v8191_v22 }
  0x1f   : > { %7314 = vmatprep.subr.bf16.mxu1 %v7950_v37  ;;  %v1520_v47 = vor.u32 %v1518_v40, %v8234_v44  ;;  %vm10267_vm9 = vcmp.ne.s16.totalorder %v8234_v44, 0  ;;  %vm8288_vm1 = vcmp.ge.s32.totalorder %v960_v7, 1 }
  0x20   : > { %v8240_v48 = vor.u32 %v1526_v42, %v1524_v46  ;;  %v1658_v53 = vsel %vm10267_vm9, %v1320_v52, 0  ;;  %vm1413_vm4 = vmpackc.low %vm8288_vm1, %vm8288_vm1  ;;  %v1546_v52 = vshll.u32 %v6627_v35, 16  ;;  %vm8350_vm1 = vcmp.ge.s32.totalorder %v1030_v39, 1 }
  0x21   : > { %7169 = vmatpush3.bf16.msra.mxu0 %v7947_v28  ;;  %v8246_v50 = vsel %vm1513_vm7, %v1520_v47, %v1524_v46  ;;  %v1693_v55 = vshrl.u32 %v1658_v53, 16  ;;  %v864_v28 = vadd.s32 192, %v8191_v22  ;;  %v1445_v29 = vsel %vm1413_vm4, 65537, %v8071_v31  ;;  %vm1421_vm4 = vmpackc.low %vm8338_vm15, %vm8338_vm15 }
  0x22   : > { %7170 = vmatprep.subr.bf16.mxu0 %v7949_v34  ;;  %7315 = vmatpush3.bf16.msra.mxu1 %v7950_v37  ;;  %vm1642_vm8 = vcmp.ne.s16.totalorder %v8246_v50, 0  ;;  %v866_v37 = vadd.s32 208, %v8191_v22  ;;  %v6629_v42 = vcombine.low %v1445_v29, %v8220_v33 }
  0x23   : > { %7316 = vmatprep.subr.bf16.mxu1 %v7952_v45  ;;  %v1695_v58 = vrot.slane %v1693_v55, 7 }
  0x24   : > { %7139 = vmatmul.mubr.msk.bf16.gmra.mrb[8].mxu0 %vm10251_vm0, %v373_v8  ;;  %v6625_v8 = vcombine.low %v1437_v4, %v8220_v33  ;;  %v1562_v62 = vshll.u32 %v6629_v42, 16 }
  0x25   : > { %7142 = vmatprep.mubr.msk.bf16.mxu0 %vm10251_vm0, %v375_v9  ;;  %7171 = vmatpush3.bf16.msra.mxu0 %v7949_v34  ;;  %v1703_v59 = vsel %vm1691_vm10, %v1695_v58, %v8262_v57  ;;  %v854_v9 = vadd.s32 112, %v8191_v22  ;;  %v868_v34 = vadd.s32 224, %v8191_v22 }
  0x26   : > { %7172 = vmatprep.subr.bf16.mxu0 %v7951_v43  ;;  %7317 = vmatpush3.bf16.msra.mxu1 %v7952_v45  ;;  %v1534_v21 = vshrl.u32 %v6625_v8, 16 }
  0x27   : > { %7318 = vmatprep.subr.bf16.mxu1 %v7954_v51  ;;  %v1072_v47 = vand.u32 15, %v868_v34 }
  0x29   : > { %7173 = vmatpush3.bf16.msra.mxu0 %v7951_v43  ;;  %v1044_v43 = vand.u32 15, %v864_v28 }
  0x2a   : > { %7174 = vmatprep.subr.bf16.mxu0 %v7953_v49  ;;  %7319 = vmatpush3.bf16.msra.mxu1 %v7954_v51  ;;  %v3260_v51 = vsel %vm10267_vm9, %v3243_v38, 0 }
  0x2b   : > { %7320 = vmatprep.subr.bf16.mxu1 %v7956_v56  ;;  %v3295_v3 = vshrl.u32 %v3260_v51, 16  ;;  %v8433_v51 = vadd.s32 24, %v8191_v22 }
  0x2c   : > { %7143 = vmatmul.mubr.msk.bf16.gmra.mrb[12].mxu0 %vm10251_vm0, %v377_v10  ;;  %v1439_v10 = vsel %vm1407_vm14, 65537, %v8071_v31 }
  0x2d   : > { %7146 = vmatprep.mubr.msk.bf16.mxu0 %vm10251_vm0, %v379_v11  ;;  %7175 = vmatpush3.bf16.msra.mxu0 %v7953_v49  ;;  %v856_v11 = vadd.s32 128, %v8191_v22  ;;  %v870_v49 = vadd.s32 240, %v8191_v22 }
  0x2e   : > { %7176 = vmatprep.subr.bf16.mxu0 %v7955_v54  ;;  %7321 = vmatpush3.bf16.msra.mxu1 %v7956_v56 }
  0x2f   : > { %7354 = vmatprep.subr.bf16.mxu1 %v8269_v60  ;;  %v1086_v2 = vand.u32 15, %v870_v49 }
  0x31   : > { %7177 = vmatpush3.bf16.msra.mxu0 %v7955_v54  ;;  %v1058_v54 = vand.u32 15, %v866_v37 }
  0x32   : > { %7210 = vmatprep.subr.bf16.mxu0 %v8275_v61 }
  0x34   : > { %7147 = vmatmul.mubr.msk.bf16.gmra.mrb[16].mxu0 %vm10251_vm0, %v381_v12  ;;  %v946_v12 = vand.u32 15, %v850_v6 }
  0x35   : > { %7150 = vmatprep.mubr.msk.bf16.mxu0 %vm10251_vm0, %v383_v13 }
  0x36   : > { %vm8296_vm3 = vcmp.ge.s32.totalorder %v946_v12, 1  ;;  %v1564_v12 = vrot.slane %v1562_v62, 1 }
  0x37   : > { %vm1411_vm6 = vmpackc.low %vm8296_vm3, %vm8296_vm3  ;;  %vm8357_vm3 = vcmp.ge.s32.totalorder %v1044_v43, 1 }
  0x38   : > { %v1443_v41 = vsel %vm1411_vm6, 65537, %v8071_v31  ;;  %vm1423_vm6 = vmpackc.low %vm8350_vm1, %vm8350_vm1 }
  0x39   : > { %v6628_v55 = vcombine.low %v1443_v41, %v8220_v33 }
  0x3c   : > { %7151 = vmatmul.mubr.msk.bf16.gmra.mrb[20].mxu0 %vm10251_vm0, %v385_v14  ;;  %v1530_v14 = vshll.u32 %v6625_v8, 16  ;;  %v1548_v8 = vrot.slane %v1546_v52, 1 }
  0x3d   : > { %7154 = vmatprep.mubr.msk.bf16.mxu0 %vm10251_vm0, %v387_v15  ;;  %v8293_v15 = vcombine.low %v1439_v10, %v8220_v33  ;;  %v1550_v10 = vshrl.u32 %v6627_v35, 16 }
  0x3e   : > { %v1532_v25 = vrot.slane %v1530_v14, 1  ;;  %v1566_v14 = vshrl.u32 %v6629_v42, 16 }
  0x3f   : > { %v1538_v26 = vshll.u32 %v8293_v15, 16  ;;  %v1542_v7 = vshrl.u32 %v8293_v15, 16  ;;  %v1453_v15 = vsel %vm1421_vm4, 65537, %v8071_v31  ;;  %v1552_v27 = vor.u32 %v1550_v10, %v1548_v8 }
  0x40   : > { %v1536_v45 = vor.u32 %v1534_v21, %v1532_v25  ;;  %v8363_v0 = vsel %vm1513_vm7, %v8240_v48, %v1532_v25  ;;  %v6633_v28 = vcombine.low %v1453_v15, %v8220_v33  ;;  %v1568_v34 = vor.u32 %v1566_v14, %v1564_v12 }
  0x41   : > { %v1540_v40 = vrot.slane %v1538_v26, 1 }
  0x43   : > { %v8382_v6 = vsel %vm1513_vm7, %v1536_v45, %v1540_v40  ;;  %v1544_v23 = vor.u32 %v1542_v7, %v1540_v40  ;;  %v1598_v7 = vshrl.u32 %v6633_v28, 16 }
  0x44   : > { %7155 = vmatmul.mubr.msk.bf16.gmra.mrb[24].mxu0 %vm10251_vm0, %v389_v16  ;;  %v974_v16 = vand.u32 15, %v854_v9  ;;  %10313 = vst [vmem:[#allocation4_spill] sm:$0xff] %v8382_v6  ;;  %v1554_v9 = vshll.u32 %v6628_v55, 16 }
  0x45   : > { %7158 = vmatprep.mubr.msk.bf16.mxu0 %vm10251_vm0, %v391_v17  ;;  %v988_v17 = vand.u32 15, %v856_v11  ;;  %v1558_v11 = vshrl.u32 %v6628_v55, 16  ;;  %v8430_v46 = vsel %vm1513_vm7, %v1544_v23, %v1548_v8  ;;  %v883_v55 = vand.u32 15, %v8424_v36 }
  0x46   : > { %vm8307_vm5 = vcmp.ge.s32.totalorder %v974_v16, 1  ;;  %v1455_v16 = vsel %vm1423_vm6, 65537, %v8071_v31  ;;  %v1556_v24 = vrot.slane %v1554_v9, 1  ;;  %10316 = vst [vmem:[#allocation5_spill] sm:$0xff] %v8430_v46  ;;  %vm10264_vm4 = vcmp.ne.s16.totalorder %v8430_v46, 0 }
  0x47   : > { %vm8316_vm11 = vcmp.ge.s32.totalorder %v988_v17, 1  ;;  %vm1415_vm12 = vmpackc.low %vm8307_vm5, %vm8307_vm5  ;;  %vm8368_vm5 = vcmp.ge.s32.totalorder %v1072_v47, 1  ;;  %v6634_v29 = vcombine.low %v1455_v16, %v8220_v33  ;;  %v1594_v47 = vshll.u32 %v6633_v28, 16 }
  0x48   : > { %vm1417_vm13 = vmpackc.low %vm8316_vm11, %vm8316_vm11  ;;  %v1447_v56 = vsel %vm1415_vm12, 65537, %v8071_v31  ;;  %vm8377_vm11 = vcmp.ge.s32.totalorder %v1058_v54, 1  ;;  %v8436_v52 = vsel %vm1513_vm7, %v1552_v27, %v1556_v24 }
  0x49   : > { %v1449_v58 = vsel %vm1417_vm13, 65537, %v8071_v31  ;;  %v6630_v4 = vcombine.low %v1447_v56, %v8220_v33  ;;  %vm1425_vm12 = vmpackc.low %vm8357_vm3, %vm8357_vm3  ;;  %v1602_v49 = vshll.u32 %v6634_v29, 16  ;;  %10317 = vst [vmem:[#allocation6_spill] sm:$0xff] %v8436_v52  ;;  %vm10265_vm3 = vcmp.ne.s16.totalorder %v8382_v6, 0 }
  0x4a   : > { %v6631_v5 = vcombine.low %v1449_v58, %v8220_v33  ;;  %vm1429_vm13 = vmpackc.low %vm8368_vm5, %vm8368_vm5  ;;  %v1457_v21 = vsel %vm1425_vm12, 65537, %v8071_v31  ;;  %v1596_v48 = vrot.slane %v1594_v47, 1  ;;  %v1606_v9 = vshrl.u32 %v6634_v29, 16 }
  0x4b   : > { %vm1427_vm1 = vmpackc.low %vm8377_vm11, %vm8377_vm11  ;;  %v1570_v19 = vshll.u32 %v6630_v4, 16  ;;  %v1461_v26 = vsel %vm1429_vm13, 65537, %v8071_v31  ;;  %v6635_v35 = vcombine.low %v1457_v21, %v8220_v33  ;;  %v1574_v38 = vshrl.u32 %v6630_v4, 16 }
  0x4c   : > { %7159 = vmatmul.mubr.msk.bf16.gmra.mrb[28].mxu0 %vm10251_vm0, %v393_v18  ;;  %v858_v18 = vadd.s32 144, %v8191_v22  ;;  %v1578_v20 = vshll.u32 %v6631_v5, 16  ;;  %v1459_v30 = vsel %vm1427_vm1, 65537, %v8071_v31  ;;  %v6637_v40 = vcombine.low %v1461_v26, %v8220_v33 }
  0x4d   : > { %7178 = vmatprep.mubr.bf16.mxu0 %v1703_v59  ;;  %v1572_v37 = vrot.slane %v1570_v19, 1  ;;  %v1582_v41 = vshrl.u32 %v6631_v5, 16  ;;  %v6636_v43 = vcombine.low %v1459_v30, %v8220_v33  ;;  %v1610_v54 = vshll.u32 %v6635_v35, 16 }
  0x4e   : > { %v1002_v32 = vand.u32 15, %v858_v18  ;;  %v8411_v18 = vrot.slane %v3295_v3, 7  ;;  %v1580_v39 = vrot.slane %v1578_v20, 1  ;;  %v1626_v59 = vshll.u32 %v6637_v40, 16 }
  0x4f   : > { %v8448_v56 = vsel %vm1513_vm7, %v1568_v34, %v1572_v37  ;;  %v1576_v58 = vor.u32 %v1574_v38, %v1572_v37  ;;  %v1618_v4 = vshll.u32 %v6636_v43, 16  ;;  %v1604_v8 = vrot.slane %v1602_v49, 1 }
  0x50   : > { %vm8331_vm14 = vcmp.ge.s32.totalorder %v1002_v32, 1  ;;  %v1560_v32 = vor.u32 %v1558_v11, %v1556_v24  ;;  %10319 = vst [vmem:[#allocation8_spill] sm:$0xff] %v8448_v56  ;;  %v1584_v1 = vor.u32 %v1582_v41, %v1580_v39  ;;  %v1622_v14 = vshrl.u32 %v6636_v43, 16 }
  0x51   : > { %vm1419_vm2 = vmpackc.low %vm8331_vm14, %vm8331_vm14  ;;  %vm8407_vm14 = vcmp.ge.s32.totalorder %v1086_v2, 1  ;;  %v1628_v17 = vrot.slane %v1626_v59, 1  ;;  %v1630_v19 = vshrl.u32 %v6637_v40, 16  ;;  %v1620_v26 = vrot.slane %v1618_v4, 1 }
  0x52   : > { %v1451_v13 = vsel %vm1419_vm2, 65537, %v8071_v31  ;;  %vm1431_vm15 = vmpackc.low %vm8407_vm14, %vm8407_vm14  ;;  %v8439_v53 = vsel %vm1513_vm7, %v1560_v32, %v1564_v12  ;;  %vm10266_vm2 = vcmp.ne.s16.totalorder %v8363_v0, 0  ;;  %v1612_v12 = vrot.slane %v1610_v54, 1 }
  0x53   : > { %v6632_v25 = vcombine.low %v1451_v13, %v8220_v33  ;;  %v1463_v45 = vsel %vm1431_vm15, 65537, %v8071_v31  ;;  %10318 = vst [vmem:[#allocation7_spill] sm:$0xff] %v8439_v53  ;;  %v8445_v31 = vld [vmem:[%s10242_s2] ss:$0 sm:$0xff]  ;;  %v1614_v13 = vshrl.u32 %v6635_v35, 16  ;;  %v1600_v29 = vor.u32 %v1598_v7, %v1596_v48 }
  0x54   : > { %v6638_v62 = vcombine.low %v1463_v45, %v8220_v33  ;;  %v1608_v30 = vor.u32 %v1606_v9, %v1604_v8  ;;  %v8466_v34 = vsel %vm1513_vm7, %v1576_v58, %v1580_v39  ;;  %v1624_v37 = vor.u32 %v1622_v14, %v1620_v26 }
  0x55   : > { %v1586_v42 = vshll.u32 %v6632_v25, 16  ;;  %v1590_v3 = vshrl.u32 %v6632_v25, 16  ;;  %10320 = vst [vmem:[#allocation9_spill] sm:$0xff] %v8466_v34  ;;  %v1616_v35 = vor.u32 %v1614_v13, %v1612_v12  ;;  %v1632_v40 = vor.u32 %v1630_v19, %v1628_v17 }
  0x56   : > { %v1634_v20 = vshll.u32 %v6638_v62, 16  ;;  %v8476_v39 = vsel %vm1513_vm7, %v1600_v29, %v1604_v8  ;;  %v8479_v58 = vsel %vm1513_vm7, %v1608_v30, %v1612_v12  ;;  %vm10263_vm5 = vcmp.ne.s16.totalorder %v8436_v52, 0 }
  0x57   : > { %v1588_v2 = vrot.slane %v1586_v42, 1  ;;  %v1638_v42 = vshrl.u32 %v6638_v62, 16  ;;  %10323 = vst [vmem:[#allocation12_spill] sm:$0xff] %v8476_v39  ;;  %10324 = vst [vmem:[#allocation13_spill] sm:$0xff] %v8479_v58  ;;  %v8483_v7 = vsel %vm1513_vm7, %v1616_v35, %v1620_v26  ;;  %vm10262_vm6 = vcmp.ne.s16.totalorder %v8439_v53, 0 }
  0x58   : > { %v1636_v41 = vrot.slane %v1634_v20, 1  ;;  %10325 = vst [vmem:[#allocation14_spill] sm:$0xff] %v8483_v7  ;;  %vm10261_vm11 = vcmp.ne.s16.totalorder %v8448_v56, 0  ;;  %vm10253_vm12 = vcmp.ne.s16.totalorder %v8466_v34, 0  ;;  %vm10259_vm14 = vcmp.ne.s16.totalorder %v8476_v39, 0 }
  0x59   : > { %v1592_v25 = vor.u32 %v1590_v3, %v1588_v2  ;;  %v8470_v47 = vsel %vm1513_vm7, %v1584_v1, %v1588_v2  ;;  %v8486_v1 = vsel %vm1513_vm7, %v1624_v37, %v1628_v17  ;;  %vm10254_vm15 = vcmp.ne.s16.totalorder %v8479_v58, 0 }
  0x5a   : > { %10321 = vst [vmem:[#allocation10_spill] sm:$0xff] %v8470_v47  ;;  %10326 = vst [vmem:[#allocation15_spill] sm:$0xff] %v8486_v1  ;;  %v8491_v8 = vsel %vm1513_vm7, %v1632_v40, %v1636_v41  ;;  %vm10252_vm13 = vcmp.ne.s16.totalorder %v8470_v47, 0  ;;  %vm10255_vm0 = vcmp.ne.s16.totalorder %v8483_v7, 0 }
  0x5b   : > { %v8473_v49 = vsel %vm1513_vm7, %v1592_v25, %v1596_v48  ;;  %10327 = vst [vmem:[#allocation16_spill] sm:$0xff] %v8491_v8 }
  0x5c   : > { %10322 = vst [vmem:[#allocation11_spill] sm:$0xff] %v8473_v49  ;;  %vm10260_vm1 = vcmp.ne.s16.totalorder %v8473_v49, 0 }
  0xe7   : > { %v7132_v5 = vpop.f32.mrb[0].mxu0 }
  0xe8   : > { %v702_v10 = vmul.f32 %v7132_v5, %v8445_v31  ;;  %v566_v11 = vpop.f32.mrb[1].mxu0 }
  0xe9   : > { %v700_v15 = vmul.f32 %v8445_v31, %v566_v11  ;;  %v7133_v16 = vpop.f32.mrb[2].mxu0 }
  0xea   : > { %v741_v21 = vadd.f32 %v8454_v63, %v702_v10  ;;  %v703_v23 = vmul.f32 %v7133_v16, %v8445_v31  ;;  %v569_v24 = vpop.f32.mrb[3].mxu0  ;;  %v8493_v10 = vor.u32 %v1638_v42, %v1636_v41 }
  0xeb   : > { %v739_v27 = vadd.f32 %v8454_v63, %v700_v15  ;;  %v701_v28 = vmul.f32 %v8445_v31, %v569_v24 }
  0xec   : > { %v742_v32 = vadd.f32 %v8454_v63, %v703_v23  ;;  %v773_v43 = vmax.f32 %v741_v21, 0.0  ;;  %10328 = vst [vmem:[#allocation17_spill] sm:$0xff] %v8493_v10 }
  0xed   : > { %v740_v38 = vadd.f32 %v8454_v63, %v701_v28  ;;  %v771_v54 = vmax.f32 %v739_v27, 0.0 }
  0xee   : > { %v774_v45 = vmax.f32 %v742_v32, 0.0 }
  0xef   : > { %v772_v59 = vmax.f32 %v740_v38, 0.0  ;;  %v7136_v3 = vpop.f32.mrb[4].mxu0 }
  0xf0   : > { %v808_v4 = vpack.c.bf16 %v774_v45, %v773_v43  ;;  %v706_v62 = vmul.f32 %v7136_v3, %v8445_v31  ;;  %v582_v5 = vpop.f32.mrb[5].mxu0 }
  0xf1   : > { %v807_v2 = vpack.c.bf16 %v772_v59, %v771_v54  ;;  %v704_v48 = vmul.f32 %v8445_v31, %v582_v5  ;;  %v7137_v9 = vpop.f32.mrb[6].mxu0 }
  0xf2   : > { %824 = vst [vmem:[#allocation2 + $0x18] sm:$0xff] %v808_v4  ;;  %v745_v11 = vadd.f32 %v8454_v63, %v706_v62  ;;  %v707_v12 = vmul.f32 %v7137_v9, %v8445_v31  ;;  %v585_v13 = vpop.f32.mrb[7].mxu0  ;;  %v1661_v14 = vsel %vm10265_vm3, %v808_v4, 0  ;;  %v3262_v15 = vsel %vm10266_vm2, %v808_v4, 0 }
  0xf3   : > { %823 = vst [vmem:[#allocation2 + $0x10] sm:$0xff] %v807_v2  ;;  %v743_v16 = vadd.f32 %v8454_v63, %v704_v48  ;;  %v705_v17 = vmul.f32 %v8445_v31, %v585_v13  ;;  %v1660_v19 = vsel %vm10266_vm2, %v807_v2, 0  ;;  %v3261_v20 = vsel %vm1642_vm8, %v807_v2, 0 }
  0xf4   : > { %v777_v21 = vmax.f32 %v745_v11, 0.0  ;;  %v746_v23 = vadd.f32 %v8454_v63, %v707_v12  ;;  %v1705_v24 = vshrl.u32 %v1660_v19, 16  ;;  %v1708_v25 = vshll.u32 %v1660_v19, 16  ;;  %v7963_v11 = vld [vmem:[%s10244_s4 + $0x48] sm:$0xff]  }
  0xf5   : > { %v775_v26 = vmax.f32 %v743_v16, 0.0  ;;  %v744_v27 = vadd.f32 %v8454_v63, %v705_v17  ;;  %v3299_v28 = vshrl.u32 %v3261_v20, 16  ;;  %v3302_v29 = vshll.u32 %v3261_v20, 16 }
  0xf6   : > { %v778_v30 = vmax.f32 %v746_v23, 0.0  ;;  %v1707_v32 = vrot.slane %v1705_v24, 7  ;;  %v1713_v35 = vshrl.u32 %v1661_v14, 16  ;;  %v1716_v37 = vshll.u32 %v1661_v14, 16 }
  0xf7   : > { %v776_v38 = vmax.f32 %v744_v27, 0.0  ;;  %v7140_v40 = vpop.f32.mrb[8].mxu0  ;;  %v3301_v41 = vrot.slane %v3299_v28, 7  ;;  %v3307_v42 = vshrl.u32 %v3262_v15, 16  ;;  %v3310_v43 = vshll.u32 %v3262_v15, 16 }
  0xf8   : > { %v8510_v45 = vpack.c.bf16 %v778_v30, %v777_v21  ;;  %v710_v54 = vmul.f32 %v7140_v40, %v8445_v31  ;;  %v598_v59 = vpop.f32.mrb[9].mxu0  ;;  %v1710_v3 = vor.u32 %v1708_v25, %v1707_v32  ;;  %v8513_v4 = vrot.slane %v1713_v35, 7  ;;  %v7964_v30 = vld [vmem:[%s10244_s4 + $0x50] sm:$0xff]  }
  0xf9   : > { %v809_v62 = vpack.c.bf16 %v776_v38, %v775_v26  ;;  %v708_v5 = vmul.f32 %v8445_v31, %v598_v59  ;;  %v7141_v2 = vpop.f32.mrb[10].mxu0  ;;  %v3304_v48 = vor.u32 %v3302_v29, %v3301_v41  ;;  %v8516_v9 = vrot.slane %v3307_v42, 7  ;;  %v7958_v26 = vld [vmem:[%s10244_s4 + $0x108] sm:$0xff]  }
  0xfa   : > { %826 = vst [vmem:[#allocation2 + $0x28] sm:$0xff] %v8510_v45  ;;  %v749_v12 = vadd.f32 %v8454_v63, %v710_v54  ;;  %v711_v13 = vmul.f32 %v7141_v2, %v8445_v31  ;;  %v601_v14 = vpop.f32.mrb[11].mxu0  ;;  %v1711_v15 = vsel %vm1691_vm10, %v8262_v57, %v1710_v3  ;;  %v1718_v16 = vor.u32 %v1716_v37, %v8513_v4 }
  0xfb   : > { %825 = vst [vmem:[#allocation2 + $0x20] sm:$0xff] %v809_v62  ;;  %v747_v17 = vadd.f32 %v8454_v63, %v708_v5  ;;  %v709_v19 = vmul.f32 %v8445_v31, %v601_v14  ;;  %7179 = vmatmul.mubr.bf16.vlgmr.msra.gmra.mrb[32].mxu0 %v1711_v15  ;;  %v3305_v20 = vsel %vm1691_vm10, %v8411_v18, %v3304_v48  ;;  %v1662_v25 = vsel %vm10264_vm4, %v809_v62, 0 }
  0xfc   : > { %v3312_v21 = vor.u32 %v3310_v43, %v8516_v9  ;;  %v781_v23 = vmax.f32 %v749_v12, 0.0  ;;  %v750_v24 = vadd.f32 %v8454_v63, %v711_v13  ;;  %7322 = vmatprep.mubr.bf16.mxu1 %v3305_v20  ;;  %v1719_v57 = vsel %vm1691_vm10, %v1707_v32, %v1718_v16  ;;  %7211 = vmatpush3.bf16.msra.mxu0 %v8275_v61  ;;  %v7966_v20 = vld [vmem:[%s10244_s4 + $0x58] sm:$0xff]  }
  0xfd   : > { %v779_v18 = vmax.f32 %v747_v17, 0.0  ;;  %v748_v27 = vadd.f32 %v8454_v63, %v709_v19  ;;  %7182 = vmatprep.mubr.bf16.mxu0 %v1719_v57  ;;  %v1721_v29 = vshrl.u32 %v1662_v25, 16  ;;  %7212 = vmatprep.subr.bf16.mxu0 %v7963_v11  ;;  %v1724_v35 = vshll.u32 %v1662_v25, 16 }
  0xfe   : > { %v3313_v28 = vsel %vm1691_vm10, %v3301_v41, %v3312_v21  ;;  %v782_v32 = vmax.f32 %v750_v24, 0.0  ;;  %v3263_v37 = vsel %vm10265_vm3, %v809_v62, 0  ;;  %v1663_v61 = vsel %vm10263_vm5, %v8510_v45, 0  ;;  %v7959_v62 = vld [vmem:[%s10244_s4 + $0x110] sm:$0xff]  }
  0xff   : > { %7323 = vmatmul.mubr.bf16.vlgmr.msra.gmra.mrb[0].mxu1 %v3313_v28  ;;  %v780_v38 = vmax.f32 %v748_v27, 0.0  ;;  %v7144_v40 = vpop.f32.mrb[12].mxu0  ;;  %v1723_v41 = vrot.slane %v1721_v29, 7  ;;  %v3315_v42 = vshrl.u32 %v3263_v37, 16  ;;  %v3318_v43 = vshll.u32 %v3263_v37, 16  ;;  %v7960_v28 = vld [vmem:[%s10244_s4 + $0x118] sm:$0xff]  }
 0x100   : > { %7355 = vmatpush3.bf16.msra.mxu1 %v8269_v60  ;;  %v8552_v54 = vpack.c.bf16 %v782_v32, %v781_v23  ;;  %v714_v59 = vmul.f32 %v7144_v40, %v8445_v31  ;;  %v614_v3 = vpop.f32.mrb[13].mxu0  ;;  %v1729_v5 = vshrl.u32 %v1663_v61, 16  ;;  %v1732_v2 = vshll.u32 %v1663_v61, 16  ;;  %7213 = vmatpush3.bf16.msra.mxu0 %v7963_v11  ;;  %v7967_v40 = vld [vmem:[%s10244_s4 + $0x60] sm:$0xff]  }
 0x101   : > { %7356 = vmatprep.subr.bf16.mxu1 %v7958_v26  ;;  %v811_v48 = vpack.c.bf16 %v780_v38, %v779_v18  ;;  %v712_v60 = vmul.f32 %v8445_v31, %v614_v3  ;;  %v7145_v12 = vpop.f32.mrb[14].mxu0  ;;  %v1726_v13 = vor.u32 %v1724_v35, %v1723_v41  ;;  %v3317_v14 = vrot.slane %v3315_v42, 7  ;;  %7214 = vmatprep.subr.bf16.mxu0 %v7964_v30 }
 0x102   : > { %828 = vst [vmem:[#allocation2 + $0x38] sm:$0xff] %v8552_v54  ;;  %v753_v15 = vadd.f32 %v8454_v63, %v714_v59  ;;  %v715_v16 = vmul.f32 %v7145_v12, %v8445_v31  ;;  %v617_v17 = vpop.f32.mrb[15].mxu0  ;;  %v8563_v19 = vrot.slane %v1729_v5, 7  ;;  %v3264_v11 = vsel %vm10264_vm4, %v8510_v45, 0 }
 0x103   : > { %827 = vst [vmem:[#allocation2 + $0x30] sm:$0xff] %v811_v48  ;;  %v751_v21 = vadd.f32 %v8454_v63, %v712_v60  ;;  %v713_v23 = vmul.f32 %v8445_v31, %v617_v17  ;;  %v1727_v24 = vsel %vm1691_vm10, %v8513_v4, %v1726_v13  ;;  %v3320_v57 = vor.u32 %v3318_v43, %v3317_v14 }
 0x104   : > { %7357 = vmatpush3.bf16.msra.mxu1 %v7958_v26  ;;  %v785_v25 = vmax.f32 %v753_v15, 0.0  ;;  %v754_v18 = vadd.f32 %v8454_v63, %v715_v16  ;;  %7183 = vmatmul.mubr.bf16.gmra.mrb[36].mxu0 %v1727_v24  ;;  %v1734_v45 = vor.u32 %v1732_v2, %v8563_v19  ;;  %v3323_v27 = vshrl.u32 %v3264_v11, 16 }
 0x105   : > { %7358 = vmatprep.subr.bf16.mxu1 %v7959_v62  ;;  %v783_v29 = vmax.f32 %v751_v21, 0.0  ;;  %v752_v32 = vadd.f32 %v8454_v63, %v713_v23  ;;  %v3321_v4 = vsel %vm1691_vm10, %v8516_v9, %v3320_v57  ;;  %v3326_v26 = vshll.u32 %v3264_v11, 16  ;;  %7215 = vmatpush3.bf16.msra.mxu0 %v7964_v30  ;;  %v7969_v57 = vld [vmem:[%s10244_s4 + $0x68] sm:$0xff]  }
 0x106   : > { %v786_v35 = vmax.f32 %v754_v18, 0.0  ;;  %7326 = vmatprep.mubr.bf16.mxu1 %v3321_v4  ;;  %v1735_v37 = vsel %vm1691_vm10, %v1723_v41, %v1734_v45  ;;  %v3325_v61 = vrot.slane %v3323_v27, 7  ;;  %v1664_v38 = vsel %vm10262_vm6, %v811_v48, 0  ;;  %7216 = vmatprep.subr.bf16.mxu0 %v7966_v20 }
 0x107   : > { %v784_v42 = vmax.f32 %v752_v32, 0.0  ;;  %v7148_v43 = vpop.f32.mrb[16].mxu0  ;;  %7186 = vmatprep.mubr.bf16.mxu0 %v1735_v37  ;;  %v1737_v59 = vshrl.u32 %v1664_v38, 16  ;;  %v1740_v9 = vshll.u32 %v1664_v38, 16  ;;  %v3265_v30 = vsel %vm10263_vm5, %v811_v48, 0  ;;  %v7965_v38 = vld [vmem:[%s10244_s4 + $0x128] sm:$0xff]  }
 0x108   : > { %7359 = vmatpush3.bf16.msra.mxu1 %v7959_v62  ;;  %v8592_v3 = vpack.c.bf16 %v786_v35, %v785_v25  ;;  %v718_v41 = vmul.f32 %v7148_v43, %v8445_v31  ;;  %v630_v5 = vpop.f32.mrb[17].mxu0  ;;  %v3328_v2 = vor.u32 %v3326_v26, %v3325_v61  ;;  %v3331_v60 = vshrl.u32 %v3265_v30, 16  ;;  %v7962_v62 = vld [vmem:[%s10244_s4 + $0x120] sm:$0xff]  }
 0x109   : > { %7360 = vmatprep.subr.bf16.mxu1 %v7960_v28  ;;  %v8595_v12 = vpack.c.bf16 %v784_v42, %v783_v29  ;;  %v716_v13 = vmul.f32 %v8445_v31, %v630_v5  ;;  %v7149_v15 = vpop.f32.mrb[18].mxu0  ;;  %v8598_v16 = vrot.slane %v1737_v59, 7  ;;  %v3334_v17 = vshll.u32 %v3265_v30, 16  ;;  %7217 = vmatpush3.bf16.msra.mxu0 %v7966_v20 }
 0x10a   : > { %830 = vst [vmem:[#allocation2 + $0x48] sm:$0xff] %v8592_v3  ;;  %v757_v48 = vadd.f32 %v8454_v63, %v718_v41  ;;  %v719_v11 = vmul.f32 %v7149_v15, %v8445_v31  ;;  %v633_v21 = vpop.f32.mrb[19].mxu0  ;;  %v3329_v23 = vsel %vm1691_vm10, %v3317_v14, %v3328_v2  ;;  %v8607_v24 = vrot.slane %v3331_v60, 7  ;;  %7218 = vmatprep.subr.bf16.mxu0 %v7967_v40  ;;  %v9273_v47 = vld [vmem:[#allocation2 + $0x30] sm:$0xff] }
 0x10b   : > { %829 = vst [vmem:[#allocation2 + $0x40] sm:$0xff] %v8595_v12  ;;  %v755_v20 = vadd.f32 %v8454_v63, %v716_v13  ;;  %v717_v25 = vmul.f32 %v8445_v31, %v633_v21  ;;  %7327 = vmatmul.mubr.bf16.gmra.mrb[4].mxu1 %v3329_v23  ;;  %v1742_v18 = vor.u32 %v1740_v9, %v8598_v16  ;;  %v1665_v14 = vsel %vm10261_vm11, %v8552_v54, 0  ;;  %v7968_v23 = vld [vmem:[%s10244_s4 + $0x130] sm:$0xff]  }
 0x10c   : > { %v789_v45 = vmax.f32 %v757_v48, 0.0  ;;  %v758_v27 = vadd.f32 %v8454_v63, %v719_v11  ;;  %v3336_v29 = vor.u32 %v3334_v17, %v8607_v24  ;;  %v1745_v32 = vshrl.u32 %v1665_v14, 16  ;;  %7361 = vmatpush3.bf16.msra.mxu1 %v7960_v28  ;;  %10359 = vst [vmem:[#allocation18_spill] sm:$0xff] %v9273_v47 }
 0x10d   : > { %v787_v4 = vmax.f32 %v755_v20, 0.0  ;;  %v756_v26 = vadd.f32 %v8454_v63, %v717_v25  ;;  %v1743_v35 = vsel %vm1691_vm10, %v8563_v19, %v1742_v18  ;;  %v1748_v37 = vshll.u32 %v1665_v14, 16  ;;  %7362 = vmatprep.subr.bf16.mxu1 %v7962_v62  ;;  %7219 = vmatpush3.bf16.msra.mxu0 %v7967_v40  ;;  %v7970_v19 = vld [vmem:[%s10244_s4 + $0x70] sm:$0xff]  }
 0x10e   : > { %v790_v42 = vmax.f32 %v758_v27, 0.0  ;;  %7187 = vmatmul.mubr.bf16.gmra.mrb[40].mxu0 %v1743_v35  ;;  %v3337_v43 = vsel %vm1691_vm10, %v3325_v61, %v3336_v29  ;;  %v1747_v59 = vrot.slane %v1745_v32, 7  ;;  %v3266_v28 = vsel %vm10262_vm6, %v8552_v54, 0  ;;  %7220 = vmatprep.subr.bf16.mxu0 %v7969_v57 }
 0x10f   : > { %v788_v9 = vmax.f32 %v756_v26, 0.0  ;;  %v7152_v30 = vpop.f32.mrb[20].mxu0  ;;  %7330 = vmatprep.mubr.bf16.mxu1 %v3337_v43  ;;  %v3339_v41 = vshrl.u32 %v3266_v28, 16  ;;  %v3342_v5 = vshll.u32 %v3266_v28, 16  ;;  %v1666_v40 = vsel %vm10253_vm12, %v8595_v12, 0 }
 0x110   : > { %v8638_v61 = vpack.c.bf16 %v790_v42, %v789_v45  ;;  %v722_v2 = vmul.f32 %v7152_v30, %v8445_v31  ;;  %v646_v60 = vpop.f32.mrb[21].mxu0  ;;  %v1750_v54 = vor.u32 %v1748_v37, %v1747_v59  ;;  %v1753_v13 = vshrl.u32 %v1666_v40, 16  ;;  %7363 = vmatpush3.bf16.msra.mxu1 %v7962_v62  ;;  %v7972_v45 = vld [vmem:[%s10244_s4 + $0x78] sm:$0xff]  }
 0x111   : > { %v8642_v15 = vpack.c.bf16 %v788_v9, %v787_v4  ;;  %v720_v17 = vmul.f32 %v8445_v31, %v646_v60  ;;  %v7153_v48 = vpop.f32.mrb[22].mxu0  ;;  %v8645_v11 = vrot.slane %v3339_v41, 7  ;;  %v1756_v21 = vshll.u32 %v1666_v40, 16  ;;  %7364 = vmatprep.subr.bf16.mxu1 %v7965_v38  ;;  %7221 = vmatpush3.bf16.msra.mxu0 %v7969_v57 }
 0x112   : > { %832 = vst [vmem:[#allocation2 + $0x58] sm:$0xff] %v8638_v61  ;;  %v761_v20 = vadd.f32 %v8454_v63, %v722_v2  ;;  %v723_v62 = vmul.f32 %v7153_v48, %v8445_v31  ;;  %v649_v25 = vpop.f32.mrb[23].mxu0  ;;  %v1751_v18 = vsel %vm1691_vm10, %v8598_v16, %v1750_v54  ;;  %v8655_v14 = vrot.slane %v1753_v13, 7  ;;  %7222 = vmatprep.subr.bf16.mxu0 %v7970_v19 }
 0x113   : > { %831 = vst [vmem:[#allocation2 + $0x50] sm:$0xff] %v8642_v15  ;;  %v759_v57 = vadd.f32 %v8454_v63, %v720_v17  ;;  %v721_v27 = vmul.f32 %v8445_v31, %v649_v25  ;;  %7190 = vmatprep.mubr.bf16.mxu0 %v1751_v18  ;;  %v3344_v29 = vor.u32 %v3342_v5, %v8645_v11  ;;  %v3267_v16 = vsel %vm10261_vm11, %v8595_v12, 0  ;;  %v7971_v12 = vld [vmem:[%s10244_s4 + $0x138] sm:$0xff]  }
 0x114   : > { %v793_v32 = vmax.f32 %v761_v20, 0.0  ;;  %v762_v4 = vadd.f32 %v8454_v63, %v723_v62  ;;  %v1758_v26 = vor.u32 %v1756_v21, %v8655_v14  ;;  %v3347_v35 = vshrl.u32 %v3267_v16, 16  ;;  %7365 = vmatpush3.bf16.msra.mxu1 %v7965_v38 }
 0x115   : > { %v791_v37 = vmax.f32 %v759_v57, 0.0  ;;  %v760_v42 = vadd.f32 %v8454_v63, %v721_v27  ;;  %v3345_v43 = vsel %vm1691_vm10, %v8607_v24, %v3344_v29  ;;  %v3350_v28 = vshll.u32 %v3267_v16, 16  ;;  %7366 = vmatprep.subr.bf16.mxu1 %v7968_v23  ;;  %7223 = vmatpush3.bf16.msra.mxu0 %v7970_v19  ;;  %v8683_v24 = vld [vmem:[%s10244_s4 + $0x80] sm:$0xff]  }
 0x116   : > { %v794_v9 = vmax.f32 %v762_v4, 0.0  ;;  %7331 = vmatmul.mubr.bf16.gmra.mrb[8].mxu1 %v3345_v43  ;;  %v1759_v30 = vsel %vm1691_vm10, %v1747_v59, %v1758_v26  ;;  %v3349_v41 = vrot.slane %v3347_v35, 7  ;;  %v1667_v38 = vsel %vm10252_vm13, %v8592_v3, 0  ;;  %7224 = vmatprep.subr.bf16.mxu0 %v7972_v45 }
 0x117   : > { %v792_v5 = vmax.f32 %v760_v42, 0.0  ;;  %v7156_v40 = vpop.f32.mrb[24].mxu0  ;;  %7191 = vmatmul.mubr.bf16.gmra.mrb[44].mxu0 %v1759_v30  ;;  %v1761_v2 = vshrl.u32 %v1667_v38, 16  ;;  %v1764_v19 = vshll.u32 %v1667_v38, 16  ;;  %v3268_v59 = vsel %vm10253_vm12, %v8592_v3, 0  ;;  %v8697_v3 = vld [vmem:[%s10244_s4 + $0x140] sm:$0xff]  }
 0x118   : > { %v8688_v60 = vpack.c.bf16 %v794_v9, %v793_v32  ;;  %v726_v54 = vmul.f32 %v7156_v40, %v8445_v31  ;;  %v662_v13 = vpop.f32.mrb[25].mxu0  ;;  %v3352_v17 = vor.u32 %v3350_v28, %v3349_v41  ;;  %v3355_v48 = vshrl.u32 %v3268_v59, 16  ;;  %7367 = vmatpush3.bf16.msra.mxu1 %v7968_v23 }
 0x119   : > { %v8691_v21 = vpack.c.bf16 %v792_v5, %v791_v37  ;;  %v724_v20 = vmul.f32 %v8445_v31, %v662_v13  ;;  %v7157_v62 = vpop.f32.mrb[26].mxu0  ;;  %v1763_v25 = vrot.slane %v1761_v2, 7  ;;  %v3358_v18 = vshll.u32 %v3268_v59, 16  ;;  %7368 = vmatprep.subr.bf16.mxu1 %v7971_v12  ;;  %7225 = vmatpush3.bf16.msra.mxu0 %v7972_v45 }
 0x11a   : > { %834 = vst [vmem:[#allocation2 + $0x68] sm:$0xff] %v8688_v60  ;;  %v765_v57 = vadd.f32 %v8454_v63, %v726_v54  ;;  %v727_v23 = vmul.f32 %v7157_v62, %v8445_v31  ;;  %v665_v27 = vpop.f32.mrb[27].mxu0  ;;  %v3353_v29 = vsel %vm1691_vm10, %v8645_v11, %v3352_v17  ;;  %v3357_v16 = vrot.slane %v3355_v48, 7  ;;  %7258 = vmatprep.subr.bf16.mxu0 %v8683_v24 }
 0x11b   : > { %833 = vst [vmem:[#allocation2 + $0x60] sm:$0xff] %v8691_v21  ;;  %v763_v45 = vadd.f32 %v8454_v63, %v724_v20  ;;  %v725_v32 = vmul.f32 %v8445_v31, %v665_v27  ;;  %7334 = vmatprep.mubr.bf16.mxu1 %v3353_v29  ;;  %v1766_v4 = vor.u32 %v1764_v19, %v1763_v25  ;;  %v1668_v26 = vsel %vm10260_vm1, %v8642_v15, 0 }
 0x11c   : > { %v797_v35 = vmax.f32 %v765_v57, 0.0  ;;  %v766_v11 = vadd.f32 %v8454_v63, %v727_v23  ;;  %v3360_v37 = vor.u32 %v3358_v18, %v3357_v16  ;;  %v1769_v42 = vshrl.u32 %v1668_v26, 16  ;;  %7369 = vmatpush3.bf16.msra.mxu1 %v7971_v12 }
 0x11d   : > { %v795_v43 = vmax.f32 %v763_v45, 0.0  ;;  %v764_v28 = vadd.f32 %v8454_v63, %v725_v32  ;;  %v1767_v9 = vsel %vm1691_vm10, %v8655_v14, %v1766_v4  ;;  %v1772_v30 = vshll.u32 %v1668_v26, 16  ;;  %7402 = vmatprep.subr.bf16.mxu1 %v8697_v3 }
 0x11e   : > { %v798_v38 = vmax.f32 %v766_v11, 0.0  ;;  %7194 = vmatprep.mubr.bf16.mxu0 %v1767_v9  ;;  %v3361_v5 = vsel %vm1691_vm10, %v3349_v41, %v3360_v37  ;;  %v1771_v40 = vrot.slane %v1769_v42, 7  ;;  %v3269_v2 = vsel %vm10252_vm13, %v8642_v15, 0 }
 0x11f   : > { %v796_v12 = vmax.f32 %v764_v28, 0.0  ;;  %7335 = vmatmul.mubr.bf16.gmra.mrb[12].mxu1 %v3361_v5  ;;  %v7160_v19 = vpop.f32.mrb[28].mxu0  ;;  %v3363_v59 = vshrl.u32 %v3269_v2, 16  ;;  %v3366_v54 = vshll.u32 %v3269_v2, 16  ;;  %v1669_v14 = vsel %vm10259_vm14, %v8638_v61, 0 }
 0x120   : > { %v8725_v13 = vpack.c.bf16 %v798_v38, %v797_v35  ;;  %v730_v41 = vmul.f32 %v7160_v19, %v8445_v31  ;;  %v678_v17 = vpop.f32.mrb[29].mxu0  ;;  %v1774_v48 = vor.u32 %v1772_v30, %v1771_v40  ;;  %v1777_v20 = vshrl.u32 %v1669_v14, 16 }
 0x121   : > { %vm10258_vm13 = vcmp.ne.s16.totalorder %v8486_v1, 0  ;;  %v8729_v15 = vpack.c.bf16 %v796_v12, %v795_v43  ;;  %v728_v62 = vmul.f32 %v8445_v31, %v678_v17  ;;  %v7161_v18 = vpop.f32.mrb[30].mxu0  ;;  %v3365_v57 = vrot.slane %v3363_v59, 7 }
 0x122   : > { %v1780_v23 = vshll.u32 %v1669_v14, 16  ;;  %836 = vst [vmem:[#allocation2 + $0x78] sm:$0xff] %v8725_v13  ;;  %v769_v27 = vadd.f32 %v8454_v63, %v730_v41  ;;  %v731_v29 = vmul.f32 %v7161_v18, %v8445_v31  ;;  %v681_v45 = vpop.f32.mrb[31].mxu0  ;;  %v1775_v32 = vsel %vm1691_vm10, %v1763_v25, %v1774_v48 }
 0x123   : > { %v1779_v4 = vrot.slane %v1777_v20, 7  ;;  %vm10256_vm12 = vcmp.ne.s16.totalorder %v8491_v8, 0  ;;  %835 = vst [vmem:[#allocation2 + $0x70] sm:$0xff] %v8729_v15  ;;  %v767_v26 = vadd.f32 %v8454_v63, %v728_v62  ;;  %v729_v35 = vmul.f32 %v8445_v31, %v681_v45  ;;  %7195 = vmatmul.mubr.bf16.gmra.mrb[48].mxu0 %v1775_v32 }
 0x124   : > { %v3368_v11 = vor.u32 %v3366_v54, %v3365_v57  ;;  %v3270_v37 = vsel %vm10260_vm1, %v8638_v61, 0  ;;  %v801_v42 = vmax.f32 %v769_v27, 0.0  ;;  %v770_v43 = vadd.f32 %v8454_v63, %v731_v29 }
 0x125   : > { %v1782_v28 = vor.u32 %v1780_v23, %v1779_v4  ;;  %v3371_v25 = vshrl.u32 %v3270_v37, 16  ;;  %v799_v9 = vmax.f32 %v767_v26, 0.0  ;;  %v768_v30 = vadd.f32 %v8454_v63, %v729_v35 }
 0x126   : > { %v3369_v38 = vsel %vm1691_vm10, %v3357_v16, %v3368_v11  ;;  %v3374_v5 = vshll.u32 %v3270_v37, 16  ;;  %v802_v2 = vmax.f32 %v770_v43, 0.0  ;;  %v1670_v61 = vsel %vm10254_vm15, %v8691_v21, 0 }
 0x127   : > { %7338 = vmatprep.mubr.bf16.mxu1 %v3369_v38  ;;  %v1783_v31 = vsel %vm1691_vm10, %v1771_v40, %v1782_v28  ;;  %v3373_v12 = vrot.slane %v3371_v25, 7  ;;  %v800_v19 = vmax.f32 %v768_v30, 0.0  ;;  %v1785_v59 = vshrl.u32 %v1670_v61, 16 }
 0x128   : > { %7198 = vmatprep.mubr.bf16.mxu0 %v1783_v31  ;;  %v1788_v54 = vshll.u32 %v1670_v61, 16  ;;  %v3271_v63 = vsel %vm10259_vm14, %v8691_v21, 0  ;;  %v8753_v14 = vpack.c.bf16 %v802_v2, %v801_v42  ;;  %v1671_v20 = vsel %vm10255_vm0, %v8688_v60, 0 }
 0x129   : > { %v3376_v16 = vor.u32 %v3374_v5, %v3373_v12  ;;  %v3379_v41 = vshrl.u32 %v3271_v63, 16  ;;  %v3382_v17 = vshll.u32 %v3271_v63, 16  ;;  %v8755_v48 = vpack.c.bf16 %v800_v19, %v799_v9 }
 0x12a   : > { %v1787_v40 = vrot.slane %v1785_v59, 7  ;;  %v3272_v62 = vsel %vm10254_vm15, %v8688_v60, 0  ;;  %838 = vst [vmem:[#allocation2 + $0x88] sm:$0xff] %v8753_v14  ;;  %v1793_v27 = vshrl.u32 %v1671_v20, 16  ;;  %v1796_v29 = vshll.u32 %v1671_v20, 16 }
 0x12b   : > { %v3377_v18 = vsel %vm1691_vm10, %v3365_v57, %v3376_v16  ;;  %v3381_v23 = vrot.slane %v3379_v41, 7  ;;  %837 = vst [vmem:[#allocation2 + $0x80] sm:$0xff] %v8755_v48  ;;  %v3387_v32 = vshrl.u32 %v3272_v62, 16  ;;  %v3390_v26 = vshll.u32 %v3272_v62, 16 }
 0x12c   : > { %7339 = vmatmul.mubr.bf16.gmra.mrb[16].mxu1 %v3377_v18  ;;  %v1790_v45 = vor.u32 %v1788_v54, %v1787_v40  ;;  %v1672_v35 = vsel %vm10258_vm13, %v8729_v15, 0  ;;  %v1795_v37 = vrot.slane %v1793_v27, 7  ;;  %v3273_v28 = vsel %vm10255_vm0, %v8729_v15, 0 }
 0x12d   : > { %v3384_v11 = vor.u32 %v3382_v17, %v3381_v23  ;;  %v1801_v60 = vshrl.u32 %v1672_v35, 16  ;;  %v1804_v42 = vshll.u32 %v1672_v35, 16  ;;  %v3389_v57 = vrot.slane %v3387_v32, 7 }
 0x12e   : > { %v1791_v43 = vsel %vm1691_vm10, %v1779_v4, %v1790_v45  ;;  %v1673_v25 = vsel %vm10256_vm12, %v8725_v13, 0  ;;  %v1798_v30 = vor.u32 %v1796_v29, %v1795_v37  ;;  %v3395_v5 = vshrl.u32 %v3273_v28, 16 }
 0x12f   : > { %7199 = vmatmul.mubr.bf16.gmra.mrb[52].mxu0 %v1791_v43  ;;  %v3385_v9 = vsel %vm1691_vm10, %v3373_v12, %v3384_v11  ;;  %v1803_v38 = vrot.slane %v1801_v60, 7  ;;  %v3392_v2 = vor.u32 %v3390_v26, %v3389_v57  ;;  %v3398_v31 = vshll.u32 %v3273_v28, 16 }
 0x130   : > { %7342 = vmatprep.mubr.bf16.mxu1 %v3385_v9  ;;  %v1809_v61 = vshrl.u32 %v1673_v25, 16  ;;  %vm10257_vm15 = vcmp.ne.s16.totalorder %v8493_v10, 0  ;;  %v1799_v4 = vsel %vm1691_vm10, %v1787_v40, %v1798_v30  ;;  %v3397_v59 = vrot.slane %v3395_v5, 7  ;;  %v8806_v30 = vld [vmem:[#allocation2] sm:$0xff] }
 0x131   : > { %v1806_v19 = vor.u32 %v1804_v42, %v1803_v38  ;;  %v3274_v54 = vsel %vm10258_vm13, %v8725_v13, 0  ;;  %7202 = vmatprep.mubr.bf16.mxu0 %v1799_v4  ;;  %v1812_v12 = vshll.u32 %v1673_v25, 16  ;;  %vm8784_vm0 = vcmp.le.s32.totalorder %v883_v55, 14 }
 0x132   : > { %v1811_v63 = vrot.slane %v1809_v61, 7  ;;  %v3403_v16 = vshrl.u32 %v3274_v54, 16  ;;  %v3393_v17 = vsel %vm1691_vm10, %v3381_v23, %v3392_v2  ;;  %v3400_v20 = vor.u32 %v3398_v31, %v3397_v59 }
 0x133   : > { %v1674_v40 = vsel %vm10257_vm15, %v8755_v48, 0  ;;  %v3275_v62 = vsel %vm10256_vm12, %v8755_v48, 0  ;;  %v1807_v18 = vsel %vm1691_vm10, %v1795_v37, %v1806_v19  ;;  %v3406_v45 = vshll.u32 %v3274_v54, 16  ;;  %vm2501_vm12 = vmpackc.low %vm8784_vm0, %vm8784_vm0 }
 0x134   : > { %7343 = vmatmul.mubr.bf16.gmra.mrb[20].mxu1 %v3393_v17  ;;  %v1814_v27 = vor.u32 %v1812_v12, %v1811_v63  ;;  %v3405_v36 = vrot.slane %v3403_v16, 7  ;;  %v1817_v55 = vshrl.u32 %v1674_v40, 16  ;;  %v3401_v29 = vsel %vm1691_vm10, %v3389_v57, %v3400_v20 }
 0x135   : > { %v3411_v32 = vshrl.u32 %v3275_v62, 16  ;;  %v3276_v23 = vsel %vm10257_vm15, %v8753_v14, 0  ;;  %7346 = vmatprep.mubr.bf16.mxu1 %v3401_v29  ;;  %v1820_v35 = vshll.u32 %v1674_v40, 16  ;;  %v3414_v11 = vshll.u32 %v3275_v62, 16  ;;  %v7979_v29 = vld [vmem:[%s10244_s4 + $0x88] sm:$0xff]  }
 0x136   : > { %v1819_v26 = vrot.slane %v1817_v55, 7  ;;  %v1815_v37 = vsel %vm1691_vm10, %v1803_v38, %v1814_v27  ;;  %v3408_v60 = vor.u32 %v3406_v45, %v3405_v36  ;;  %v3419_v43 = vshrl.u32 %v3276_v23, 16 }
 0x137   : > { %7203 = vmatmul.mubr.bf16.gmra.mrb[56].mxu0 %v1807_v18  ;;  %v3413_v42 = vrot.slane %v3411_v32, 7  ;;  %v897_v28 = vand.u32 15, %v8433_v51  ;;  %v845_v25 = vadd.s32 40, %v8191_v22  ;;  %v2533_v5 = vsel %vm2501_vm12, 65537, %v8806_v30  ;;  %v8827_v18 = vld [vmem:[#allocation2 + $0x10] sm:$0xff] }
 0x138   : > { %7206 = vmatprep.mubr.bf16.mxu0 %v1815_v37  ;;  %v1822_v57 = vor.u32 %v1820_v35, %v1819_v26  ;;  %v3409_v2 = vsel %vm1691_vm10, %v3397_v59, %v3408_v60  ;;  %v3421_v61 = vrot.slane %v3419_v43, 7  ;;  %v6671_v4 = vcombine.low %v8220_v33, %v2533_v5  ;;  %v8847_v60 = vld [vmem:[#allocation2 + $0x18] sm:$0xff]  ;;  %v7983_v5 = vld [vmem:[%s10244_s4 + $0xa0] sm:$0xff]  }
 0x139   : > { %v3416_v9 = vor.u32 %v3414_v11, %v3413_v42  ;;  %vm1291_vm0 = vcmp.le.s32.totalorder %v897_v28, 14  ;;  %v911_v19 = vand.u32 15, %v845_v25  ;;  %v3422_v51 = vshll.u32 %v3276_v23, 16 }
 0x13a   : > { %v1823_v38 = vsel %vm1691_vm10, %v1811_v63, %v1822_v57  ;;  %v847_v54 = vadd.s32 56, %v8191_v22  ;;  %vm2503_vm15 = vmpackc.low %vm1291_vm0, %vm1291_vm0  ;;  %v2613_v59 = vshrl.u32 %v6671_v4, 16  ;;  %v849_v63 = vadd.s32 72, %v8191_v22 }
 0x13b   : > { %v3417_v31 = vsel %vm1691_vm10, %v3405_v36, %v3416_v9  ;;  %v3424_v12 = vor.u32 %v3422_v51, %v3421_v61  ;;  %vm8815_vm12 = vcmp.le.s32.totalorder %v911_v19, 14  ;;  %v2535_v17 = vsel %vm2503_vm15, 65537, %v8806_v30 }
 0x13c   : > { %7347 = vmatmul.mubr.bf16.gmra.mrb[24].mxu1 %v3409_v2  ;;  %v925_v41 = vand.u32 15, %v847_v54  ;;  %v851_v20 = vadd.s32 88, %v8191_v22  ;;  %vm2505_vm0 = vmpackc.low %vm8815_vm12, %vm8815_vm12  ;;  %v853_v62 = vadd.s32 104, %v8191_v22  ;;  %v8829_v27 = vrot.slane %v2613_v59, 7  ;;  %v8882_v54 = vld [vmem:[#allocation2 + $0x20] sm:$0xff] }
 0x13d   : > { %7350 = vmatprep.mubr.bf16.mxu1 %v3417_v31  ;;  %v3425_v40 = vsel %vm1691_vm10, %v3413_v42, %v3424_v12  ;;  %v2616_v36 = vshll.u32 %v6671_v4, 16  ;;  %v855_v55 = vadd.s32 120, %v8191_v22  ;;  %v8837_v45 = vcombine.low %v8220_v33, %v2535_v17  ;;  %v7980_v31 = vld [vmem:[%s10244_s4 + $0x90] sm:$0xff]  }
 0x13e   : > { %vm8839_vm15 = vcmp.le.s32.totalorder %v925_v41, 14  ;;  %v939_v23 = vand.u32 15, %v849_v63  ;;  %v857_v26 = vadd.s32 136, %v8191_v22  ;;  %v2537_v35 = vsel %vm2505_vm0, 65537, %v8806_v30  ;;  %v7982_v41 = vld [vmem:[%s10244_s4 + $0x98] sm:$0xff]  }
 0x13f   : > { %7207 = vmatmul.mubr.bf16.gmra.mrb[60].mxu0 %v1823_v38  ;;  %v953_v11 = vand.u32 15, %v851_v20  ;;  %v859_v37 = vadd.s32 152, %v8191_v22  ;;  %v967_v42 = vand.u32 15, %v853_v62  ;;  %v861_v43 = vadd.s32 168, %v8191_v22  ;;  %vm2507_vm12 = vmpackc.low %vm8839_vm15, %vm8839_vm15 }
 0x140   : > { %7226 = vmatprep.mubr.bf16.mxu0 %v8806_v30  ;;  %v8853_v57 = vor.u32 %v2616_v36, %v8829_v27  ;;  %v981_v28 = vand.u32 15, %v855_v55  ;;  %v2620_v25 = vshrl.u32 %v8837_v45, 16  ;;  %v8860_v9 = vcombine.low %v8220_v33, %v2537_v35  ;;  %v8924_v55 = vld [vmem:[#allocation2 + $0x28] sm:$0xff]  ;;  %v7988_v36 = vld [vmem:[%s10244_s4 + $0xb8] sm:$0xff]  }
 0x141   : > { %vm8862_vm0 = vcmp.le.s32.totalorder %v939_v23, 14  ;;  %v995_v2 = vand.u32 15, %v857_v26  ;;  %vm8872_vm15 = vcmp.le.s32.totalorder %v953_v11, 14  ;;  %v1009_v38 = vand.u32 15, %v859_v37 }
 0x142   : > { %v2539_v4 = vsel %vm2507_vm12, 65537, %v8806_v30  ;;  %vm8877_vm13 = vcmp.le.s32.totalorder %v967_v42, 14  ;;  %v1023_v51 = vand.u32 15, %v861_v43  ;;  %v2623_v12 = vshll.u32 %v8837_v45, 16  ;;  %vm2509_vm1 = vmpackc.low %vm8862_vm0, %vm8862_vm0  ;;  %v9040_v45 = vld [vmem:[#allocation2 + $0x38] sm:$0xff] }
 0x143   : > { %vm2739_vm14 = vcmp.ne.s16.totalorder %v8853_v57, 0  ;;  %vm8889_vm11 = vcmp.le.s32.totalorder %v981_v28, 14  ;;  %v863_v16 = vadd.s32 184, %v8191_v22  ;;  %v8899_v63 = vrot.slane %v2620_v25, 7  ;;  %vm2511_vm12 = vmpackc.low %vm8872_vm15, %vm8872_vm15  ;;  %v7976_v25 = vld [vmem:[%s10244_s4 + $0x158] sm:$0xff]  }
 0x144   : > { %7351 = vmatmul.mubr.bf16.gmra.mrb[28].mxu1 %v3425_v40  ;;  %v2628_v17 = vshrl.u32 %v8860_v9, 16  ;;  %vm8905_vm6 = vcmp.le.s32.totalorder %v995_v2, 14  ;;  %v7975_v40 = vld [vmem:[%s10244_s4 + $0x150] sm:$0xff]   ;;  %v8914_v62 = vcombine.low %v8220_v33, %v2539_v4  ;;  %vm2513_vm5 = vmpackc.low %vm8877_vm13, %vm8877_vm13  ;;  %vm8919_vm4 = vcmp.le.s32.totalorder %v1009_v38, 14 }
 0x145   : > { %7370 = vmatprep.mubr.bf16.mxu1 %v8827_v18  ;;  %vm2515_vm3 = vmpackc.low %vm8889_vm11, %vm8889_vm11  ;;  %vm8934_vm2 = vcmp.le.s32.totalorder %v1023_v51, 14  ;;  %v867_v32 = vadd.s32 216, %v8191_v22  ;;  %v2541_v23 = vsel %vm2509_vm1, 65537, %v8806_v30  ;;  %v2543_v26 = vsel %vm2511_vm12, 65537, %v8806_v30  ;;  %v8994_v51 = vld [vmem:[#allocation2 + $0x30] sm:$0xff] }
 0x146   : > { %vm2517_vm9 = vmpackc.low %vm8905_vm6, %vm8905_vm6  ;;  %v1037_v35 = vand.u32 15, %v863_v16  ;;  %v869_v11 = vadd.s32 232, %v8191_v22  ;;  %v2625_v37 = vor.u32 %v2623_v12, %v8899_v63  ;;  %v8957_v42 = vrot.slane %v2628_v17, 7 }
 0x147   : > { %7227 = vmatmul.mubr.bf16.vlgmr.msra.gmra.mrb[32].mxu0 %v8827_v18  ;;  %v2631_v43 = vshll.u32 %v8860_v9, 16  ;;  %vm2519_vm1 = vmpackc.low %vm8919_vm4, %vm8919_vm4  ;;  %v2636_v2 = vshrl.u32 %v8914_v62, 16  ;;  %v2545_v9 = vsel %vm2513_vm5, 65537, %v8806_v30  ;;  %v8988_v38 = vcombine.low %v8220_v33, %v2541_v23 }
 0x148   : > { %7230 = vmatprep.mubr.bf16.mxu0 %v8847_v60  ;;  %7259 = vmatpush3.bf16.msra.mxu0 %v8683_v24  ;;  %v7974_v24 = vld [vmem:[%s10244_s4 + $0x148] sm:$0xff]   ;;  %vm2521_vm0 = vmpackc.low %vm8934_vm2, %vm8934_vm2  ;;  %v8991_v4 = vcombine.low %v8220_v33, %v2543_v26  ;;  %v1065_v19 = vand.u32 15, %v867_v32  ;;  %v2551_v12 = vsel %vm2519_vm1, 65537, %v8806_v30  ;;  %v1079_v16 = vand.u32 15, %v869_v11 }
 0x149   : > { %7260 = vmatprep.subr.bf16.mxu0 %v7979_v29  ;;  %v9017_v17 = vcombine.low %v8220_v33, %v2545_v9  ;;  %v2633_v32 = vor.u32 %v2631_v43, %v8957_v42  ;;  %v9036_v23 = vrot.slane %v2636_v2, 7  ;;  %v2639_v26 = vshll.u32 %v8914_v62, 16 }
 0x14a   : > { %v9044_v11 = vsel %vm1691_vm10, %v8829_v27, %v2625_v37  ;;  %v9050_v9 = vcombine.low %v8220_v33, %v2551_v12  ;;  %vm9055_vm4 = vcmp.le.s32.totalorder %v1065_v19, 14  ;;  %v2644_v27 = vshrl.u32 %v8988_v38, 16  ;;  %v7986_v12 = vld [vmem:[%s10244_s4 + $0xb0] sm:$0xff]  }
 0x14b   : > { %v2652_v37 = vshrl.u32 %v8991_v4, 16  ;;  %vm9068_vm6 = vcmp.le.s32.totalorder %v1079_v16, 14  ;;  %vm2527_vm11 = vmpackc.low %vm9055_vm4, %vm9055_vm4  ;;  %v2663_v7 = vshll.u32 %v9017_v17, 16  ;;  %vm2740_vm1 = vcmp.ne.s16.totalorder %v9044_v11, 0 }
 0x14c   : > { %7371 = vmatmul.mubr.bf16.vlgmr.msra.gmra.mrb[0].mxu1 %v8847_v60  ;;  %7261 = vmatpush3.bf16.msra.mxu0 %v7979_v29  ;;  %v8929_v29 = vsel %vm2739_vm14, %v8806_v30, 0  ;;  %v2684_v10 = vshrl.u32 %v9050_v9, 16  ;;  %vm2529_vm15 = vmpackc.low %vm9068_vm6, %vm9068_vm6 }
 0x14d   : > { %7403 = vmatpush3.bf16.msra.mxu1 %v8697_v3  ;;  %7374 = vmatprep.mubr.bf16.mxu1 %v8882_v54  ;;  %v865_v3 = vadd.s32 200, %v8191_v22  ;;  %v2793_v61 = vshll.u32 %v8929_v29, 16  ;;  %v9114_v59 = vrot.slane %v2652_v37, 7  ;;  %v2561_v62 = vsel %vm2529_vm15, 65537, %v8806_v30  ;;  %v9153_v37 = vld [vmem:[#allocation2 + $0x48] sm:$0xff] }
 0x14e   : > { %7404 = vmatprep.subr.bf16.mxu1 %v7974_v24  ;;  %7262 = vmatprep.subr.bf16.mxu0 %v7980_v31 }
 0x14f   : > { %7231 = vmatmul.mubr.bf16.gmra.mrb[36].mxu0 %v8882_v54  ;;  %v1051_v28 = vand.u32 15, %v865_v3  ;;  %v2553_v3 = vsel %vm2521_vm0, 65537, %v8806_v30 }
 0x150   : > { %7234 = vmatprep.mubr.bf16.mxu0 %v8924_v55  ;;  %7263 = vmatpush3.bf16.msra.mxu0 %v7980_v31  ;;  %v871_v31 = vadd.s32 248, %v8191_v22  ;;  %v2549_v22 = vsel %vm2517_vm9, 65537, %v8806_v30  ;;  %v9063_v43 = vcombine.low %v8220_v33, %v2553_v3 }
 0x151   : > { %7405 = vmatpush3.bf16.msra.mxu1 %v7974_v24  ;;  %7264 = vmatprep.subr.bf16.mxu0 %v7982_v41  ;;  %v2547_v24 = vsel %vm2515_vm3, 65537, %v8806_v30  ;;  %vm9008_vm3 = vcmp.le.s32.totalorder %v1037_v35, 14  ;;  %vm9028_vm9 = vcmp.le.s32.totalorder %v1051_v28, 14  ;;  %v9047_v28 = vcombine.low %v8220_v33, %v2549_v22  ;;  %v7981_v22 = vld [vmem:[%s10244_s4 + $0x168] sm:$0xff]  }
 0x152   : > { %7406 = vmatprep.subr.bf16.mxu1 %v7975_v40  ;;  %v9020_v20 = vcombine.low %v8220_v33, %v2547_v24  ;;  %v1093_v35 = vand.u32 15, %v871_v31  ;;  %vm2523_vm2 = vmpackc.low %vm9008_vm3, %vm9008_vm3  ;;  %v2791_v24 = vshrl.u32 %v8929_v29, 16  ;;  %v2660_v31 = vshrl.u32 %v9017_v17, 16 }
 0x153   : > { %vm2525_vm5 = vmpackc.low %vm9028_vm9, %vm9028_vm9  ;;  %v2641_v29 = vor.u32 %v2639_v26, %v9036_v23  ;;  %v2676_v3 = vshrl.u32 %v9047_v28, 16  ;;  %v2646_v26 = vrot.slane %v2644_v27, 7  ;;  %v2692_v8 = vshrl.u32 %v9063_v43, 16 }
 0x154   : > { %7375 = vmatmul.mubr.bf16.gmra.mrb[4].mxu1 %v8924_v55  ;;  %7265 = vmatpush3.bf16.msra.mxu0 %v7982_v41  ;;  %v7985_v41 = vld [vmem:[%s10244_s4 + $0xa8] sm:$0xff]   ;;  %v2668_v19 = vshrl.u32 %v9020_v20, 16  ;;  %vm9090_vm13 = vcmp.le.s32.totalorder %v1093_v35, 14  ;;  %v2655_v35 = vshll.u32 %v8991_v4, 16  ;;  %v9122_v1 = vrot.slane %v2660_v31, 7 }
 0x155   : > { %7378 = vmatprep.mubr.bf16.mxu1 %v8994_v51  ;;  %7407 = vmatpush3.bf16.msra.mxu1 %v7975_v40  ;;  %v7978_v40 = vld [vmem:[%s10244_s4 + $0x160] sm:$0xff]   ;;  %v2559_v4 = vsel %vm2527_vm11, 65537, %v8806_v30  ;;  %vm2531_vm12 = vmpackc.low %vm9090_vm13, %vm9090_vm13  ;;  %v2671_v17 = vshll.u32 %v9020_v20, 16  ;;  %v2678_v31 = vrot.slane %v2676_v3, 7  ;;  %v2679_v20 = vshll.u32 %v9047_v28, 16 }
 0x156   : > { %7408 = vmatprep.subr.bf16.mxu1 %v7976_v25  ;;  %7266 = vmatprep.subr.bf16.mxu0 %v7983_v5  ;;  %v9125_v58 = vrot.slane %v2668_v19, 7  ;;  %v2686_v19 = vrot.slane %v2684_v10, 7  ;;  %v2695_v39 = vshll.u32 %v9063_v43, 16  ;;  %v9162_v2 = vcombine.low %v8220_v33, %v2559_v4  ;;  %v7987_v43 = vld [vmem:[%s10244_s4 + $0x178] sm:$0xff]  }
 0x157   : > { %7235 = vmatmul.mubr.bf16.gmra.mrb[40].mxu0 %v8994_v51  ;;  %v2563_v28 = vsel %vm2531_vm12, 65537, %v8806_v30  ;;  %v9182_v16 = vsel %vm1691_vm10, %v8957_v42, %v2641_v29  ;;  %v9197_v42 = vld [vmem:[#allocation2 + $0x50] sm:$0xff] }
 0x158   : > { %7238 = vmatprep.mubr.bf16.mxu0 %v9040_v45  ;;  %7267 = vmatpush3.bf16.msra.mxu0 %v7983_v5  ;;  %v2795_v5 = vrot.slane %v2793_v61, 1  ;;  %v2647_v61 = vshll.u32 %v8988_v38, 16  ;;  %v2557_v38 = vsel %vm2525_vm5, 65537, %v8806_v30  ;;  %v2673_v4 = vor.u32 %v2671_v17, %v9125_v58  ;;  %v9212_v17 = vld [vmem:[#allocation2 + $0x18] sm:$0xff] }
 0x159   : > { %7409 = vmatpush3.bf16.msra.mxu1 %v7976_v25  ;;  %7268 = vmatprep.subr.bf16.mxu0 %v7985_v41  ;;  %v9083_v25 = vsel %vm1691_vm10, %v8899_v63, %v2633_v32  ;;  %v2555_v63 = vsel %vm2523_vm2, 65537, %v8806_v30  ;;  %v9112_v32 = vld [vmem:[#allocation2 + $0x40] sm:$0xff]  ;;  %v9144_v27 = vcombine.low %v8220_v33, %v2557_v38  ;;  %v9158_v38 = vrot.slane %v2692_v8, 7 }
 0x15a   : > { %7410 = vmatprep.subr.bf16.mxu1 %v7978_v40  ;;  %v2649_v10 = vor.u32 %v2647_v61, %v2646_v26  ;;  %v2657_v8 = vor.u32 %v2655_v35, %v9114_v59  ;;  %v2665_v35 = vor.u32 %v2663_v7, %v9122_v1  ;;  %vm2741_vm0 = vcmp.ne.s16.totalorder %v9083_v25, 0 }
 0x15b   : > { %v2708_v3 = vshrl.u32 %v9144_v27, 16  ;;  %v2697_v29 = vor.u32 %v2695_v39, %v9158_v38  ;;  %v2716_v49 = vshrl.u32 %v9162_v2, 16  ;;  %vm2742_vm3 = vcmp.ne.s16.totalorder %v9182_v16, 0  ;;  %v9217_v39 = vld [vmem:[%s10244_s4 + $0x180] sm:$0xff]  }
 0x15c   : > { %7379 = vmatmul.mubr.bf16.gmra.mrb[8].mxu1 %v9040_v45  ;;  %7269 = vmatpush3.bf16.msra.mxu0 %v7985_v41  ;;  %v7984_v41 = vld [vmem:[%s10244_s4 + $0x170] sm:$0xff]   ;;  %v9209_v7 = vsel %vm1691_vm10, %v2646_v26, %v2657_v8  ;;  %v2711_v26 = vshll.u32 %v9144_v27, 16  ;;  %v9235_v8 = vsel %vm1691_vm10, %v9122_v1, %v2673_v4  ;;  %v5448_v1 = vsel %vm2739_vm14, %v9212_v17, 0 }
 0x15d   : > { %7382 = vmatprep.mubr.bf16.mxu1 %v9112_v32  ;;  %7411 = vmatpush3.bf16.msra.mxu1 %v7978_v40  ;;  %v9141_v40 = vcombine.low %v8220_v33, %v2555_v63  ;;  %v2687_v63 = vshll.u32 %v9050_v9, 16  ;;  %v9173_v9 = vcombine.low %v8220_v33, %v2561_v62  ;;  %v2681_v62 = vor.u32 %v2679_v20, %v2678_v31 }
 0x15e   : > { %7412 = vmatprep.subr.bf16.mxu1 %v7981_v22  ;;  %7270 = vmatprep.subr.bf16.mxu0 %v7986_v12  ;;  %v2710_v20 = vrot.slane %v2708_v3, 7  ;;  %v9247_v3 = vsel %vm1691_vm10, %v2686_v19, %v2697_v29  ;;  %vm2744_vm2 = vcmp.ne.s16.totalorder %v9209_v7, 0 }
 0x15f   : > { %7239 = vmatmul.mubr.bf16.gmra.mrb[44].mxu0 %v9112_v32  ;;  %v2700_v61 = vshrl.u32 %v9141_v40, 16  ;;  %vm2749_vm11 = vcmp.ne.s16.totalorder %v9247_v3, 0 }
 0x160   : > { %7242 = vmatprep.mubr.bf16.mxu0 %v9153_v37  ;;  %7271 = vmatpush3.bf16.msra.mxu0 %v7986_v12  ;;  %v9178_v12 = vor.u32 %v2795_v5, %v2791_v24  ;;  %v9194_v24 = vcombine.low %v8220_v33, %v2563_v28  ;;  %v2689_v5 = vor.u32 %v2687_v63, %v2686_v19  ;;  %v9224_v63 = vld [vmem:[#allocation2 + $0x20] sm:$0xff]  ;;  %v9227_v28 = vld [vmem:[#allocation2 + $0x58] sm:$0xff] }
 0x161   : > { %7413 = vmatpush3.bf16.msra.mxu1 %v7981_v22  ;;  %7272 = vmatprep.subr.bf16.mxu0 %v7988_v36  ;;  %v9187_v22 = vld [vmem:[%s10244_s4 + $0x200] sm:$0xff]   ;;  %v9206_v33 = vsel %vm1691_vm10, %v9036_v23, %v2649_v10  ;;  %v2703_v23 = vshll.u32 %v9141_v40, 16  ;;  %v9231_v10 = vsel %vm1691_vm10, %v9114_v59, %v2665_v35  ;;  %v9239_v40 = vsel %vm1691_vm10, %v9125_v58, %v2681_v62  ;;  %v9252_v35 = vld [vmem:[#allocation2 + $0x28] sm:$0xff] }
 0x162   : > { %7414 = vmatprep.subr.bf16.mxu1 %v7984_v41  ;;  %v2732_v27 = vshrl.u32 %v9194_v24, 16  ;;  %v2718_v59 = vrot.slane %v2716_v49, 7  ;;  %v2719_v58 = vshll.u32 %v9162_v2, 16  ;;  %v2727_v62 = vshll.u32 %v9173_v9, 16 }
 0x163   : > { %vm2743_vm9 = vcmp.ne.s16.totalorder %v9206_v33, 0  ;;  %v2713_v19 = vor.u32 %v2711_v26, %v2710_v20  ;;  %v9265_v2 = vsel %vm2740_vm1, %v8827_v18, 0  ;;  %vm2745_vm4 = vcmp.ne.s16.totalorder %v9231_v10, 0 }
 0x164   : > { %7383 = vmatmul.mubr.bf16.gmra.mrb[12].mxu1 %v9153_v37  ;;  %7273 = vmatpush3.bf16.msra.mxu0 %v7988_v36  ;;  %v2724_v36 = vshrl.u32 %v9173_v9, 16  ;;  %v2735_v9 = vshll.u32 %v9194_v24, 16  ;;  %v2721_v24 = vor.u32 %v2719_v58, %v2718_v59  ;;  %v2798_v46 = vshll.u32 %v9265_v2, 16 }
 0x165   : > { %7386 = vmatprep.mubr.bf16.mxu1 %v9197_v42  ;;  %7415 = vmatpush3.bf16.msra.mxu1 %v7984_v41  ;;  %v9220_v41 = vrot.slane %v2700_v61, 7  ;;  %v9244_v61 = vsel %vm1691_vm10, %v2678_v31, %v2689_v5  ;;  %v5449_v31 = vsel %vm2740_vm1, %v9224_v63, 0  ;;  %v5485_v5 = vshll.u32 %v5448_v1, 16 }
 0x166   : > { %7416 = vmatprep.subr.bf16.mxu1 %v7987_v43  ;;  %7546 = vmatprep.subr.bf16.mxu0 %v9187_v22  ;;  %v2726_v4 = vrot.slane %v2724_v36, 7  ;;  %v5490_v29 = vshll.u32 %v5449_v31, 16  ;;  %v5450_v36 = vsel %vm2741_vm0, %v9252_v35, 0  ;;  %v5494_v56 = vshrl.u32 %v5449_v31, 16 }
 0x167   : > { %7243 = vmatmul.mubr.bf16.gmra.mrb[48].mxu0 %v9197_v42  ;;  %v2705_v49 = vor.u32 %v2703_v23, %v9220_v41  ;;  %v5483_v23 = vshrl.u32 %v5448_v1, 16  ;;  %v5487_v26 = vrot.slane %v5485_v5, 1  ;;  %v5498_v52 = vshll.u32 %v5450_v36, 16  ;;  %v9287_v5 = vld [vmem:[#allocation2 + $0x68] sm:$0xff] }
 0x168   : > { %7246 = vmatprep.mubr.bf16.mxu0 %v9227_v28  ;;  %v5492_v34 = vrot.slane %v5490_v29, 1  ;;  %v2729_v53 = vor.u32 %v2727_v62, %v2726_v4  ;;  %v5451_v31 = vsel %vm2742_vm3, %v9273_v47, 0  ;;  %v9308_v11 = vsel %vm1691_vm10, %v9220_v41, %v2713_v19 }
 0x169   : > { %7417 = vmatpush3.bf16.msra.mxu1 %v7987_v43  ;;  %v9267_v43 = vrot.slane %v2732_v27, 7  ;;  %v4102_v27 = vsel %vm2739_vm14, %v8827_v18, 0  ;;  %v5488_v6 = vor.u32 %v5487_v26, %v5483_v23  ;;  %v9292_v18 = vsel %vm2740_vm1, %v8847_v60, 0  ;;  %v9303_v26 = vld [vmem:[#allocation2 + $0x38] sm:$0xff] }
 0x16a   : > { %7450 = vmatprep.subr.bf16.mxu1 %v9217_v39  ;;  %v5496_v1 = vor.u32 %v5494_v56, %v5492_v34  ;;  %v9296_v57 = vsel %vm1691_vm10, %v9158_v38, %v2705_v49  ;;  %v5500_v56 = vrot.slane %v5498_v52, 1  ;;  %v4139_v62 = vshll.u32 %v4102_v27, 16 }
 0x16b   : > { %v2737_v58 = vor.u32 %v2735_v9, %v9267_v43  ;;  %v9301_v29 = vsel %vm1513_vm7, %v5488_v6, %v5492_v34  ;;  %v5506_v23 = vshll.u32 %v5451_v31, 16  ;;  %vm2746_vm14 = vcmp.ne.s16.totalorder %v9235_v8, 0 }
 0x16c   : > { %7387 = vmatmul.mubr.bf16.gmra.mrb[16].mxu1 %v9227_v28  ;;  %10360 = vst [vmem:[#allocation19_spill] sm:$0xff] %v9301_v29  ;;  %v9311_v38 = vsel %vm1691_vm10, %v2710_v20, %v2721_v24  ;;  %v9314_v52 = vsel %vm1691_vm10, %v2718_v59, %v2729_v53  ;;  %v9317_v49 = vsel %vm1513_vm7, %v5496_v1, %v5500_v56  ;;  %v2800_v6 = vrot.slane %v2798_v46, 1  ;;  %v9327_v53 = vld [vmem:[#allocation2 + $0x40] sm:$0xff] }
 0x16d   : > { %7390 = vmatprep.mubr.bf16.mxu1 %v8691_v21  ;;  %10361 = vst [vmem:[#allocation20_spill] sm:$0xff] %v9317_v49  ;;  %v4144_v34 = vshll.u32 %v9292_v18, 16  ;;  %v2802_v47 = vshrl.u32 %v9265_v2, 16  ;;  %v9322_v29 = vsel %vm1691_vm10, %v2726_v4, %v2737_v58  ;;  %v5452_v41 = vsel %vm2743_vm9, %v9303_v26, 0  ;;  %10362 = vst [vmem:[#allocation21_spill] sm:$0xff] %v9327_v53  ;;  %v9337_v2 = vld [vmem:[#allocation2 + $0x48] sm:$0xff] }
 0x16e   : > { %v5510_v20 = vshrl.u32 %v5451_v31, 16  ;;  %v4141_v59 = vrot.slane %v4139_v62, 1  ;;  %v2758_v46 = vsel %vm2741_vm0, %v8847_v60, 0  ;;  %vm2747_vm5 = vcmp.ne.s16.totalorder %v9239_v40, 0  ;;  %10364 = vst [vmem:[#allocation23_spill] sm:$0xff] %v9337_v2 }
 0x16f   : > { %7247 = vmatmul.mubr.bf16.gmra.mrb[52].mxu0 %v8691_v21  ;;  %v5502_v21 = vshrl.u32 %v5450_v36, 16  ;;  %v5508_v36 = vrot.slane %v5506_v23, 1  ;;  %v5514_v4 = vshll.u32 %v5452_v41, 16  ;;  %v4137_v24 = vshrl.u32 %v4102_v27, 16 }
 0x170   : > { %7250 = vmatprep.mubr.bf16.mxu0 %v9287_v5  ;;  %v4148_v1 = vshrl.u32 %v9292_v18, 16  ;;  %v9344_v31 = vsel %vm2742_vm3, %v8882_v54, 0  ;;  %v2801_v60 = vsel %vm1513_vm7, %v9178_v12, %v2800_v6  ;;  %v2806_v27 = vshll.u32 %v2758_v46, 16 }
 0x171   : > { %v5504_v9 = vor.u32 %v5502_v21, %v5500_v56  ;;  %v5512_v58 = vor.u32 %v5510_v20, %v5508_v36  ;;  %v4146_v56 = vrot.slane %v4144_v34, 1  ;;  %v5516_v62 = vrot.slane %v5514_v4, 1 }
 0x172   : > { %v5453_v21 = vsel %vm2744_vm2, %v9327_v53, 0  ;;  %vm2748_vm6 = vcmp.ne.s16.totalorder %v9244_v61, 0  ;;  %v5518_v18 = vshrl.u32 %v5452_v41, 16  ;;  %v2804_v12 = vor.u32 %v2802_v47, %v2800_v6 }
 0x173   : > { %v9335_v19 = vsel %vm1513_vm7, %v5504_v9, %v5508_v36  ;;  %v5522_v23 = vshll.u32 %v5453_v21, 16  ;;  %v5454_v9 = vsel %vm2745_vm4, %v9337_v2, 0  ;;  %v9356_v36 = vld [vmem:[#allocation2 + $0x50] sm:$0xff]  ;;  %v4142_v34 = vor.u32 %v4141_v59, %v4137_v24  ;;  %v9375_v59 = vld [vmem:[#allocation2 + $0x58] sm:$0xff] }
 0x174   : > { %7391 = vmatmul.mubr.bf16.gmra.mrb[20].mxu1 %v9287_v5  ;;  %10363 = vst [vmem:[#allocation22_spill] sm:$0xff] %v9335_v19  ;;  %10365 = vst [vmem:[#allocation24_spill] sm:$0xff] %v9356_v36  ;;  %v2814_v20 = vshll.u32 %v9344_v31, 16  ;;  %v9361_v4 = vsel %vm1513_vm7, %v5512_v58, %v5516_v62  ;;  %v5520_v41 = vor.u32 %v5518_v18, %v5516_v62  ;;  %v5526_v19 = vshrl.u32 %v5453_v21, 16 }
 0x175   : > { %7394 = vmatprep.mubr.bf16.mxu1 %v8729_v15  ;;  %v5524_v53 = vrot.slane %v5522_v23, 1  ;;  %v2810_v49 = vshrl.u32 %v2758_v46, 16  ;;  %v9369_v2 = vsel %vm2742_vm3, %v8924_v55, 0  ;;  %v5530_v47 = vshll.u32 %v5454_v9, 16  ;;  %v9385_v23 = vld [vmem:[#allocation2 + $0x60] sm:$0xff] }
 0x176   : > { %v5455_v6 = vsel %vm2746_vm14, %v9356_v36, 0  ;;  %v9377_v25 = vor.u32 %v4148_v1, %v4146_v56  ;;  %v4147_v16 = vsel %vm1513_vm7, %v4142_v34, %v4146_v56  ;;  %v2816_v18 = vrot.slane %v2814_v20, 1 }
 0x177   : > { %7251 = vmatmul.mubr.bf16.gmra.mrb[56].mxu0 %v8729_v15  ;;  %v4104_v15 = vsel %vm2741_vm0, %v8882_v54, 0  ;;  %v2808_v54 = vrot.slane %v2806_v27, 1  ;;  %v9380_v24 = vsel %vm1513_vm7, %v5520_v41, %v5524_v53  ;;  %v5528_v46 = vor.u32 %v5526_v19, %v5524_v53 }
 0x178   : > { %7254 = vmatprep.mubr.bf16.mxu0 %v8725_v13  ;;  %v4152_v58 = vshll.u32 %v4104_v15, 16  ;;  %v4156_v62 = vshrl.u32 %v4104_v15, 16  ;;  %v5532_v21 = vrot.slane %v5530_v47, 1  ;;  %v5534_v36 = vshrl.u32 %v5454_v9, 16 }
 0x179   : > { %v5538_v1 = vshll.u32 %v5455_v6, 16  ;;  %v5456_v27 = vsel %vm2747_vm5, %v9375_v59, 0  ;;  %v2809_v53 = vsel %vm1513_vm7, %v2804_v12, %v2808_v54  ;;  %v9395_v19 = vsel %vm2743_vm9, %v8924_v55, 0 }
 0x17a   : > { %v9398_v56 = vsel %vm1513_vm7, %v5528_v46, %v5532_v21  ;;  %v9404_v9 = vsel %vm2743_vm9, %v8994_v51, 0  ;;  %v5536_v34 = vor.u32 %v5534_v36, %v5532_v21  ;;  %v5542_v12 = vshrl.u32 %v5455_v6, 16  ;;  %v9409_v46 = vld [vmem:[#allocation2 + $0x68] sm:$0xff] }
 0x17b   : > { %10366 = vst [vmem:[#allocation25_spill] sm:$0xff] %v9398_v56  ;;  %v5540_v20 = vrot.slane %v5538_v1, 1  ;;  %v2812_v15 = vor.u32 %v2810_v49, %v2808_v54  ;;  %v4154_v41 = vrot.slane %v4152_v58, 1  ;;  %v5546_v47 = vshll.u32 %v5456_v27, 16  ;;  %10367 = vst [vmem:[#allocation26_spill] sm:$0xff] %v9409_v46 }
 0x17c   : > { %7395 = vmatmul.mubr.bf16.gmra.mrb[24].mxu1 %v8725_v13  ;;  %v4160_v13 = vshll.u32 %v9369_v2, 16  ;;  %v5457_v55 = vsel %vm2748_vm6, %v9385_v23, 0  ;;  %v2761_v33 = vsel %vm2744_vm2, %v8994_v51, 0  ;;  %v2822_v49 = vshll.u32 %v9395_v19, 16 }
 0x17d   : > { %7398 = vmatprep.mubr.bf16.mxu1 %v8755_v48  ;;  %v9416_v36 = vsel %vm1513_vm7, %v5536_v34, %v5540_v20  ;;  %v5544_v6 = vor.u32 %v5542_v12, %v5540_v20  ;;  %v4168_v54 = vshll.u32 %v9404_v9, 16  ;;  %v5548_v58 = vrot.slane %v5546_v47, 1 }
 0x17e   : > { %v2817_v21 = vsel %vm1513_vm7, %v2812_v15, %v2816_v18  ;;  %v5550_v1 = vshrl.u32 %v5456_v27, 16  ;;  %v5554_v56 = vshll.u32 %v5457_v55, 16  ;;  %v4158_v51 = vor.u32 %v4156_v62, %v4154_v41 }
 0x17f   : > { %7255 = vmatmul.mubr.bf16.gmra.mrb[60].mxu0 %v8755_v48  ;;  %v2818_v48 = vshrl.u32 %v9344_v31, 16  ;;  %v9424_v31 = vsel %vm2749_vm11, %v9409_v46, 0  ;;  %v2830_v34 = vshll.u32 %v2761_v33, 16  ;;  %v9433_v20 = vsel %vm1513_vm7, %v5544_v6, %v5548_v58 }
 0x180   : > { %7274 = vmatprep.mubr.bf16.mxu0 %v2801_v60  ;;  %v4162_v60 = vrot.slane %v4160_v13, 1  ;;  %v9430_v13 = vsel %vm2745_vm4, %v9040_v45, 0  ;;  %v9438_v27 = vsel %vm2744_vm2, %v9040_v45, 0  ;;  %v5552_v62 = vor.u32 %v5550_v1, %v5548_v58 }
 0x181   : > { %v5556_v12 = vrot.slane %v5554_v56, 1  ;;  %v5558_v15 = vshrl.u32 %v5457_v55, 16  ;;  %v2824_v47 = vrot.slane %v2822_v49, 1  ;;  %v4170_v46 = vrot.slane %v4168_v54, 1 }
 0x182   : > { %v9448_v6 = vsel %vm2746_vm14, %v9112_v32, 0  ;;  %vm2750_vm13 = vcmp.ne.s16.totalorder %v9296_v57, 0  ;;  %v5562_v45 = vshll.u32 %v9424_v31, 16  ;;  %v2838_v7 = vshll.u32 %v9430_v13, 16 }
 0x183   : > { %v9459_v56 = vsel %vm1513_vm7, %v5552_v62, %v5556_v12  ;;  %v5560_v55 = vor.u32 %v5558_v15, %v5556_v12  ;;  %v2820_v49 = vor.u32 %v2818_v48, %v2816_v18  ;;  %v2832_v54 = vrot.slane %v2830_v34, 1  ;;  %v7990_v18 = vld [vmem:[%s10244_s4 + $0x188] sm:$0xff]  }
 0x184   : > { %7399 = vmatmul.mubr.bf16.gmra.mrb[28].mxu1 %v8753_v14  ;;  %v9443_v14 = vld [vmem:[%s10244_s4 + $0x208] sm:$0xff]   ;;  %10368 = vst [vmem:[#allocation27_spill] sm:$0xff] %v9459_v56  ;;  %v4176_v58 = vshll.u32 %v9438_v27, 16  ;;  %v9463_v1 = vrot.slane %v5562_v45, 1  ;;  %v2826_v10 = vshrl.u32 %v9395_v19, 16  ;;  %v2846_v62 = vshll.u32 %v9448_v6, 16 }
 0x185   : > { %7418 = vmatprep.mubr.bf16.mxu1 %v4147_v16  ;;  %v9456_v16 = vsel %vm2745_vm4, %v9112_v32, 0  ;;  %v4172_v32 = vshrl.u32 %v9404_v9, 16  ;;  %vm2751_vm15 = vcmp.ne.s16.totalorder %v9308_v11, 0  ;;  %v2834_v48 = vshrl.u32 %v2761_v33, 16  ;;  %v9490_v56 = vld [vmem:[#allocation2 + $0x70] sm:$0xff] }
 0x186   : > { %v9484_v19 = vsel %vm1513_vm7, %v5560_v55, %v9463_v1  ;;  %v4163_v9 = vsel %vm1513_vm7, %v4158_v51, %v4162_v60  ;;  %v2840_v12 = vrot.slane %v2838_v7, 1  ;;  %vm2752_vm12 = vcmp.ne.s16.totalorder %v9311_v38, 0 }
 0x187   : > { %7275 = vmatmul.mubr.bf16.vlgmr.msra.gmra.mrb[32].mxu0 %v2809_v53  ;;  %v4155_v53 = vsel %vm1513_vm7, %v9377_v25, %v4154_v41  ;;  %v9480_v25 = vld [vmem:[%s10244_s4 + $0x210] sm:$0xff]   ;;  %v2828_v41 = vor.u32 %v2826_v10, %v2824_v47  ;;  %v4174_v34 = vor.u32 %v4172_v32, %v4170_v46  ;;  %v4178_v15 = vrot.slane %v4176_v58, 1  ;;  %v9521_v10 = vld [vmem:[#allocation2 + $0x78] sm:$0xff] }
 0x188   : > { %7278 = vmatprep.mubr.bf16.mxu0 %v2817_v21  ;;  %7547 = vmatpush3.bf16.msra.mxu0 %v9187_v22  ;;  %v4164_v22 = vshrl.u32 %v9369_v2, 16  ;;  %v4184_v21 = vshll.u32 %v9456_v16, 16  ;;  %v2825_v2 = vsel %vm1513_vm7, %v2820_v49, %v2824_v47  ;;  %v2836_v45 = vor.u32 %v2834_v48, %v2832_v54 }
 0x189   : > { %7548 = vmatprep.subr.bf16.mxu0 %v9443_v14  ;;  %v2833_v51 = vsel %vm1513_vm7, %v2828_v41, %v2832_v54  ;;  %v2842_v55 = vshrl.u32 %v9430_v13, 16  ;;  %v9495_v7 = vrot.slane %v2846_v62, 1  ;;  %v9500_v47 = vsel %vm2746_vm14, %v9153_v37, 0  ;;  %v7991_v13 = vld [vmem:[%s10244_s4 + $0x190] sm:$0xff]  }
 0x18a   : > { %v4166_v33 = vor.u32 %v4164_v22, %v4162_v60  ;;  %v9505_v60 = vld [vmem:[%s10244_s4 + $0x218] sm:$0xff]   ;;  %vm2753_vm1 = vcmp.ne.s16.totalorder %v9314_v52, 0  ;;  %v4180_v49 = vshrl.u32 %v9438_v27, 16  ;;  %v4186_v54 = vrot.slane %v4184_v21, 1  ;;  %v9534_v21 = vld [vmem:[#allocation2 + $0x80] sm:$0xff] }
 0x18b   : > { %10369 = vst [vmem:[#allocation28_spill] sm:$0xff] %v9505_v60  ;;  %v9516_v8 = vsel %vm2747_vm5, %v9153_v37, 0  ;;  %v4179_v58 = vsel %vm1513_vm7, %v4174_v34, %v4178_v15  ;;  %v5459_v27 = vsel %vm2750_vm13, %v9490_v56, 0  ;;  %v2841_v32 = vsel %vm1513_vm7, %v2836_v45, %v2840_v12 }
 0x18c   : > { %7419 = vmatmul.mubr.bf16.vlgmr.msra.gmra.mrb[0].mxu1 %v4155_v53  ;;  %7549 = vmatpush3.bf16.msra.mxu0 %v9443_v14  ;;  %v2844_v53 = vor.u32 %v2842_v55, %v2840_v12  ;;  %v4182_v62 = vor.u32 %v4180_v49, %v4178_v15  ;;  %v4192_v37 = vshll.u32 %v9500_v47, 16  ;;  %v2850_v22 = vshrl.u32 %v9448_v6, 16  ;;  %v7992_v6 = vld [vmem:[%s10244_s4 + $0x198] sm:$0xff]  }
 0x18d   : > { %7451 = vmatpush3.bf16.msra.mxu1 %v9217_v39  ;;  %7422 = vmatprep.mubr.bf16.mxu1 %v4163_v9  ;;  %v4171_v39 = vsel %vm1513_vm7, %v4166_v33, %v4170_v46  ;;  %v4188_v46 = vshrl.u32 %v9456_v16, 16  ;;  %v2854_v48 = vshll.u32 %v9516_v8, 16  ;;  %v5566_v9 = vshrl.u32 %v9424_v31, 16  ;;  %v9555_v33 = vld [vmem:[#allocation2 + $0x88] sm:$0xff] }
 0x18e   : > { %7452 = vmatprep.subr.bf16.mxu1 %v7990_v18  ;;  %7550 = vmatprep.subr.bf16.mxu0 %v9480_v25  ;;  %v2849_v16 = vsel %vm1513_vm7, %v2844_v53, %v9495_v7  ;;  %v5570_v41 = vshll.u32 %v5459_v27, 16  ;;  %v4187_v34 = vsel %vm1513_vm7, %v4182_v62, %v4186_v54  ;;  %v5460_v31 = vsel %vm2751_vm15, %v9521_v10, 0 }
 0x18f   : > { %7279 = vmatmul.mubr.bf16.gmra.mrb[36].mxu0 %v2825_v2  ;;  %v9550_v2 = vld [vmem:[%s10244_s4 + $0x220] sm:$0xff]   ;;  %v5568_v15 = vor.u32 %v5566_v9, %v9463_v1  ;;  %v5578_v55 = vshll.u32 %v5460_v31, 16  ;;  %v9561_v49 = vsel %vm2747_vm5, %v9197_v42, 0  ;;  %vm2754_vm0 = vcmp.ne.s16.totalorder %v9322_v29, 0  ;;  %v9571_v1 = vld [vmem:[%s10244_s4 + $0x228] sm:$0xff]  }
 0x190   : > { %7282 = vmatprep.mubr.bf16.mxu0 %v2833_v51  ;;  %7551 = vmatpush3.bf16.msra.mxu0 %v9480_v25  ;;  %v5572_v45 = vrot.slane %v5570_v41, 1  ;;  %v5574_v51 = vshrl.u32 %v5459_v27, 16  ;;  %v5461_v53 = vsel %vm2752_vm12, %v9534_v21, 0  ;;  %v5582_v62 = vshrl.u32 %v5460_v31, 16  ;;  %v7993_v41 = vld [vmem:[%s10244_s4 + $0x1a0] sm:$0xff]  }
 0x191   : > { %7453 = vmatpush3.bf16.msra.mxu1 %v7990_v18  ;;  %7552 = vmatprep.subr.bf16.mxu0 %v9505_v60  ;;  %v9544_v18 = vsel %vm2748_vm6, %v9197_v42, 0  ;;  %v5586_v27 = vshll.u32 %v5461_v53, 16  ;;  %v9587_v31 = vsel %vm2754_vm0, %v8806_v30, 0  ;;  %v4190_v12 = vor.u32 %v4188_v46, %v4186_v54  ;;  %v7996_v46 = vld [vmem:[%s10244_s4 + $0x1a8] sm:$0xff]  }
 0x192   : > { %7454 = vmatprep.subr.bf16.mxu1 %v7991_v13  ;;  %v9574_v40 = vsel %vm1513_vm7, %v5568_v15, %v5572_v45  ;;  %v5576_v42 = vor.u32 %v5574_v51, %v5572_v45  ;;  %v2862_v9 = vshll.u32 %v9544_v18, 16  ;;  %v2766_v54 = vsel %vm2749_vm11, %v9227_v28, 0 }
 0x193   : > { %10370 = vst [vmem:[#allocation29_spill] sm:$0xff] %v9574_v40  ;;  %v5588_v51 = vrot.slane %v5586_v27, 1  ;;  %v2856_v40 = vrot.slane %v2854_v48, 1  ;;  %v9609_v48 = vld [vmem:[%s10244_s4 + $0x230] sm:$0xff]   ;;  %v2769_v57 = vsel %vm2752_vm12, %v9490_v56, 0  ;;  %vm2755_vm3 = vcmp.ne.s16.totalorder %v9267_v43, 0 }
 0x194   : > { %7423 = vmatmul.mubr.bf16.gmra.mrb[4].mxu1 %v4171_v39  ;;  %7553 = vmatpush3.bf16.msra.mxu0 %v9505_v60  ;;  %v5580_v39 = vrot.slane %v5578_v55, 1  ;;  %v4200_v60 = vshll.u32 %v9561_v49, 16  ;;  %v2864_v27 = vrot.slane %v2862_v9, 1  ;;  %v4112_v9 = vsel %vm2749_vm11, %v9385_v23, 0 }
 0x195   : > { %7426 = vmatprep.mubr.bf16.mxu1 %v4179_v58  ;;  %7455 = vmatpush3.bf16.msra.mxu1 %v7991_v13  ;;  %v5462_v13 = vsel %vm2753_vm1, %v9555_v33, 0  ;;  %v5590_v58 = vshrl.u32 %v5461_v53, 16  ;;  %v5602_v53 = vshll.u32 %v9587_v31, 16  ;;  %v4607_v29 = vsel %vm1642_vm8, %v9212_v17, 0 }
 0x196   : > { %7456 = vmatprep.subr.bf16.mxu1 %v7992_v6  ;;  %7554 = vmatprep.subr.bf16.mxu0 %v9550_v2  ;;  %v9590_v15 = vsel %vm1513_vm7, %v5576_v42, %v5580_v39  ;;  %v5584_v45 = vor.u32 %v5582_v62, %v5580_v39  ;;  %v5594_v55 = vshll.u32 %v5462_v13, 16  ;;  %v5598_v62 = vshrl.u32 %v5462_v13, 16 }
 0x197   : > { %7283 = vmatmul.mubr.bf16.gmra.mrb[40].mxu0 %v2841_v32  ;;  %v5592_v32 = vor.u32 %v5590_v58, %v5588_v51  ;;  %v4194_v39 = vrot.slane %v4192_v37, 1  ;;  %v4202_v58 = vrot.slane %v4200_v60, 1  ;;  %v9636_v60 = vld [vmem:[%s10244_s4 + $0x238] sm:$0xff]   ;;  %vm10372_vm9 = vcmp.ne.s16.totalorder %v8234_v44, 0 }
 0x198   : > { %7286 = vmatprep.mubr.bf16.mxu0 %v2849_v16  ;;  %7555 = vmatpush3.bf16.msra.mxu0 %v9550_v2  ;;  %v9597_v30 = vsel %vm1513_vm7, %v5584_v45, %v5588_v51  ;;  %v5596_v42 = vrot.slane %v5594_v55, 1  ;;  %v2852_v16 = vor.u32 %v2850_v22, %v9495_v7  ;;  %v9616_v7 = vsel %vm2748_vm6, %v9227_v28, 0 }
 0x199   : > { %7457 = vmatpush3.bf16.msra.mxu1 %v7992_v6  ;;  %7556 = vmatprep.subr.bf16.mxu0 %v9571_v1  ;;  %v9611_v6 = vrot.slane %v5602_v53, 1  ;;  %v4195_v13 = vsel %vm1513_vm7, %v4190_v12, %v4194_v39  ;;  %v9625_v45 = vsel %vm2750_vm13, %v9385_v23, 0  ;;  %v10371_v28 = vshrl.u32 %v9516_v8, 16  ;;  %v7999_v8 = vld [vmem:[%s10244_s4 + $0x1b0] sm:$0xff]  }
 0x19a   : > { %7458 = vmatprep.subr.bf16.mxu1 %v7993_v41  ;;  %v9619_v37 = vsel %vm1513_vm7, %v5592_v32, %v5596_v42  ;;  %v5600_v22 = vor.u32 %v5598_v62, %v5596_v42  ;;  %v2870_v51 = vshll.u32 %v2766_v54, 16  ;;  %v2857_v3 = vsel %vm1513_vm7, %v2852_v16, %v2856_v40 }
 0x19b   : > { %v2860_v61 = vor.u32 %v10371_v28, %v2856_v40  ;;  %v4204_v12 = vshrl.u32 %v9561_v49, 16  ;;  %v4208_v55 = vshll.u32 %v9616_v7, 16  ;;  %v4196_v53 = vshrl.u32 %v9500_v47, 16 }
 0x19c   : > { %7427 = vmatmul.mubr.bf16.gmra.mrb[8].mxu1 %v4187_v34  ;;  %7557 = vmatpush3.bf16.msra.mxu0 %v9571_v1  ;;  %v9640_v34 = vsel %vm1513_vm7, %v5600_v22, %v9611_v6  ;;  %v2878_v32 = vshll.u32 %v9625_v45, 16  ;;  %v4216_v42 = vshll.u32 %v4112_v9, 16  ;;  %v2866_v49 = vshrl.u32 %v9544_v18, 16  ;;  %v8002_v18 = vld [vmem:[%s10244_s4 + $0x1b8] sm:$0xff]  }
 0x19d   : > { %7430 = vmatprep.mubr.bf16.mxu1 %v4195_v13  ;;  %7459 = vmatpush3.bf16.msra.mxu1 %v7993_v41  ;;  %v2865_v41 = vsel %vm1513_vm7, %v2860_v61, %v2864_v27  ;;  %v4206_v40 = vor.u32 %v4204_v12, %v4202_v58  ;;  %v4198_v62 = vor.u32 %v4196_v53, %v4194_v39  ;;  %v2872_v16 = vrot.slane %v2870_v51, 1 }
 0x19e   : > { %7460 = vmatprep.subr.bf16.mxu1 %v7996_v46  ;;  %7558 = vmatprep.subr.bf16.mxu0 %v9609_v48  ;;  %v4210_v22 = vrot.slane %v4208_v55, 1  ;;  %v2868_v13 = vor.u32 %v2866_v49, %v2864_v27  ;;  %v4113_v47 = vsel %vm2750_vm13, %v9287_v5, 0  ;;  %v2768_v28 = vsel %vm2751_vm15, %v9287_v5, 0 }
 0x19f   : > { %7287 = vmatmul.mubr.bf16.gmra.mrb[44].mxu0 %v2857_v3  ;;  %v4203_v39 = vsel %vm1513_vm7, %v4198_v62, %v4202_v58  ;;  %v2880_v61 = vrot.slane %v2878_v32, 1  ;;  %v4218_v51 = vrot.slane %v4216_v42, 1  ;;  %v4220_v3 = vshrl.u32 %v4112_v9, 16  ;;  %v9677_v9 = vld [vmem:[%s10244_s4 + $0x1c0] sm:$0xff]  }
 0x1a0   : > { %7290 = vmatprep.mubr.bf16.mxu0 %v2865_v41  ;;  %7559 = vmatpush3.bf16.msra.mxu0 %v9609_v48  ;;  %v4211_v27 = vsel %vm1513_vm7, %v4206_v40, %v4210_v22  ;;  %v4224_v12 = vshll.u32 %v4113_v47, 16  ;;  %v2886_v55 = vshll.u32 %v2768_v28, 16  ;;  %v2873_v58 = vsel %vm1513_vm7, %v2868_v13, %v2872_v16 }
 0x1a1   : > { %7461 = vmatpush3.bf16.msra.mxu1 %v7996_v46  ;;  %7560 = vmatprep.subr.bf16.mxu0 %v9636_v60  ;;  %v2874_v46 = vshrl.u32 %v2766_v54, 16  ;;  %v4114_v54 = vsel %vm2751_vm15, %v9490_v56, 0  ;;  %v4212_v53 = vshrl.u32 %v9616_v7, 16  ;;  %v4222_v32 = vor.u32 %v4220_v3, %v4218_v51 }
 0x1a2   : > { %7462 = vmatprep.subr.bf16.mxu1 %v7999_v8  ;;  %v2894_v42 = vshll.u32 %v2769_v57, 16  ;;  %v2882_v11 = vshrl.u32 %v9625_v45, 16  ;;  %v4232_v40 = vshll.u32 %v4114_v54, 16  ;;  %v4226_v49 = vrot.slane %v4224_v12, 1 }
 0x1a3   : > { %v2876_v5 = vor.u32 %v2874_v46, %v2872_v16  ;;  %v2888_v62 = vrot.slane %v2886_v55, 1  ;;  %v2770_v16 = vsel %vm2753_vm1, %v9521_v10, 0  ;;  %v4115_v45 = vsel %vm2752_vm12, %v9521_v10, 0 }
 0x1a4   : > { %7431 = vmatmul.mubr.bf16.gmra.mrb[12].mxu1 %v4203_v39  ;;  %7561 = vmatpush3.bf16.msra.mxu0 %v9636_v60  ;;  %v2884_v13 = vor.u32 %v2882_v11, %v2880_v61  ;;  %v2890_v39 = vshrl.u32 %v2768_v28, 16  ;;  %v4227_v46 = vsel %vm1513_vm7, %v4222_v32, %v4226_v49  ;;  %v2902_v3 = vshll.u32 %v2770_v16, 16 }
 0x1a5   : > { %7434 = vmatprep.mubr.bf16.mxu1 %v4211_v27  ;;  %7463 = vmatpush3.bf16.msra.mxu1 %v7999_v8  ;;  %v2881_v41 = vsel %vm1513_vm7, %v2876_v5, %v2880_v61  ;;  %v4214_v8 = vor.u32 %v4212_v53, %v4210_v22  ;;  %v2896_v27 = vrot.slane %v2894_v42, 1  ;;  %v4234_v22 = vrot.slane %v4232_v40, 1 }
 0x1a6   : > { %7464 = vmatprep.subr.bf16.mxu1 %v8002_v18  ;;  %v4116_v28 = vsel %vm2753_vm1, %v9534_v21, 0  ;;  %v2892_v61 = vor.u32 %v2890_v39, %v2888_v62  ;;  %v4236_v5 = vshrl.u32 %v4114_v54, 16  ;;  %v4240_v12 = vshll.u32 %v4115_v45, 16  ;;  %v2435_v54 = vld [vmem:[#allocation2 + $0x88] sm:$0x1] }
 0x1a7   : > { %7291 = vmatmul.mubr.bf16.gmra.mrb[48].mxu0 %v2873_v58  ;;  %v4219_v7 = vsel %vm1513_vm7, %v4214_v8, %v4218_v51  ;;  %v2889_v51 = vsel %vm1513_vm7, %v2884_v13, %v2888_v62  ;;  %v4228_v55 = vshrl.u32 %v4113_v47, 16  ;;  %v2898_v32 = vshrl.u32 %v2769_v57, 16 }
 0x1a8   : > { %7294 = vmatprep.mubr.bf16.mxu0 %v2881_v41  ;;  %v2897_v38 = vsel %vm1513_vm7, %v2892_v61, %v2896_v27  ;;  %v4248_v41 = vshll.u32 %v4116_v28, 16  ;;  %v4238_v53 = vor.u32 %v4236_v5, %v4234_v22  ;;  %v2904_v42 = vrot.slane %v2902_v3, 1 }
 0x1a9   : > { %7465 = vmatpush3.bf16.msra.mxu1 %v8002_v18  ;;  %v2771_v18 = vsel %vm2754_vm0, %v9534_v21, 0  ;;  %v4230_v11 = vor.u32 %v4228_v55, %v4226_v49  ;;  %v2906_v40 = vshrl.u32 %v2770_v16, 16  ;;  %v4242_v52 = vrot.slane %v4240_v12, 1 }
 0x1aa   : > { %7498 = vmatprep.subr.bf16.mxu1 %v9677_v9  ;;  %v2910_v58 = vshll.u32 %v2771_v18, 16  ;;  %v2900_v8 = vor.u32 %v2898_v32, %v2896_v27  ;;  %v4117_v62 = vsel %vm2754_vm0, %v9555_v33, 0  ;;  %v4250_v39 = vrot.slane %v4248_v41, 1  ;;  %v4101_v27 = vld [vmem:[#allocation2 + $0x90] sm:$0x1] }
 0x1ab   : > { %v4235_v13 = vsel %vm1513_vm7, %v4230_v11, %v4234_v22  ;;  %v2908_v57 = vor.u32 %v2906_v40, %v2904_v42  ;;  %v4252_v49 = vshrl.u32 %v4116_v28, 16  ;;  %v4256_v16 = vshll.u32 %v4117_v62, 16  ;;  %v4589_v22 = vld [vmem:[#allocation2 + $0x10] sm:$0x80] }
 0x1ac   : > { %7435 = vmatmul.mubr.bf16.gmra.mrb[16].mxu1 %v4219_v7  ;;  %v2912_v47 = vrot.slane %v2910_v58, 1  ;;  %v4243_v7 = vsel %vm1513_vm7, %v4238_v53, %v4242_v52  ;;  %v2905_v3 = vsel %vm1513_vm7, %v2900_v8, %v2904_v42  ;;  %v2914_v12 = vshrl.u32 %v2771_v18, 16  ;;  %v10374_v8 = vld [vmem:[#allocation4_spill] sm:$0xff] }
 0x1ad   : > { %7438 = vmatprep.mubr.bf16.mxu1 %v4227_v46  ;;  %v2772_v46 = vsel %vm2755_vm3, %v2435_v54, 0  ;;  %v4254_v5 = vor.u32 %v4252_v49, %v4250_v39  ;;  %v4645_v55 = vshrl.u32 %v4607_v29, 16  ;;  %v4258_v41 = vrot.slane %v4256_v16, 1 }
 0x1ae   : > { %v2913_v61 = vsel %vm1513_vm7, %v2908_v57, %v2912_v47  ;;  %v2918_v28 = vshll.u32 %v2772_v46, 16  ;;  %v4606_v50 = vsel %vm10372_vm9, %v4589_v22, 0  ;;  %v2916_v17 = vor.u32 %v2914_v12, %v2912_v47  ;;  %v10376_v57 = vld [vmem:[#allocation19_spill] sm:$0xff]  ;;  %v10382_v12 = vld [vmem:[#allocation20_spill] sm:$0xff] }
 0x1af   : > { %7295 = vmatmul.mubr.bf16.gmra.mrb[52].mxu0 %v2889_v51  ;;  %v4244_v51 = vshrl.u32 %v4115_v45, 16  ;;  %v4259_v32 = vsel %vm1513_vm7, %v4254_v5, %v4258_v41  ;;  %v4641_v11 = vshrl.u32 %v4606_v50, 16  ;;  %v4647_v18 = vrot.slane %v4645_v55, 7  ;;  %v10383_v55 = vld [vmem:[#allocation22_spill] sm:$0xff]  ;;  %v8006_v50 = vld [vmem:[%s10244_s4 + $0x1c8] sm:$0xff]  }
 0x1b0   : > { %7298 = vmatprep.mubr.bf16.mxu0 %v2897_v38  ;;  %v4118_v38 = vsel %vm2755_vm3, %v4101_v27, 0  ;;  %v2920_v45 = vrot.slane %v2918_v28, 1  ;;  %vm10373_vm8 = vcmp.ne.s16.totalorder %v8363_v0, 0  ;;  %vm10375_vm2 = vcmp.ne.s16.totalorder %v10374_v8, 0  ;;  %v10388_v8 = vld [vmem:[#allocation8_spill] sm:$0xff] }
 0x1b1   : > { %v4246_v58 = vor.u32 %v4244_v51, %v4242_v52  ;;  %v4264_v42 = vshll.u32 %v4118_v38, 16  ;;  %v4608_v40 = vsel %vm10373_vm8, %v9224_v63, 0  ;;  %v4260_v52 = vshrl.u32 %v4117_v62, 16 }
 0x1b2   : > { %v4609_v44 = vsel %vm10375_vm2, %v9252_v35, 0  ;;  %v2921_v54 = vsel %vm1513_vm7, %v2916_v17, %v2920_v45  ;;  %v4643_v49 = vrot.slane %v4641_v11, 7  ;;  %v10377_v35 = vld [vmem:[#allocation18_spill] sm:$0xff]  ;;  %v4656_v22 = vshll.u32 %v4608_v40, 16  ;;  %v10385_v45 = vld [vmem:[#allocation7_spill] sm:$0xff] }
 0x1b3   : > { %v4251_v53 = vsel %vm1513_vm7, %v4246_v58, %v4250_v39  ;;  %v4262_v47 = vor.u32 %v4260_v52, %v4258_v41  ;;  %v4266_v39 = vrot.slane %v4264_v42, 1  ;;  %v4661_v46 = vshrl.u32 %v4609_v44, 16  ;;  %v10384_v42 = vld [vmem:[#allocation21_spill] sm:$0xff]  ;;  %v10387_v52 = vld [vmem:[#allocation23_spill] sm:$0xff] }
 0x1b4   : > { %7439 = vmatmul.mubr.bf16.gmra.mrb[20].mxu1 %v4235_v13  ;;  %v4648_v13 = vshll.u32 %v4607_v29, 16  ;;  %v4664_v5 = vshll.u32 %v4609_v44, 16  ;;  %vm10386_vm5 = vcmp.ne.s16.totalorder %v10385_v45, 0  ;;  %vm10389_vm6 = vcmp.ne.s16.totalorder %v10388_v8, 0 }
 0x1b5   : > { %7442 = vmatprep.mubr.bf16.mxu1 %v4243_v7  ;;  %v4653_v7 = vshrl.u32 %v4608_v40, 16  ;;  %v4267_v0 = vsel %vm1513_vm7, %v4262_v47, %v4266_v39  ;;  %v4663_v27 = vrot.slane %v4661_v46, 7  ;;  %v4612_v11 = vsel %vm10386_vm5, %v10384_v42, 0 }
 0x1b6   : > { %v4650_v16 = vor.u32 %v4648_v13, %v4647_v18  ;;  %v4613_v44 = vsel %vm10389_vm6, %v10387_v52, 0  ;;  %v4685_v47 = vshrl.u32 %v4612_v11, 16 }
 0x1b7   : > { %7299 = vmatmul.mubr.bf16.gmra.mrb[56].mxu0 %v2905_v3  ;;  %v4655_v63 = vrot.slane %v4653_v7, 7  ;;  %v10378_v3 = vld [vmem:[#allocation5_spill] sm:$0xff]  ;;  %v4666_v58 = vor.u32 %v4664_v5, %v4663_v27  ;;  %v8008_v7 = vld [vmem:[%s10244_s4 + $0x1d8] sm:$0xff]  }
 0x1b8   : > { %7302 = vmatprep.mubr.bf16.mxu0 %v2913_v61  ;;  %v4651_v62 = vsel %vm1691_vm10, %v4643_v49, %v4650_v16  ;;  %vm10379_vm4 = vcmp.ne.s16.totalorder %v10378_v3, 0  ;;  %v10380_v61 = vld [vmem:[#allocation6_spill] sm:$0xff]  ;;  %v4687_v49 = vrot.slane %v4685_v47, 7  ;;  %v4696_v3 = vshll.u32 %v4613_v44, 16 }
 0x1b9   : > { %v4610_v29 = vsel %vm10379_vm4, %v10377_v35, 0  ;;  %vm10381_vm14 = vcmp.ne.s16.totalorder %v10380_v61, 0  ;;  %v4658_v28 = vor.u32 %v4656_v22, %v4655_v63 }
 0x1ba   : > { %v4611_v51 = vsel %vm10381_vm14, %v9303_v26, 0  ;;  %v4669_v38 = vshrl.u32 %v4610_v29, 16  ;;  %v4672_v40 = vshll.u32 %v4610_v29, 16  ;;  %v10395_v29 = vld [vmem:[#allocation25_spill] sm:$0xff] }
 0x1bb   : > { %v4677_v41 = vshrl.u32 %v4611_v51, 16  ;;  %v4659_v17 = vsel %vm1691_vm10, %v4647_v18, %v4658_v28  ;;  %v8007_v18 = vld [vmem:[%s10244_s4 + $0x1d0] sm:$0xff]  }
 0x1bc   : > { %7443 = vmatmul.mubr.bf16.gmra.mrb[24].mxu1 %v4251_v53  ;;  %v4671_v53 = vrot.slane %v4669_v38, 7 }
 0x1bd   : > { %7446 = vmatprep.mubr.bf16.mxu1 %v4259_v32  ;;  %v4667_v32 = vsel %vm1691_vm10, %v4655_v63, %v4666_v58  ;;  %v4679_v26 = vrot.slane %v4677_v41, 7  ;;  %v10396_v41 = vld [vmem:[#allocation11_spill] sm:$0xff] }
 0x1be   : > { %v4674_v13 = vor.u32 %v4672_v40, %v4671_v53  ;;  %vm10397_vm15 = vcmp.ne.s16.totalorder %v10396_v41, 0  ;;  %v10401_v40 = vld [vmem:[#allocation27_spill] sm:$0xff] }
 0x1bf   : > { %7303 = vmatmul.mubr.bf16.gmra.mrb[60].mxu0 %v2921_v54  ;;  %v4680_v54 = vshll.u32 %v4611_v51, 16 }
 0x1c0   : > { %7562 = vmatprep.mubr.bf16.mxu0 %v10376_v57  ;;  %v4675_v57 = vsel %vm1691_vm10, %v4663_v27, %v4674_v13  ;;  %v8009_v27 = vld [vmem:[%s10244_s4 + $0x1e0] sm:$0xff]  }
 0x1c1   : > { %v4682_v39 = vor.u32 %v4680_v54, %v4679_v26 }
 0x1c3   : > { %v4683_v16 = vsel %vm1691_vm10, %v4671_v53, %v4682_v39  ;;  %v10399_v53 = vld [vmem:[#allocation12_spill] sm:$0xff] }
 0x1c4   : > { %7447 = vmatmul.mubr.bf16.gmra.mrb[28].mxu1 %v4267_v0  ;;  %v10391_v0 = vld [vmem:[#allocation9_spill] sm:$0xff]  ;;  %vm10400_vm12 = vcmp.ne.s16.totalorder %v10399_v53, 0  ;;  %v8039_v53 = vld [vmem:[#allocation2] sm:$0xff] }
 0x1c5   : > { %7466 = vmatprep.mubr.bf16.mxu1 %v4651_v62  ;;  %vm10392_vm11 = vcmp.ne.s16.totalorder %v10391_v0, 0  ;;  %v10393_v62 = vld [vmem:[#allocation10_spill] sm:$0xff] }
 0x1c6   : > { %vm10394_vm13 = vcmp.ne.s16.totalorder %v10393_v62, 0 }
 0x1c7   : > { %7563 = vmatmul.mubr.bf16.vlgmr.msra.gmra.mrb[64].mxu0 %v10382_v12  ;;  %v4615_v35 = vsel %vm10394_vm13, %v9375_v59, 0  ;;  %v8010_v12 = vld [vmem:[%s10244_s4 + $0x1e8] sm:$0xff]  }
 0x1c8   : > { %7566 = vmatprep.mubr.bf16.mxu0 %v10383_v55  ;;  %v4709_v5 = vshrl.u32 %v4615_v35, 16  ;;  %v4712_v42 = vshll.u32 %v4615_v35, 16 }
 0x1ca   : > { %v4711_v58 = vrot.slane %v4709_v5, 7 }
 0x1cc   : > { %7467 = vmatmul.mubr.bf16.vlgmr.msra.gmra.mrb[0].mxu1 %v4659_v17  ;;  %v10398_v17 = vld [vmem:[#allocation26_spill] sm:$0xff]  ;;  %v4714_v52 = vor.u32 %v4712_v42, %v4711_v58 }
 0x1cd   : > { %7499 = vmatpush3.bf16.msra.mxu1 %v9677_v9  ;;  %7470 = vmatprep.mubr.bf16.mxu1 %v4667_v32  ;;  %v4693_v9 = vshrl.u32 %v4613_v44, 16  ;;  %v4617_v32 = vsel %vm10400_vm12, %v10398_v17, 0  ;;  %v8012_v44 = vld [vmem:[%s10244_s4 + $0x1f8] sm:$0xff]  }
 0x1ce   : > { %7500 = vmatprep.subr.bf16.mxu1 %v8006_v50  ;;  %v4725_v8 = vshrl.u32 %v4617_v32, 16 }
 0x1cf   : > { %7567 = vmatmul.mubr.bf16.gmra.mrb[68].mxu0 %v9361_v4  ;;  %v4695_v46 = vrot.slane %v4693_v9, 7  ;;  %v10390_v4 = vld [vmem:[#allocation24_spill] sm:$0xff] }
 0x1d0   : > { %7570 = vmatprep.mubr.bf16.mxu0 %v9380_v24  ;;  %v4614_v63 = vsel %vm10392_vm11, %v10390_v4, 0  ;;  %v4688_v24 = vshll.u32 %v4612_v11, 16  ;;  %v4727_v47 = vrot.slane %v4725_v8, 7 }
 0x1d1   : > { %7501 = vmatpush3.bf16.msra.mxu1 %v8006_v50  ;;  %v4701_v61 = vshrl.u32 %v4614_v63, 16  ;;  %v4698_v51 = vor.u32 %v4696_v3, %v4695_v46  ;;  %v4616_v50 = vsel %vm10397_vm15, %v9385_v23, 0 }
 0x1d2   : > { %7502 = vmatprep.subr.bf16.mxu1 %v8007_v18  ;;  %v4690_v22 = vor.u32 %v4688_v24, %v4687_v49  ;;  %v4717_v11 = vshrl.u32 %v4616_v50, 16  ;;  %v4720_v9 = vshll.u32 %v4616_v50, 16  ;;  %v8038_v24 = vld [vmem:[%s10244_s4 + $0x200] sm:$0xff]  }
 0x1d3   : > { %v4703_v38 = vrot.slane %v4701_v61, 7  ;;  %v4699_v55 = vsel %vm1691_vm10, %v4687_v49, %v4698_v51  ;;  %v4728_v49 = vshll.u32 %v4617_v32, 16  ;;  %v10408_v61 = vld [vmem:[#allocation16_spill] sm:$0xff]  ;;  %v10410_v32 = vld [vmem:[#allocation17_spill] sm:$0xff] }
 0x1d4   : > { %7471 = vmatmul.mubr.bf16.gmra.mrb[4].mxu1 %v4675_v57  ;;  %v4691_v28 = vsel %vm1691_vm10, %v4679_v26, %v4690_v22  ;;  %v8011_v26 = vld [vmem:[%s10244_s4 + $0x1f0] sm:$0xff]   ;;  %vm10409_vm8 = vcmp.ne.s16.totalorder %v10408_v61, 0  ;;  %vm10411_vm2 = vcmp.ne.s16.totalorder %v10410_v32, 0 }
 0x1d5   : > { %7474 = vmatprep.mubr.bf16.mxu1 %v4683_v16  ;;  %7503 = vmatpush3.bf16.msra.mxu1 %v8007_v18  ;;  %v4719_v18 = vrot.slane %v4717_v11, 7  ;;  %v4715_v13 = vsel %vm1691_vm10, %v4703_v38, %v4714_v52  ;;  %v4730_v0 = vor.u32 %v4728_v49, %v4727_v47  ;;  %v4621_v51 = vsel %vm10409_vm8, %v9555_v33, 0  ;;  %v10412_v49 = vld [vmem:[#allocation28_spill] sm:$0xff] }
 0x1d6   : > { %7504 = vmatprep.subr.bf16.mxu1 %v8008_v7  ;;  %v4622_v42 = vsel %vm10411_vm2, %v8039_v53, 0 }
 0x1d7   : > { %7571 = vmatmul.mubr.bf16.gmra.mrb[72].mxu0 %v10395_v29  ;;  %v4722_v16 = vor.u32 %v4720_v9, %v4719_v18  ;;  %v4731_v3 = vsel %vm1691_vm10, %v4719_v18, %v4730_v0  ;;  %v10406_v29 = vld [vmem:[#allocation15_spill] sm:$0xff]  ;;  %v8042_v9 = vld [vmem:[#allocation2 + $0x28] sm:$0xff] }
 0x1d8   : > { %7574 = vmatprep.mubr.bf16.mxu0 %v9416_v36  ;;  %v4704_v36 = vshll.u32 %v4614_v63, 16  ;;  %vm10407_vm9 = vcmp.ne.s16.totalorder %v10406_v29, 0 }
 0x1d9   : > { %7505 = vmatpush3.bf16.msra.mxu1 %v8008_v7  ;;  %v10404_v7 = vld [vmem:[#allocation14_spill] sm:$0xff]  ;;  %v4723_v62 = vsel %vm1691_vm10, %v4711_v58, %v4722_v16  ;;  %v8045_v16 = vld [vmem:[#allocation2 + $0x40] sm:$0xff] }
 0x1da   : > { %7506 = vmatprep.subr.bf16.mxu1 %v8009_v27  ;;  %v4706_v45 = vor.u32 %v4704_v36, %v4703_v38  ;;  %vm10405_vm0 = vcmp.ne.s16.totalorder %v10404_v7, 0  ;;  %v8043_v7 = vld [vmem:[#allocation2 + $0x30] sm:$0xff] }
 0x1db   : > { %v4619_v57 = vsel %vm10405_vm0, %v9521_v10, 0 }
 0x1dc   : > { %7475 = vmatmul.mubr.bf16.gmra.mrb[8].mxu1 %v4691_v28  ;;  %v4707_v54 = vsel %vm1691_vm10, %v4695_v46, %v4706_v45  ;;  %v4741_v63 = vshrl.u32 %v4619_v57, 16  ;;  %v4744_v5 = vshll.u32 %v4619_v57, 16  ;;  %v4760_v45 = vshll.u32 %v4621_v51, 16  ;;  %v8044_v57 = vld [vmem:[#allocation2 + $0x38] sm:$0xff] }
 0x1dd   : > { %7478 = vmatprep.mubr.bf16.mxu1 %v4699_v55  ;;  %7507 = vmatpush3.bf16.msra.mxu1 %v8009_v27  ;;  %v4757_v55 = vshrl.u32 %v4621_v51, 16 }
 0x1de   : > { %7508 = vmatprep.subr.bf16.mxu1 %v8010_v12  ;;  %v4743_v27 = vrot.slane %v4741_v63, 7 }
 0x1df   : > { %7575 = vmatmul.mubr.bf16.gmra.mrb[76].mxu0 %v9433_v20  ;;  %v10402_v20 = vld [vmem:[#allocation13_spill] sm:$0xff]  ;;  %v4759_v36 = vrot.slane %v4757_v55, 7 }
 0x1e0   : > { %7578 = vmatprep.mubr.bf16.mxu0 %v10401_v40  ;;  %vm10403_vm1 = vcmp.ne.s16.totalorder %v10402_v20, 0  ;;  %v4746_v38 = vor.u32 %v4744_v5, %v4743_v27  ;;  %v4765_v40 = vshrl.u32 %v4622_v42, 16  ;;  %v8040_v20 = vld [vmem:[#allocation2 + $0x18] sm:$0xff] }
 0x1e1   : > { %7509 = vmatpush3.bf16.msra.mxu1 %v8010_v12  ;;  %v4618_v39 = vsel %vm10403_vm1, %v9490_v56, 0  ;;  %v4762_v52 = vor.u32 %v4760_v45, %v4759_v36 }
 0x1e2   : > { %7510 = vmatprep.subr.bf16.mxu1 %v8011_v26  ;;  %v4733_v46 = vshrl.u32 %v4618_v39, 16  ;;  %v4736_v22 = vshll.u32 %v4618_v39, 16  ;;  %v8041_v39 = vld [vmem:[#allocation2 + $0x20] sm:$0xff] }
 0x1e4   : > { %7479 = vmatmul.mubr.bf16.gmra.mrb[12].mxu1 %v4707_v54  ;;  %v4735_v35 = vrot.slane %v4733_v46, 7  ;;  %v4768_v54 = vshll.u32 %v4622_v42, 16  ;;  %v8046_v46 = vld [vmem:[#allocation2 + $0x48] sm:$0xff] }
 0x1e5   : > { %7482 = vmatprep.mubr.bf16.mxu1 %v4715_v13  ;;  %7511 = vmatpush3.bf16.msra.mxu1 %v8011_v26 }
 0x1e6   : > { %7512 = vmatprep.subr.bf16.mxu1 %v8012_v44  ;;  %v4738_v12 = vor.u32 %v4736_v22, %v4735_v35  ;;  %v4747_v50 = vsel %vm1691_vm10, %v4735_v35, %v4746_v38 }
 0x1e7   : > { %7579 = vmatmul.mubr.bf16.gmra.mrb[80].mxu0 %v9484_v19  ;;  %v4620_v19 = vsel %vm10407_vm9, %v9534_v21, 0 }
 0x1e8   : > { %v4749_v28 = vshrl.u32 %v4620_v19, 16  ;;  %v4739_v58 = vsel %vm1691_vm10, %v4727_v47, %v4738_v12  ;;  %v4752_v26 = vshll.u32 %v4620_v19, 16 }
 0x1e9   : > { %7513 = vmatpush3.bf16.msra.mxu1 %v8012_v44  ;;  %v4767_v44 = vrot.slane %v4765_v40, 7 }
 0x1ea   : > { %7642 = vmatprep.subr.bf16.mxu1 %v8038_v24  ;;  %v4751_v41 = vrot.slane %v4749_v28, 7 }
 0x1eb   : > { %v4770_v13 = vor.u32 %v4768_v54, %v4767_v44 }
 0x1ec   : > { %7483 = vmatmul.mubr.bf16.gmra.mrb[16].mxu1 %v4723_v62  ;;  %v4754_v11 = vor.u32 %v4752_v26, %v4751_v41  ;;  %v4763_v18 = vsel %vm1691_vm10, %v4751_v41, %v4762_v52  ;;  %v8018_v62 = vld [vmem:[%s10247_s7 + $0x28] sm:$0xff]  }
 0x1ed   : > { %7486 = vmatprep.mubr.bf16.mxu1 %v4731_v3  ;;  %v4771_v47 = vsel %vm1691_vm10, %v4759_v36, %v4770_v13  ;;  %v8019_v3 = vld [vmem:[%s10247_s7 + $0x30] sm:$0xff]  }
 0x1ee   : > { %v4755_v8 = vsel %vm1691_vm10, %v4743_v27, %v4754_v11  ;;  %v8020_v27 = vld [vmem:[%s10247_s7 + $0x38] sm:$0xff]  }
 0x1f4   : > { %7487 = vmatmul.mubr.bf16.gmra.mrb[20].mxu1 %v4739_v58 }
 0x1f5   : > { %7490 = vmatprep.mubr.bf16.mxu1 %v4747_v50 }
 0x1fc   : > { %7491 = vmatmul.mubr.bf16.gmra.mrb[24].mxu1 %v4755_v8 }
 0x1fd   : > { %7494 = vmatprep.mubr.bf16.mxu1 %v4763_v18 }
 0x204   : > { %7495 = vmatmul.mubr.bf16.gmra.mrb[28].mxu1 %v4771_v47 }
 0x205   : > { %7514 = vmatprep.mubr.bf16.mxu1 %v8040_v20 }
 0x20c   : > { %7515 = vmatmul.mubr.bf16.vlgmr.msra.gmra.mrb[0].mxu1 %v8041_v39 }
 0x20d   : > { %7650 = vmatpush3.bf16.msra.mxu1 %v8038_v24  ;;  %7518 = vmatprep.mubr.bf16.mxu1 %v8042_v9 }
 0x20e   : > { %7643 = vmatprep.subr.bf16.mxu1 %v9443_v14 }
 0x211   : > { %7651 = vmatpush3.bf16.msra.mxu1 %v9443_v14  ;;  %v8014_v14 = vld [vmem:[%s10247_s7 + $0x8] sm:$0xff]  }
 0x212   : > { %7644 = vmatprep.subr.bf16.mxu1 %v9480_v25 }
 0x214   : > { %7519 = vmatmul.mubr.bf16.gmra.mrb[4].mxu1 %v8043_v7 }
 0x215   : > { %7522 = vmatprep.mubr.bf16.mxu1 %v8044_v57  ;;  %7652 = vmatpush3.bf16.msra.mxu1 %v9480_v25  ;;  %v8016_v25 = vld [vmem:[%s10247_s7 + $0x18] sm:$0xff]  }
 0x216   : > { %7645 = vmatprep.subr.bf16.mxu1 %v10412_v49 }
 0x219   : > { %7653 = vmatpush3.bf16.msra.mxu1 %v10412_v49 }
 0x21a   : > { %7646 = vmatprep.subr.bf16.mxu1 %v9550_v2 }
 0x21c   : > { %7523 = vmatmul.mubr.bf16.gmra.mrb[8].mxu1 %v8045_v16 }
 0x21d   : > { %7526 = vmatprep.mubr.bf16.mxu1 %v8046_v46  ;;  %7654 = vmatpush3.bf16.msra.mxu1 %v9550_v2  ;;  %v5606_v2 = vshrl.u32 %v9587_v31, 16 }
 0x21e   : > { %7647 = vmatprep.subr.bf16.mxu1 %v9571_v1 }
 0x221   : > { %7655 = vmatpush3.bf16.msra.mxu1 %v9571_v1  ;;  %v5608_v1 = vor.u32 %v5606_v2, %v9611_v6  ;;  %v8017_v6 = vld [vmem:[%s10247_s7 + $0x20] sm:$0xff]  }
 0x222   : > { %7648 = vmatprep.subr.bf16.mxu1 %v9609_v48  ;;  %v9963_v2 = vld [vmem:[%s10245_s5] ss:$0 sm:$0xff] }
 0x224   : > { %7527 = vmatmul.mubr.bf16.gmra.mrb[12].mxu1 %v10390_v4 }
 0x225   : > { %7530 = vmatprep.mubr.bf16.mxu1 %v9375_v59  ;;  %7656 = vmatpush3.bf16.msra.mxu1 %v9609_v48  ;;  %v8013_v59 = vld [vmem:[%s10247_s7] sm:$0xff]  }
 0x226   : > { %7649 = vmatprep.subr.bf16.mxu1 %v9636_v60  ;;  %7594 = vmatprep.subr.bf16.mxu0 %v8013_v59 }
 0x227   : > { %7595 = vmatpush3.bf16.msra.mxu0 %v8013_v59 }
 0x228   : > { %7596 = vmatprep.subr.bf16.mxu0 %v8014_v14 }
 0x229   : > { %7657 = vmatpush3.bf16.msra.mxu1 %v9636_v60 }
 0x22b   : > { %7597 = vmatpush3.bf16.msra.mxu0 %v8014_v14 }
 0x22c   : > { %7531 = vmatmul.mubr.bf16.gmra.mrb[16].mxu1 %v9385_v23  ;;  %v8015_v23 = vld [vmem:[%s10247_s7 + $0x10] sm:$0xff]  }
 0x22d   : > { %7534 = vmatprep.mubr.bf16.mxu1 %v10398_v17  ;;  %7598 = vmatprep.subr.bf16.mxu0 %v8015_v23 }
 0x22f   : > { %7599 = vmatpush3.bf16.msra.mxu0 %v8015_v23 }
 0x230   : > { %7600 = vmatprep.subr.bf16.mxu0 %v8016_v25 }
 0x233   : > { %7601 = vmatpush3.bf16.msra.mxu0 %v8016_v25 }
 0x234   : > { %7535 = vmatmul.mubr.bf16.gmra.mrb[20].mxu1 %v9490_v56  ;;  %v10413_v56 = vld [vmem:[#allocation29_spill] sm:$0xff]  ;;  %7602 = vmatprep.subr.bf16.mxu0 %v8017_v6 }
 0x235   : > { %7538 = vmatprep.mubr.bf16.mxu1 %v9521_v10  ;;  %v5447_v10 = vld [vmem:[#allocation2 + $0x98] sm:$0x1] }
 0x237   : > { %7603 = vmatpush3.bf16.msra.mxu0 %v8017_v6 }
 0x238   : > { %7604 = vmatprep.subr.bf16.mxu0 %v8018_v62 }
 0x23b   : > { %7605 = vmatpush3.bf16.msra.mxu0 %v8018_v62  ;;  %v9970_v62 = vld [vmem:[%s10246_s6] ss:$0 sm:$0xff] }
 0x23c   : > { %7539 = vmatmul.mubr.bf16.gmra.mrb[24].mxu1 %v9534_v21  ;;  %v5464_v21 = vsel %vm2755_vm3, %v5447_v10, 0  ;;  %7606 = vmatprep.subr.bf16.mxu0 %v8019_v3 }
 0x23d   : > { %7542 = vmatprep.mubr.bf16.mxu1 %v9555_v33  ;;  %v5610_v33 = vshll.u32 %v5464_v21, 16 }
 0x23f   : > { %v5612_v48 = vrot.slane %v5610_v33, 1  ;;  %7607 = vmatpush3.bf16.msra.mxu0 %v8019_v3 }
 0x240   : > { %7608 = vmatprep.subr.bf16.mxu0 %v8020_v27 }
 0x241   : > { %v5613_v60 = vsel %vm1513_vm7, %v5608_v1, %v5612_v48  ;;  %vm10420_vm7 = vcmask 130048  }
 0x242   : > { %vm10421_vm10 = vmmov %vm10420_vm7 }
 0x243   : > { %7609 = vmatpush3.bf16.msra.mxu0 %v8020_v27  ;;  %vm10422_vm3 = vmmov %vm10420_vm7 }
 0x244   : > { %7543 = vmatmul.mubr.bf16.gmra.mrb[28].mxu1 %v8039_v53  ;;  %vm10423_vm4 = vmmov %vm10422_vm3 }
 0x245   : > { %7582 = vmatprep.mubr.bf16.mxu1 %v10413_v56  ;;  %vm10424_vm14 = vmmov %vm10422_vm3 }
 0x246   : > { %vm10425_vm5 = vmmov %vm10422_vm3 }
 0x247   : > { %vm10426_vm6 = vmmov %vm10422_vm3 }
 0x248   : > { %vm10427_vm11 = vmmov %vm10422_vm3 }
 0x249   : > { %vm10428_vm13 = vmmov %vm10422_vm3 }
 0x24a   : > { %vm10429_vm15 = vmmov %vm10422_vm3 }
 0x24b   : > { %vm10430_vm12 = vmmov %vm10422_vm3 }
 0x24c   : > { %7583 = vmatmul.mubr.bf16.vlgmr.msra.gmra.mrb[20].mxu1 %v9590_v15  ;;  %vm10431_vm1 = vmmov %vm10422_vm3 }
 0x24d   : > { %7586 = vmatprep.mubr.bf16.mxu1 %v9597_v30  ;;  %vm10432_vm0 = vmmov %vm10431_vm1 }
 0x24e   : > { %vm10433_vm9 = vmmov %vm10432_vm0 }
 0x24f   : > { %vm10434_vm8 = vmmov %vm10432_vm0 }
 0x250   : > { %vm10435_vm2 = vmmov %vm10432_vm0 }
 0x254   : > { %7587 = vmatmul.mubr.bf16.gmra.mrb[24].mxu1 %v9619_v37 }
 0x255   : > { %7590 = vmatprep.mubr.bf16.mxu1 %v9640_v34 }
 0x25a   : > { %v9859_v4 = vpop.f32.mrb[32].mxu0 }
 0x25b   : > { %v9861_v15 = vpop.f32.mrb[33].mxu0 }
 0x25c   : > { %7591 = vmatmul.mubr.bf16.gmra.mrb[28].mxu1 %v5613_v60  ;;  %v9863_v30 = vpop.f32.mrb[34].mxu0 }
 0x25d   : > { %v9865_v43 = vpop.f32.mrb[35].mxu0 }
 0x262   : > { %v9867_v31 = vpop.f32.mrb[36].mxu0 }
 0x263   : > { %v9869_v17 = vpop.f32.mrb[37].mxu0 }
 0x264   : > { %v9871_v37 = vpop.f32.mrb[38].mxu0 }
 0x265   : > { %v9873_v34 = vpop.f32.mrb[39].mxu0 }
 0x26a   : > { %v9878_v0 = vpop.f32.mrb[40].mxu0 }
 0x26b   : > { %v9880_v63 = vpop.f32.mrb[41].mxu0 }
 0x26c   : > { %v9882_v24 = vpop.f32.mrb[42].mxu0 }
 0x26d   : > { %v9887_v35 = vpop.f32.mrb[43].mxu0 }
 0x272   : > { %v9895_v29 = vpop.f32.mrb[44].mxu0 }
 0x273   : > { %v9897_v19 = vpop.f32.mrb[45].mxu0 }
 0x274   : > { %v9899_v22 = vpop.f32.mrb[46].mxu0 }
 0x275   : > { %v9901_v61 = vpop.f32.mrb[47].mxu0 }
 0x27a   : > { %v9903_v51 = vpop.f32.mrb[48].mxu0 }
 0x27b   : > { %v9905_v5 = vpop.f32.mrb[49].mxu0 }
 0x27c   : > { %v9907_v12 = vpop.f32.mrb[50].mxu0 }
 0x27d   : > { %v9909_v28 = vpop.f32.mrb[51].mxu0 }
 0x282   : > { %v9911_v38 = vpop.f32.mrb[52].mxu0 }
 0x283   : > { %v9913_v55 = vpop.f32.mrb[53].mxu0 }
 0x284   : > { %v9915_v58 = vpop.f32.mrb[54].mxu0 }
 0x285   : > { %v9917_v41 = vpop.f32.mrb[55].mxu0 }
 0x28a   : > { %v9919_v50 = vpop.f32.mrb[56].mxu0 }
 0x28b   : > { %v9921_v36 = vpop.f32.mrb[57].mxu0 }
 0x28c   : > { %v9923_v53 = vpop.f32.mrb[58].mxu0 }
 0x28d   : > { %v9925_v32 = vpop.f32.mrb[59].mxu0 }
 0x292   : > { %v9927_v42 = vpop.f32.mrb[60].mxu0 }
 0x293   : > { %v9929_v26 = vpop.f32.mrb[61].mxu0 }
 0x294   : > { %10414 = vst [vmem:[#allocation4_spill] sm:$0xff] %v9929_v26  ;;  %v9931_v45 = vpop.f32.mrb[62].mxu0 }
 0x295   : > { %10415 = vst [vmem:[#allocation19_spill] sm:$0xff] %v9931_v45  ;;  %v9933_v11 = vpop.f32.mrb[63].mxu0 }
 0x296   : > { %10416 = vst [vmem:[#allocation18_spill] sm:$0xff] %v9933_v11 }
 0x29a   : > { %v7564_v40 = vpop.f32.mrb[64].mxu0 }
 0x29b   : > { %v5712_v52 = vpop.f32.mrb[65].mxu0 }
 0x29c   : > { %v7565_v8 = vpop.f32.mrb[66].mxu0 }
 0x29d   : > { %v5715_v44 = vpop.f32.mrb[67].mxu0 }
 0x2a2   : > { %v7568_v54 = vpop.f32.mrb[68].mxu0 }
 0x2a3   : > { %v5728_v18 = vpop.f32.mrb[69].mxu0 }
 0x2a4   : > { %v7569_v13 = vpop.f32.mrb[70].mxu0 }
 0x2a5   : > { %v5731_v47 = vpop.f32.mrb[71].mxu0 }
 0x2aa   : > { %v9935_v20 = vpop.f32.mrb[72].mxu0 }
 0x2ab   : > { %v9937_v39 = vpop.f32.mrb[73].mxu0 }
 0x2ac   : > { %v9939_v9 = vpop.f32.mrb[74].mxu0 }
 0x2ad   : > { %v9941_v7 = vpop.f32.mrb[75].mxu0 }
 0x2b2   : > { %v9943_v57 = vpop.f32.mrb[76].mxu0 }
 0x2b3   : > { %v9945_v49 = vpop.f32.mrb[77].mxu0 }
 0x2b4   : > { %v9947_v16 = vpop.f32.mrb[78].mxu0 }
 0x2b5   : > { %v9949_v46 = vpop.f32.mrb[79].mxu0 }
 0x2ba   : > { %v9951_v59 = vpop.f32.mrb[80].mxu0 }
 0x2bb   : > { %v9953_v14 = vpop.f32.mrb[81].mxu0 }
 0x2bc   : > { %v9955_v23 = vpop.f32.mrb[82].mxu0 }
 0x2bd   : > { %v9957_v56 = vpop.f32.mrb[83].mxu0 }
 0x2df   : > { %v7516_v25 = vpop.f32.mrb[0].mxu1 }
 0x2e0   : > { %v7658_v10 = vadd.f32 %v7516_v25, %v9859_v4  ;;  %v5208_v21 = vpop.f32.mrb[1].mxu1 }
 0x2e1   : > { %v7660_v33 = vadd.f32 %v5208_v21, %v9861_v15  ;;  %v7517_v1 = vpop.f32.mrb[2].mxu1 }
 0x2e2   : > { %v7659_v48 = vadd.f32 %v7658_v10, %v7564_v40  ;;  %v7662_v60 = vadd.f32 %v7517_v1, %v9863_v30  ;;  %v5211_v6 = vpop.f32.mrb[3].mxu1 }
 0x2e3   : > { %v7661_v3 = vadd.f32 %v7660_v33, %v5712_v52  ;;  %v7664_v4 = vadd.f32 %v5211_v6, %v9865_v43 }
 0x2e4   : > { %v5976_v27 = vmul.f32 %v7659_v48, %v9963_v2  ;;  %v7663_v25 = vadd.f32 %v7662_v60, %v7565_v8 }
 0x2e5   : > { %v5974_v11 = vmul.f32 %v7661_v3, %v9963_v2  ;;  %v7665_v45 = vadd.f32 %v7664_v4, %v5715_v44 }
 0x2e6   : > { %v6015_v15 = vadd.f32 %v9970_v62, %v5976_v27  ;;  %v5977_v40 = vmul.f32 %v7663_v25, %v9963_v2 }
 0x2e7   : > { %v5975_v30 = vmul.f32 %v7665_v45, %v9963_v2  ;;  %v7520_v10 = vpop.f32.mrb[4].mxu1  ;;  %v6013_v21 = vadd.f32 %v9970_v62, %v5974_v11 }
 0x2e8   : > { %v6016_v1 = vadd.f32 %v9970_v62, %v5977_v40  ;;  %v7666_v52 = vadd.f32 %v7520_v10, %v9867_v31  ;;  %v5224_v43 = vpop.f32.mrb[5].mxu1  ;;  %v6047_v44 = vmax.f32 %v6015_v15, 0.0 }
 0x2e9   : > { %v7668_v33 = vadd.f32 %v5224_v43, %v9869_v17  ;;  %v7521_v8 = vpop.f32.mrb[6].mxu1  ;;  %v6014_v48 = vadd.f32 %v9970_v62, %v5975_v30  ;;  %v6045_v11 = vmax.f32 %v6013_v21, 0.0 }
 0x2ea   : > { %v6048_v60 = vmax.f32 %v6016_v1, 0.0  ;;  %v7667_v6 = vadd.f32 %v7666_v52, %v7568_v54  ;;  %v7670_v3 = vadd.f32 %v7521_v8, %v9871_v37  ;;  %v5227_v4 = vpop.f32.mrb[7].mxu1 }
 0x2eb   : > { %v7669_v45 = vadd.f32 %v7668_v33, %v5728_v18  ;;  %v7672_v27 = vadd.f32 %v5227_v4, %v9873_v34  ;;  %v6046_v25 = vmax.f32 %v6014_v48, 0.0 }
 0x2ec   : > { %v6078_v40 = vpack.c.bf16 %v6048_v60, %v6047_v44  ;;  %v5980_v31 = vmul.f32 %v7667_v6, %v9963_v2  ;;  %v7671_v10 = vadd.f32 %v7670_v3, %v7569_v13 }
 0x2ed   : > { %v5978_v17 = vmul.f32 %v7669_v45, %v9963_v2  ;;  %v7673_v43 = vadd.f32 %v7672_v27, %v5731_v47  ;;  %v6077_v26 = vpack.c.bf16 %v6046_v25, %v6045_v11 }
 0x2ee   : > { %v5981_v15 = vmul.f32 %v7671_v10, %v9963_v2  ;;  %v6019_v54 = vadd.f32 %v9970_v62, %v5980_v31 }
 0x2ef   : > { %v5979_v37 = vmul.f32 %v7673_v43, %v9963_v2  ;;  %v7524_v30 = vpop.f32.mrb[8].mxu1  ;;  %7610 = vmatprep.mubr.bf16.mxu0 %v6077_v26  ;;  %v6017_v34 = vadd.f32 %v9970_v62, %v5978_v17 }
 0x2f0   : > { %v7674_v18 = vadd.f32 %v7524_v30, %v9878_v0  ;;  %v5240_v21 = vpop.f32.mrb[9].mxu1  ;;  %7611 = vmatmul.mubr.bf16.vlgmr.msra.gmra.mrb[84].mxu0 %v6078_v40  ;;  %v6020_v13 = vadd.f32 %v9970_v62, %v5981_v15  ;;  %v6051_v44 = vmax.f32 %v6019_v54, 0.0 }
 0x2f1   : > { %v7676_v1 = vadd.f32 %v5240_v21, %v9880_v63  ;;  %v7525_v47 = vpop.f32.mrb[10].mxu1  ;;  %v6018_v52 = vadd.f32 %v9970_v62, %v5979_v37  ;;  %v6049_v6 = vmax.f32 %v6017_v34, 0.0 }
 0x2f2   : > { %v7675_v33 = vadd.f32 %v7674_v18, %v9935_v20  ;;  %v7678_v8 = vadd.f32 %v7525_v47, %v9882_v24  ;;  %v5243_v48 = vpop.f32.mrb[11].mxu1  ;;  %v6052_v26 = vmax.f32 %v6020_v13, 0.0 }
 0x2f3   : > { %v7677_v60 = vadd.f32 %v7676_v1, %v9937_v39  ;;  %v7680_v0 = vadd.f32 %v5243_v48, %v9887_v35  ;;  %v6050_v3 = vmax.f32 %v6018_v52, 0.0 }
 0x2f4   : > { %v5984_v4 = vmul.f32 %v7675_v33, %v9963_v2  ;;  %v7679_v63 = vadd.f32 %v7678_v8, %v9939_v9  ;;  %v6080_v45 = vpack.c.bf16 %v6052_v26, %v6051_v44 }
 0x2f5   : > { %v5982_v27 = vmul.f32 %v7677_v60, %v9963_v2  ;;  %v7681_v20 = vadd.f32 %v7680_v0, %v9941_v7  ;;  %v6079_v11 = vpack.c.bf16 %v6050_v3, %v6049_v6 }
 0x2f6   : > { %v5985_v24 = vmul.f32 %v7679_v63, %v9963_v2  ;;  %v6023_v25 = vadd.f32 %v9970_v62, %v5984_v4 }
 0x2f7   : > { %v5983_v39 = vmul.f32 %v7681_v20, %v9963_v2  ;;  %v7528_v40 = vpop.f32.mrb[12].mxu1  ;;  %7614 = vmatprep.mubr.bf16.mxu0 %v6079_v11  ;;  %v6021_v35 = vadd.f32 %v9970_v62, %v5982_v27 }
 0x2f8   : > { %v7682_v31 = vadd.f32 %v7528_v40, %v9895_v29  ;;  %v5256_v10 = vpop.f32.mrb[13].mxu1  ;;  %7615 = vmatmul.mubr.bf16.gmra.mrb[88].mxu0 %v6080_v45  ;;  %v6024_v9 = vadd.f32 %v9970_v62, %v5985_v24  ;;  %v6055_v30 = vmax.f32 %v6023_v25, 0.0 }
 0x2f9   : > { %v7684_v17 = vadd.f32 %v5256_v10, %v9897_v19  ;;  %v7529_v7 = vpop.f32.mrb[14].mxu1  ;;  %v6022_v43 = vadd.f32 %v9970_v62, %v5983_v39  ;;  %v6053_v21 = vmax.f32 %v6021_v35, 0.0 }
 0x2fa   : > { %v7683_v15 = vadd.f32 %v7682_v31, %v9943_v57  ;;  %v7686_v54 = vadd.f32 %v7529_v7, %v9899_v22  ;;  %v5259_v37 = vpop.f32.mrb[15].mxu1  ;;  %v6056_v34 = vmax.f32 %v6024_v9, 0.0 }
 0x2fb   : > { %v7685_v18 = vadd.f32 %v7684_v17, %v9945_v49  ;;  %v7688_v29 = vadd.f32 %v5259_v37, %v9901_v61  ;;  %v6054_v13 = vmax.f32 %v6022_v43, 0.0 }
 0x2fc   : > { %v5988_v1 = vmul.f32 %v7683_v15, %v9963_v2  ;;  %v7687_v19 = vadd.f32 %v7686_v54, %v9947_v16  ;;  %v6082_v47 = vpack.c.bf16 %v6056_v34, %v6055_v30 }
 0x2fd   : > { %v5986_v52 = vmul.f32 %v7685_v18, %v9963_v2  ;;  %v7689_v57 = vadd.f32 %v7688_v29, %v9949_v46  ;;  %v6081_v33 = vpack.c.bf16 %v6054_v13, %v6053_v21 }
 0x2fe   : > { %v5989_v22 = vmul.f32 %v7687_v19, %v9963_v2  ;;  %v6027_v8 = vadd.f32 %v9970_v62, %v5988_v1 }
 0x2ff   : > { %v5987_v49 = vmul.f32 %v7689_v57, %v9963_v2  ;;  %v7532_v48 = vpop.f32.mrb[16].mxu1  ;;  %7618 = vmatprep.mubr.bf16.mxu0 %v6081_v33  ;;  %v6025_v61 = vadd.f32 %v9970_v62, %v5986_v52 }
 0x300   : > { %v7690_v44 = vadd.f32 %v7532_v48, %v9903_v51  ;;  %v5272_v26 = vpop.f32.mrb[17].mxu1  ;;  %7619 = vmatmul.mubr.bf16.gmra.mrb[92].mxu0 %v6082_v47  ;;  %v6028_v16 = vadd.f32 %v9970_v62, %v5989_v22  ;;  %v6059_v63 = vmax.f32 %v6027_v8, 0.0 }
 0x301   : > { %v7692_v60 = vadd.f32 %v5272_v26, %v9905_v5  ;;  %v7533_v46 = vpop.f32.mrb[18].mxu1  ;;  %v6026_v0 = vadd.f32 %v9970_v62, %v5987_v49  ;;  %v6057_v20 = vmax.f32 %v6025_v61, 0.0 }
 0x302   : > { %v7691_v6 = vadd.f32 %v7690_v44, %v9951_v59  ;;  %v7694_v3 = vadd.f32 %v7533_v46, %v9907_v12  ;;  %v5275_v4 = vpop.f32.mrb[19].mxu1  ;;  %v6060_v45 = vmax.f32 %v6028_v16, 0.0 }
 0x303   : > { %v7693_v27 = vadd.f32 %v7692_v60, %v9953_v14  ;;  %v7696_v51 = vadd.f32 %v5275_v4, %v9909_v28  ;;  %v6058_v11 = vmax.f32 %v6026_v0, 0.0 }
 0x304   : > { %v5992_v24 = vmul.f32 %v7691_v6, %v9963_v2  ;;  %v7695_v5 = vadd.f32 %v7694_v3, %v9955_v23  ;;  %v6084_v25 = vpack.c.bf16 %v6060_v45, %v6059_v63 }
 0x305   : > { %v5990_v39 = vmul.f32 %v7693_v27, %v9963_v2  ;;  %v7697_v59 = vadd.f32 %v7696_v51, %v9957_v56  ;;  %v6083_v40 = vpack.c.bf16 %v6058_v11, %v6057_v20 }
 0x306   : > { %v5993_v12 = vmul.f32 %v7695_v5, %v9963_v2  ;;  %v6031_v35 = vadd.f32 %v9970_v62, %v5992_v24 }
 0x307   : > { %v5991_v14 = vmul.f32 %v7697_v59, %v9963_v2  ;;  %7622 = vmatprep.mubr.bf16.mxu0 %v6083_v40  ;;  %v6029_v28 = vadd.f32 %v9970_v62, %v5990_v39 }
 0x308   : > { %7623 = vmatmul.mubr.bf16.gmra.mrb[96].mxu0 %v6084_v25  ;;  %v6032_v31 = vadd.f32 %v9970_v62, %v5993_v12  ;;  %v6063_v10 = vmax.f32 %v6031_v35, 0.0  ;;  %v10417_v25 = vld [vmem:[#allocation4_spill] sm:$0xff]  ;;  %v10418_v12 = vld [vmem:[#allocation19_spill] sm:$0xff] }
 0x309   : > { %v6030_v23 = vadd.f32 %v9970_v62, %v5991_v14  ;;  %v6061_v17 = vmax.f32 %v6029_v28, 0.0 }
 0x30a   : > { %v6064_v9 = vmax.f32 %v6032_v31, 0.0 }
 0x30b   : > { %v6062_v7 = vmax.f32 %v6030_v23, 0.0  ;;  %v10419_v23 = vld [vmem:[#allocation18_spill] sm:$0xff] }
 0x30c   : > { %v6086_v56 = vpack.c.bf16 %v6064_v9, %v6063_v10 }
 0x30d   : > { %v6085_v43 = vpack.c.bf16 %v6062_v7, %v6061_v17 }
 0x30f   : > { %7626 = vmatprep.mubr.bf16.mxu0 %v6085_v43 }
 0x310   : > { %7627 = vmatmul.mubr.bf16.gmra.mrb[100].mxu0 %v6086_v56 }
 0x31f   : > { %v7584_v15 = vpop.f32.mrb[20].mxu1 }
 0x320   : > { %v7698_v54 = vadd.f32 %v7584_v15, %v9911_v38  ;;  %v5792_v37 = vpop.f32.mrb[21].mxu1 }
 0x321   : > { %v7699_v30 = vadd.f32 %v5792_v37, %v9913_v55  ;;  %v7585_v34 = vpop.f32.mrb[22].mxu1 }
 0x322   : > { %v5996_v18 = vmul.f32 %v7698_v54, %v9963_v2  ;;  %v7700_v29 = vadd.f32 %v7585_v34, %v9915_v58  ;;  %v5795_v21 = vpop.f32.mrb[23].mxu1 }
 0x323   : > { %v5994_v13 = vmul.f32 %v7699_v30, %v9963_v2  ;;  %v7701_v1 = vadd.f32 %v5795_v21, %v9917_v41 }
 0x324   : > { %v6035_v19 = vadd.f32 %v9970_v62, %v5996_v18  ;;  %v5997_v47 = vmul.f32 %v7700_v29, %v9963_v2 }
 0x325   : > { %v6033_v52 = vadd.f32 %v9970_v62, %v5994_v13  ;;  %v5995_v38 = vmul.f32 %v7701_v1, %v9963_v2  ;;  %v8047_v1 = vld [vmem:[%s8151_s24 + $0x8] sm:$0xff]  }
 0x326   : > { %v6036_v55 = vadd.f32 %v9970_v62, %v5997_v47  ;;  %v6067_v22 = vmax.f32 %v6035_v19, 0.0  ;;  %v6398_v19 = vunpack.c.l.bf16 %v8047_v1 }
 0x327   : > { %v6034_v57 = vadd.f32 %v9970_v62, %v5995_v38  ;;  %v7588_v33 = vpop.f32.mrb[24].mxu1  ;;  %v6065_v48 = vmax.f32 %v6033_v52, 0.0  ;;  %v8048_v52 = vld [vmem:[%s8151_s24] sm:$0xff]  }
 0x328   : > { %v6068_v58 = vmax.f32 %v6036_v55, 0.0  ;;  %v7702_v8 = vadd.f32 %v7588_v33, %v9919_v50  ;;  %v5808_v49 = vpop.f32.mrb[25].mxu1  ;;  %v6396_v38 = vunpack.c.l.bf16 %v8048_v52 }
 0x329   : > { %v6066_v41 = vmax.f32 %v6034_v57, 0.0  ;;  %v7703_v61 = vadd.f32 %v5808_v49, %v9921_v36  ;;  %v7589_v44 = vpop.f32.mrb[26].mxu1  ;;  %v6397_v49 = vunpack.c.h.bf16 %v8048_v52 }
 0x32a   : > { %v6000_v26 = vmul.f32 %v7702_v8, %v9963_v2  ;;  %v7704_v16 = vadd.f32 %v7589_v44, %v9923_v53  ;;  %v5811_v60 = vpop.f32.mrb[27].mxu1  ;;  %v6088_v46 = vpack.c.bf16 %v6068_v58, %v6067_v22  ;;  %v6399_v58 = vunpack.c.h.bf16 %v8047_v1 }
 0x32b   : > { %v5998_v0 = vmul.f32 %v7703_v61, %v9963_v2  ;;  %v7705_v6 = vadd.f32 %v5811_v60, %v9925_v32  ;;  %v6087_v3 = vpack.c.bf16 %v6066_v41, %v6065_v48 }
 0x32c   : > { %v6039_v4 = vadd.f32 %v9970_v62, %v6000_v26  ;;  %v6001_v50 = vmul.f32 %v7704_v16, %v9963_v2 }
 0x32d   : > { %v6037_v63 = vadd.f32 %v9970_v62, %v5998_v0  ;;  %v5999_v36 = vmul.f32 %v7705_v6, %v9963_v2  ;;  %7630 = vmatprep.mubr.bf16.mxu0 %v6087_v3 }
 0x32e   : > { %v6040_v45 = vadd.f32 %v9970_v62, %v6001_v50  ;;  %7631 = vmatmul.mubr.bf16.gmra.mrb[104].mxu0 %v6088_v46  ;;  %v6071_v51 = vmax.f32 %v6039_v4, 0.0 }
 0x32f   : > { %v6038_v53 = vadd.f32 %v9970_v62, %v5999_v36  ;;  %v7592_v27 = vpop.f32.mrb[28].mxu1  ;;  %v6069_v24 = vmax.f32 %v6037_v63, 0.0  ;;  %v8049_v63 = vld [vmem:[%s8151_s24 + $0x18] sm:$0xff]  }
 0x330   : > { %v6072_v20 = vmax.f32 %v6040_v45, 0.0  ;;  %v7706_v32 = vadd.f32 %v7592_v27, %v9927_v42  ;;  %v5824_v11 = vpop.f32.mrb[29].mxu1  ;;  %v6402_v36 = vunpack.c.l.bf16 %v8049_v63 }
 0x331   : > { %v6070_v5 = vmax.f32 %v6038_v53, 0.0  ;;  %v7707_v39 = vadd.f32 %v5824_v11, %v10417_v25  ;;  %v7593_v59 = vpop.f32.mrb[30].mxu1 }
 0x332   : > { %v6004_v40 = vmul.f32 %v7706_v32, %v9963_v2  ;;  %v7708_v35 = vadd.f32 %v7593_v59, %v10418_v12  ;;  %v5827_v14 = vpop.f32.mrb[31].mxu1  ;;  %v6090_v28 = vpack.c.bf16 %v6072_v20, %v6071_v51  ;;  %v8050_v51 = vld [vmem:[%s8151_s24 + $0x10] sm:$0xff]  }
 0x333   : > { %v6002_v31 = vmul.f32 %v7707_v39, %v9963_v2  ;;  %v7709_v10 = vadd.f32 %v5827_v14, %v10419_v23  ;;  %v6089_v9 = vpack.c.bf16 %v6070_v5, %v6069_v24  ;;  %v6400_v20 = vunpack.c.l.bf16 %v8050_v51 }
 0x334   : > { %v6043_v17 = vadd.f32 %v9970_v62, %v6004_v40  ;;  %v6005_v42 = vmul.f32 %v7708_v35, %v9963_v2  ;;  %v6403_v5 = vunpack.c.h.bf16 %v8049_v63  ;;  %v6401_v40 = vunpack.c.h.bf16 %v8050_v51 }
 0x335   : > { %v6041_v7 = vadd.f32 %v9970_v62, %v6002_v31  ;;  %v6003_v56 = vmul.f32 %v7709_v10, %v9963_v2  ;;  %7634 = vmatprep.mubr.bf16.mxu0 %v6089_v9  ;;  %v10080_v2 = vld [vmem:[%s10248_s8] ss:$0 sm:$0xff] }
 0x336   : > { %v6044_v43 = vadd.f32 %v9970_v62, %v6005_v42  ;;  %7635 = vmatmul.mubr.bf16.gmra.mrb[108].mxu0 %v6090_v28  ;;  %v6075_v54 = vmax.f32 %v6043_v17, 0.0 }
 0x337   : > { %v6042_v15 = vadd.f32 %v9970_v62, %v6003_v56  ;;  %v6073_v30 = vmax.f32 %v6041_v7, 0.0  ;;  %v10085_v62 = vld [vmem:[%s10249_s9] ss:$0 sm:$0xff]  ;;  %v8051_v56 = vld [vmem:[%s8151_s24 + $0x28] sm:$0xff]  }
 0x338   : > { %v6076_v37 = vmax.f32 %v6044_v43, 0.0  ;;  %v6406_v43 = vunpack.c.l.bf16 %v8051_v56 }
 0x339   : > { %v6074_v34 = vmax.f32 %v6042_v15, 0.0 }
 0x33a   : > { %v6092_v18 = vpack.c.bf16 %v6076_v37, %v6075_v54 }
 0x33b   : > { %v6091_v29 = vpack.c.bf16 %v6074_v34, %v6073_v30  ;;  %v8052_v30 = vld [vmem:[%s8151_s24 + $0x20] sm:$0xff]  }
 0x33c   : > { %v6404_v34 = vunpack.c.l.bf16 %v8052_v30  ;;  %v6405_v52 = vunpack.c.h.bf16 %v8052_v30 }
 0x33d   : > { %7638 = vmatprep.mubr.bf16.mxu0 %v6091_v29 }
 0x33e   : > { %7639 = vmatmul.mubr.bf16.gmra.mrb[112].mxu0 %v6092_v18 }
 0x3c3   : > { %v7612_v21 = vpop.f32.mrb[84].mxu0 }
 0x3c4   : > { %v6327_v13 = vmul.f32 %v7612_v21, %v10080_v2  ;;  %v6191_v47 = vpop.f32.mrb[85].mxu0 }
 0x3c5   : > { %v6325_v55 = vmul.f32 %v10080_v2, %v6191_v47  ;;  %v7613_v57 = vpop.f32.mrb[86].mxu0 }
 0x3c6   : > { %v6366_v33 = vadd.f32 %v10085_v62, %v6327_v13  ;;  %v6328_v22 = vmul.f32 %v7613_v57, %v10080_v2  ;;  %v6194_v8 = vpop.f32.mrb[87].mxu0  ;;  %v6407_v13 = vunpack.c.h.bf16 %v8051_v56 }
 0x3c7   : > { %v6364_v48 = vadd.f32 %v10085_v62, %v6325_v55  ;;  %v6326_v41 = vmul.f32 %v10080_v2, %v6194_v8 }
 0x3c8   : > { %v6430_v61 = vadd.f32 %v6398_v19, %v6366_v33  ;;  %v6367_v44 = vadd.f32 %v10085_v62, %v6328_v22 }
 0x3c9   : > { %v6428_v26 = vadd.f32 %v6396_v38, %v6364_v48  ;;  %v6365_v16 = vadd.f32 %v10085_v62, %v6326_v41 }
 0x3ca   : > { %v6462_v60 = vmax.f32 %v6430_v61, 0.0  ;;  %v6431_v46 = vadd.f32 %v6399_v58, %v6367_v44  ;;  %v8053_v44 = vld [vmem:[%s8151_s24 + $0x38] sm:$0xff]  }
 0x3cb   : > { %v6460_v0 = vmax.f32 %v6428_v26, 0.0  ;;  %v6429_v6 = vadd.f32 %v6397_v49, %v6365_v16  ;;  %v7616_v3 = vpop.f32.mrb[88].mxu0  ;;  %v6410_v26 = vunpack.c.l.bf16 %v8053_v44  ;;  %v6411_v63 = vunpack.c.h.bf16 %v8053_v44 }
 0x3cc   : > { %6494 = vst.msk [vmem:[%s10100_s28 + $0x10] sm:$0xff] %vm10420_vm7, %v6462_v60  ;;  %v6463_v4 = vmax.f32 %v6431_v46, 0.0  ;;  %v6331_v50 = vmul.f32 %v7616_v3, %v10080_v2  ;;  %v6207_v45 = vpop.f32.mrb[89].mxu0  ;;  %vm10436_vm7 = vmmov %vm10432_vm0 }
 0x3cd   : > { %6492 = vst.msk [vmem:[%s10100_s28] sm:$0xff] %vm10421_vm10, %v6460_v0  ;;  %v6461_v53 = vmax.f32 %v6429_v6, 0.0  ;;  %v6329_v27 = vmul.f32 %v10080_v2, %v6207_v45  ;;  %v7617_v32 = vpop.f32.mrb[90].mxu0  ;;  %v8054_v0 = vld [vmem:[%s8151_s24 + $0x30] sm:$0xff]   ;;  %vm10437_vm10 = vmmov %vm10432_vm0 }
 0x3ce   : > { %6495 = vst.msk [vmem:[%s10100_s28 + $0x18] sm:$0xff] %vm10422_vm3, %v6463_v4  ;;  %v6370_v11 = vadd.f32 %v10085_v62, %v6331_v50  ;;  %v6332_v24 = vmul.f32 %v7617_v32, %v10080_v2  ;;  %v6210_v25 = vpop.f32.mrb[91].mxu0  ;;  %v6408_v6 = vunpack.c.l.bf16 %v8054_v0  ;;  %vm10438_vm3 = vmmov %vm10432_vm0 }
 0x3cf   : > { %6493 = vst.msk [vmem:[%s10100_s28 + $0x8] sm:$0xff] %vm10423_vm4, %v6461_v53  ;;  %v6368_v39 = vadd.f32 %v10085_v62, %v6329_v27  ;;  %v6330_v59 = vmul.f32 %v10080_v2, %v6210_v25  ;;  %v6409_v27 = vunpack.c.h.bf16 %v8054_v0  ;;  %vm10439_vm4 = vmmov %vm10432_vm0 }
 0x3d0   : > { %v6434_v12 = vadd.f32 %v6402_v36, %v6370_v11  ;;  %v6371_v35 = vadd.f32 %v10085_v62, %v6332_v24 }
 0x3d1   : > { %v6432_v14 = vadd.f32 %v6400_v20, %v6368_v39  ;;  %v6369_v28 = vadd.f32 %v10085_v62, %v6330_v59 }
 0x3d2   : > { %v6466_v31 = vmax.f32 %v6434_v12, 0.0  ;;  %v6435_v23 = vadd.f32 %v6403_v5, %v6371_v35  ;;  %v8055_v35 = vld [vmem:[%s8151_s24 + $0x48] sm:$0xff]  }
 0x3d3   : > { %v6464_v10 = vmax.f32 %v6432_v14, 0.0  ;;  %v6433_v9 = vadd.f32 %v6401_v40, %v6369_v28  ;;  %v7620_v17 = vpop.f32.mrb[92].mxu0  ;;  %v6414_v14 = vunpack.c.l.bf16 %v8055_v35  ;;  %v6415_v56 = vunpack.c.h.bf16 %v8055_v35 }
 0x3d4   : > { %6498 = vst.msk [vmem:[%s10100_s28 + $0x30] sm:$0xff] %vm10424_vm14, %v6466_v31  ;;  %v6467_v42 = vmax.f32 %v6435_v23, 0.0  ;;  %v6335_v7 = vmul.f32 %v7620_v17, %v10080_v2  ;;  %v6223_v15 = vpop.f32.mrb[93].mxu0  ;;  %vm10440_vm14 = vmmov %vm10432_vm0 }
 0x3d5   : > { %6496 = vst.msk [vmem:[%s10100_s28 + $0x20] sm:$0xff] %vm10425_vm5, %v6464_v10  ;;  %v6465_v54 = vmax.f32 %v6433_v9, 0.0  ;;  %v6333_v37 = vmul.f32 %v10080_v2, %v6223_v15  ;;  %v7621_v18 = vpop.f32.mrb[94].mxu0  ;;  %v8056_v10 = vld [vmem:[%s8151_s24 + $0x40] sm:$0xff]   ;;  %vm10441_vm5 = vmmov %vm10432_vm0 }
 0x3d6   : > { %6499 = vst.msk [vmem:[%s10100_s28 + $0x38] sm:$0xff] %vm10426_vm6, %v6467_v42  ;;  %v6374_v29 = vadd.f32 %v10085_v62, %v6335_v7  ;;  %v6336_v21 = vmul.f32 %v7621_v18, %v10080_v2  ;;  %v6226_v1 = vpop.f32.mrb[95].mxu0  ;;  %v6412_v9 = vunpack.c.l.bf16 %v8056_v10  ;;  %vm10442_vm6 = vmmov %vm10432_vm0 }
 0x3d7   : > { %6497 = vst.msk [vmem:[%s10100_s28 + $0x28] sm:$0xff] %vm10427_vm11, %v6465_v54  ;;  %v6372_v19 = vadd.f32 %v10085_v62, %v6333_v37  ;;  %v6334_v47 = vmul.f32 %v10080_v2, %v6226_v1  ;;  %v6413_v37 = vunpack.c.h.bf16 %v8056_v10  ;;  %vm10443_vm11 = vmmov %vm10432_vm0 }
 0x3d8   : > { %v6438_v38 = vadd.f32 %v6406_v43, %v6374_v29  ;;  %v6375_v55 = vadd.f32 %v10085_v62, %v6336_v21 }
 0x3d9   : > { %v6436_v57 = vadd.f32 %v6404_v34, %v6372_v19  ;;  %v6373_v33 = vadd.f32 %v10085_v62, %v6334_v47 }
 0x3da   : > { %v6470_v22 = vmax.f32 %v6438_v38, 0.0  ;;  %v6439_v58 = vadd.f32 %v6407_v13, %v6375_v55 }
 0x3db   : > { %v6468_v8 = vmax.f32 %v6436_v57, 0.0  ;;  %v6437_v49 = vadd.f32 %v6405_v52, %v6373_v33  ;;  %v7624_v48 = vpop.f32.mrb[96].mxu0  ;;  %v8057_v57 = vld [vmem:[%s8151_s24 + $0x58] sm:$0xff]  }
 0x3dc   : > { %6502 = vst.msk [vmem:[%s10100_s28 + $0x50] sm:$0xff] %vm10428_vm13, %v6470_v22  ;;  %v6471_v41 = vmax.f32 %v6439_v58, 0.0  ;;  %v6339_v61 = vmul.f32 %v7624_v48, %v10080_v2  ;;  %v6239_v16 = vpop.f32.mrb[97].mxu0  ;;  %v6418_v33 = vunpack.c.l.bf16 %v8057_v57  ;;  %v6419_v44 = vunpack.c.h.bf16 %v8057_v57  ;;  %vm10444_vm13 = vmmov %vm10432_vm0 }
 0x3dd   : > { %6500 = vst.msk [vmem:[%s10100_s28 + $0x40] sm:$0xff] %vm10429_vm15, %v6468_v8  ;;  %v6469_v60 = vmax.f32 %v6437_v49, 0.0  ;;  %v6337_v46 = vmul.f32 %v10080_v2, %v6239_v16  ;;  %v7625_v3 = vpop.f32.mrb[98].mxu0  ;;  %v8058_v8 = vld [vmem:[%s8151_s24 + $0x50] sm:$0xff]   ;;  %vm10445_vm15 = vmmov %vm10432_vm0 }
 0x3de   : > { %6503 = vst.msk [vmem:[%s10100_s28 + $0x58] sm:$0xff] %vm10430_vm12, %v6471_v41  ;;  %v6378_v4 = vadd.f32 %v10085_v62, %v6339_v61  ;;  %v6340_v50 = vmul.f32 %v7625_v3, %v10080_v2  ;;  %v6242_v36 = vpop.f32.mrb[99].mxu0  ;;  %v6416_v49 = vunpack.c.l.bf16 %v8058_v8  ;;  %vm10446_vm12 = vmmov %vm10432_vm0 }
 0x3df   : > { %6501 = vst.msk [vmem:[%s10100_s28 + $0x48] sm:$0xff] %vm10431_vm1, %v6469_v60  ;;  %v6376_v45 = vadd.f32 %v10085_v62, %v6337_v46  ;;  %v6338_v53 = vmul.f32 %v10080_v2, %v6242_v36  ;;  %v6417_v46 = vunpack.c.h.bf16 %v8058_v8  ;;  %vm10447_vm1 = vmmov %vm10432_vm0 }
 0x3e0   : > { %v6442_v51 = vadd.f32 %v6410_v26, %v6378_v4  ;;  %v6379_v20 = vadd.f32 %v10085_v62, %v6340_v50 }
 0x3e1   : > { %v6440_v32 = vadd.f32 %v6408_v6, %v6376_v45  ;;  %v6377_v11 = vadd.f32 %v10085_v62, %v6338_v53 }
 0x3e2   : > { %v6474_v24 = vmax.f32 %v6442_v51, 0.0  ;;  %v6443_v5 = vadd.f32 %v6411_v63, %v6379_v20  ;;  %v8059_v20 = vld [vmem:[%s8151_s24 + $0x68] sm:$0xff]  }
 0x3e3   : > { %v6472_v25 = vmax.f32 %v6440_v32, 0.0  ;;  %v6441_v39 = vadd.f32 %v6409_v27, %v6377_v11  ;;  %v7628_v59 = vpop.f32.mrb[100].mxu0  ;;  %v6422_v32 = vunpack.c.l.bf16 %v8059_v20  ;;  %v6423_v35 = vunpack.c.h.bf16 %v8059_v20 }
 0x3e4   : > { %6506 = vst.msk [vmem:[%s10100_s28 + $0x70] sm:$0xff] %vm10432_vm0, %v6474_v24  ;;  %v6475_v40 = vmax.f32 %v6443_v5, 0.0  ;;  %v6343_v12 = vmul.f32 %v7628_v59, %v10080_v2  ;;  %v6255_v28 = vpop.f32.mrb[101].mxu0 }
 0x3e5   : > { %6504 = vst.msk [vmem:[%s10100_s28 + $0x60] sm:$0xff] %vm10433_vm9, %v6472_v25  ;;  %v6473_v31 = vmax.f32 %v6441_v39, 0.0  ;;  %v6341_v23 = vmul.f32 %v10080_v2, %v6255_v28  ;;  %v7629_v17 = vpop.f32.mrb[102].mxu0  ;;  %v8060_v25 = vld [vmem:[%s8151_s24 + $0x60] sm:$0xff]   ;;  %vm10448_vm9 = vmmov %vm10432_vm0 }
 0x3e6   : > { %6507 = vst.msk [vmem:[%s10100_s28 + $0x78] sm:$0xff] %vm10434_vm8, %v6475_v40  ;;  %v6382_v42 = vadd.f32 %v10085_v62, %v6343_v12  ;;  %v6344_v7 = vmul.f32 %v7629_v17, %v10080_v2  ;;  %v6258_v43 = vpop.f32.mrb[103].mxu0  ;;  %v6420_v39 = vunpack.c.l.bf16 %v8060_v25  ;;  %vm10449_vm8 = vmmov %vm10432_vm0 }
 0x3e7   : > { %6505 = vst.msk [vmem:[%s10100_s28 + $0x68] sm:$0xff] %vm10435_vm2, %v6473_v31  ;;  %v6380_v15 = vadd.f32 %v10085_v62, %v6341_v23  ;;  %v6342_v54 = vmul.f32 %v10080_v2, %v6258_v43  ;;  %v6421_v23 = vunpack.c.h.bf16 %v8060_v25  ;;  %vm10450_vm2 = vmmov %vm10432_vm0 }
 0x3e8   : > { %v6446_v30 = vadd.f32 %v6414_v14, %v6382_v42  ;;  %v6383_v34 = vadd.f32 %v10085_v62, %v6344_v7 }
 0x3e9   : > { %v6444_v18 = vadd.f32 %v6412_v9, %v6380_v15  ;;  %v6381_v29 = vadd.f32 %v10085_v62, %v6342_v54 }
 0x3ea   : > { %v6478_v21 = vmax.f32 %v6446_v30, 0.0  ;;  %v6447_v13 = vadd.f32 %v6415_v56, %v6383_v34  ;;  %v8061_v34 = vld [vmem:[%s8151_s24 + $0x78] sm:$0xff]  }
 0x3eb   : > { %v6476_v1 = vmax.f32 %v6444_v18, 0.0  ;;  %v6445_v19 = vadd.f32 %v6413_v37, %v6381_v29  ;;  %v6426_v18 = vunpack.c.l.bf16 %v8061_v34 }
 0x3ec   : > { %6510 = vst.msk [vmem:[%s10100_s28 + $0x90] sm:$0xff] %vm10436_vm7, %v6478_v21  ;;  %v6479_v47 = vmax.f32 %v6447_v13, 0.0 }
 0x3ed   : > { %6508 = vst.msk [vmem:[%s10100_s28 + $0x80] sm:$0xff] %vm10437_vm10, %v6476_v1  ;;  %v6477_v52 = vmax.f32 %v6445_v19, 0.0  ;;  %v8062_v1 = vld [vmem:[%s8151_s24 + $0x70] sm:$0xff]  }
 0x3ee   : > { %6511 = vst.msk [vmem:[%s10100_s28 + $0x98] sm:$0xff] %vm10438_vm3, %v6479_v47  ;;  %v6424_v19 = vunpack.c.l.bf16 %v8062_v1 }
 0x3ef   : > { %6509 = vst.msk [vmem:[%s10100_s28 + $0x88] sm:$0xff] %vm10439_vm4, %v6477_v52 }
 0x401   : > { %v7632_v38 = vpop.f32.mrb[104].mxu0 }
 0x402   : > { %v6347_v55 = vmul.f32 %v7632_v38, %v10080_v2  ;;  %v6271_v22 = vpop.f32.mrb[105].mxu0 }
 0x403   : > { %v6345_v58 = vmul.f32 %v10080_v2, %v6271_v22  ;;  %v7633_v48 = vpop.f32.mrb[106].mxu0 }
 0x404   : > { %v6386_v41 = vadd.f32 %v10085_v62, %v6347_v55  ;;  %v6348_v61 = vmul.f32 %v7633_v48, %v10080_v2  ;;  %v6274_v26 = vpop.f32.mrb[107].mxu0  ;;  %v6427_v55 = vunpack.c.h.bf16 %v8061_v34 }
 0x405   : > { %v6384_v16 = vadd.f32 %v10085_v62, %v6345_v58  ;;  %v6346_v60 = vmul.f32 %v10080_v2, %v6274_v26  ;;  %v6425_v58 = vunpack.c.h.bf16 %v8062_v1 }
 0x406   : > { %v6450_v0 = vadd.f32 %v6418_v33, %v6386_v41  ;;  %v6387_v6 = vadd.f32 %v10085_v62, %v6348_v61 }
 0x407   : > { %v6448_v3 = vadd.f32 %v6416_v49, %v6384_v16  ;;  %v6385_v4 = vadd.f32 %v10085_v62, %v6346_v60 }
 0x408   : > { %v6482_v50 = vmax.f32 %v6450_v0, 0.0  ;;  %v6451_v63 = vadd.f32 %v6419_v44, %v6387_v6 }
 0x409   : > { %v6480_v36 = vmax.f32 %v6448_v3, 0.0  ;;  %v6449_v45 = vadd.f32 %v6417_v46, %v6385_v4  ;;  %v7636_v53 = vpop.f32.mrb[108].mxu0 }
 0x40a   : > { %6514 = vst.msk [vmem:[%s10100_s28 + $0xb0] sm:$0xff] %vm10440_vm14, %v6482_v50  ;;  %v6483_v27 = vmax.f32 %v6451_v63, 0.0  ;;  %v6351_v51 = vmul.f32 %v7636_v53, %v10080_v2  ;;  %v6287_v11 = vpop.f32.mrb[109].mxu0 }
 0x40b   : > { %6512 = vst.msk [vmem:[%s10100_s28 + $0xa0] sm:$0xff] %vm10441_vm5, %v6480_v36  ;;  %v6481_v24 = vmax.f32 %v6449_v45, 0.0  ;;  %v6349_v5 = vmul.f32 %v10080_v2, %v6287_v11  ;;  %v7637_v59 = vpop.f32.mrb[110].mxu0 }
 0x40c   : > { %6515 = vst.msk [vmem:[%s10100_s28 + $0xb8] sm:$0xff] %vm10442_vm6, %v6483_v27  ;;  %v6390_v40 = vadd.f32 %v10085_v62, %v6351_v51  ;;  %v6352_v12 = vmul.f32 %v7637_v59, %v10080_v2  ;;  %v6290_v14 = vpop.f32.mrb[111].mxu0 }
 0x40d   : > { %6513 = vst.msk [vmem:[%s10100_s28 + $0xa8] sm:$0xff] %vm10443_vm11, %v6481_v24  ;;  %v6388_v28 = vadd.f32 %v10085_v62, %v6349_v5  ;;  %v6350_v31 = vmul.f32 %v10080_v2, %v6290_v14 }
 0x40e   : > { %v6454_v10 = vadd.f32 %v6422_v32, %v6390_v40  ;;  %v6391_v9 = vadd.f32 %v10085_v62, %v6352_v12 }
 0x40f   : > { %v6452_v17 = vadd.f32 %v6420_v39, %v6388_v28  ;;  %v6389_v42 = vadd.f32 %v10085_v62, %v6350_v31 }
 0x410   : > { %v6486_v7 = vmax.f32 %v6454_v10, 0.0  ;;  %v6455_v56 = vadd.f32 %v6423_v35, %v6391_v9 }
 0x411   : > { %v6484_v43 = vmax.f32 %v6452_v17, 0.0  ;;  %v6453_v15 = vadd.f32 %v6421_v23, %v6389_v42  ;;  %v7640_v54 = vpop.f32.mrb[112].mxu0 }
 0x412   : > { %6518 = vst.msk [vmem:[%s10100_s28 + $0xd0] sm:$0xff] %vm10444_vm13, %v6486_v7  ;;  %v6487_v37 = vmax.f32 %v6455_v56, 0.0  ;;  %v6355_v30 = vmul.f32 %v7640_v54, %v10080_v2  ;;  %v6303_v29 = vpop.f32.mrb[113].mxu0 }
 0x413   : > { %6516 = vst.msk [vmem:[%s10100_s28 + $0xc0] sm:$0xff] %vm10445_vm15, %v6484_v43  ;;  %v6485_v21 = vmax.f32 %v6453_v15, 0.0  ;;  %v6353_v13 = vmul.f32 %v10080_v2, %v6303_v29  ;;  %v7641_v47 = vpop.f32.mrb[114].mxu0 }
 0x414   : > { %6519 = vst.msk [vmem:[%s10100_s28 + $0xd8] sm:$0xff] %vm10446_vm12, %v6487_v37  ;;  %v6394_v52 = vadd.f32 %v10085_v62, %v6355_v30  ;;  %v6356_v38 = vmul.f32 %v7641_v47, %v10080_v2  ;;  %v6306_v57 = vpop.f32.mrb[115].mxu0 }
 0x415   : > { %6517 = vst.msk [vmem:[%s10100_s28 + $0xc8] sm:$0xff] %vm10447_vm1, %v6485_v21  ;;  %v6392_v33 = vadd.f32 %v10085_v62, %v6353_v13  ;;  %v6354_v22 = vmul.f32 %v10080_v2, %v6306_v57 }
 0x416   : > { %v6458_v8 = vadd.f32 %v6426_v18, %v6394_v52  ;;  %v6395_v49 = vadd.f32 %v10085_v62, %v6356_v38 }
 0x417   : > { %v6456_v48 = vadd.f32 %v6424_v19, %v6392_v33  ;;  %v6393_v41 = vadd.f32 %v10085_v62, %v6354_v22 }
 0x418   : > { %v6490_v61 = vmax.f32 %v6458_v8, 0.0  ;;  %v6459_v44 = vadd.f32 %v6427_v55, %v6395_v49 }
 0x419   : > { %v6488_v26 = vmax.f32 %v6456_v48, 0.0  ;;  %v6457_v16 = vadd.f32 %v6425_v58, %v6393_v41 }
 0x41a   : > { %6522 = vst.msk [vmem:[%s10100_s28 + $0xf0] sm:$0xff] %vm10432_vm0, %v6490_v61  ;;  %v6491_v60 = vmax.f32 %v6459_v44, 0.0 }
 0x41b   : > { %6520 = vst.msk [vmem:[%s10100_s28 + $0xe0] sm:$0xff] %vm10448_vm9, %v6488_v26  ;;  %v6489_v46 = vmax.f32 %v6457_v16, 0.0 }
 0x41c   : > { %6523 = vst.msk [vmem:[%s10100_s28 + $0xf8] sm:$0xff] %vm10449_vm8, %v6491_v60 }
 0x41d   : > { %6521 = vst.msk [vmem:[%s10100_s28 + $0xe8] sm:$0xff] %vm10450_vm2, %v6489_v46 }
 0x41e PF: > { %s20_s13 = sadd.s32 1, %s8069_s13  }
 0x41f   : > { %p17_p4 = scmp.ge.s32.totalorder %s20_s13, 10  }
 0x421   :  { %19 = sbr.rel (!%p17_p4) target bundleno = 1 (0x1), region = 98 }

</bundles_post_ra>
